<compile_context>
chip_gen: v7x
topology: tpu7x:2x2x1
jax: 0.10.0
libtpu: 0.0.40
codegen_flags: <defaults>
</compile_context>

<pallas_src>
import jax
import jax.numpy as jnp
from jax.experimental import pallas as pl
from jax.experimental.pallas import tpu as pltpu

CHANNELS = 1
IMG_SIZE = 32
LATENT_DIM = 100
N_CLASSES = 26
IMG_PROD = CHANNELS * IMG_SIZE * IMG_SIZE  # 1024
IN_FEAT = LATENT_DIM + N_CLASSES           # 126
PAD = 128                                  # lane-aligned width for layer-1 operands
BN_EPS = 0.8                               # nn.BatchNorm1d(out_feat, 0.8) -> eps=0.8


def _leaky_relu(x, slope=0.2):
    return jnp.where(x > 0, x, slope * x)


def generator_kernel(
    labels_ref, noise_ref,                     # (B,1) i32, (B,100) f32
    t_ref, w1n_ref, b1_ref,                    # folded emb@w1[:26] table, noise half, bias
    w2_ref, b2_ref, g2_ref, be2_ref,           # 128->256 + BN params
    w3_ref, b3_ref, g3_ref, be3_ref,           # 256->512 + BN params
    w4_ref, b4_ref, g4_ref, be4_ref,           # 512->1024 + BN params
    w5_ref, b5_ref,                            # 1024->1024
    out_ref,                                   # (B, 1024) f32
):
    B = noise_ref.shape[0]

    # Exact one-hot row-select of the folded embedding/layer-1 table (bf16 MXU).
    labels = labels_ref[...]                                        # (B, 1) int32
    iota = jax.lax.broadcasted_iota(jnp.int32, (B, PAD), 1)
    onehot = (labels == iota).astype(jnp.bfloat16)                  # (B, 128), exact 0/1

    # Pad noise 100 -> 128 lanes in-kernel (w1n rows >= 100 are zero).
    noise_p = jnp.concatenate(
        [noise_ref[...], jnp.zeros((B, PAD - LATENT_DIM), jnp.float32)], axis=1)

    # Layer 1: Linear(126->128) as (onehot @ T) + (noise_pad @ w1n) + b1, LeakyReLU.
    h = (
        jnp.dot(onehot, t_ref[...], preferred_element_type=jnp.float32)
        + jnp.dot(noise_p.astype(jnp.bfloat16), w1n_ref[...],
                  preferred_element_type=jnp.float32)
        + b1_ref[...]
    )
    h = _leaky_relu(h)

    def bn_block(h, w, b, g, be):
        # Linear (bf16 weights, f32 accumulate) -> BatchNorm1d (training-mode
        # biased batch stats, two-pass variance, eps=0.8) -> LeakyReLU.
        z = jnp.dot(h.astype(jnp.bfloat16), w,
                    preferred_element_type=jnp.float32) + b
        mean = jnp.mean(z, axis=0, keepdims=True)
        d = z - mean
        var = jnp.mean(d * d, axis=0, keepdims=True)
        zn = d * jax.lax.rsqrt(var + BN_EPS)
        return _leaky_relu(zn * g + be)

    h = bn_block(h, w2_ref[...], b2_ref[...], g2_ref[...], be2_ref[...])
    h = bn_block(h, w3_ref[...], b3_ref[...], g3_ref[...], be3_ref[...])
    h = bn_block(h, w4_ref[...], b4_ref[...], g4_ref[...], be4_ref[...])

    out = jnp.dot(h.astype(jnp.bfloat16), w5_ref[...],
                  preferred_element_type=jnp.float32) + b5_ref[...]
    out_ref[...] = jnp.tanh(out)


def init_params(key):
    """Deterministic synthetic parameters (shapes/layout match the PyTorch module)."""
    ks = jax.random.split(key, 16)

    def lin(kw, kb, fan_in, fan_out):
        bound = 1.0 / jnp.sqrt(fan_in)
        w = jax.random.uniform(kw, (fan_in, fan_out), jnp.float32, -bound, bound)
        b = jax.random.uniform(kb, (1, fan_out), jnp.float32, -bound, bound)
        return w, b

    params = {}
    params["emb"] = jax.random.normal(ks[0], (N_CLASSES, N_CLASSES), jnp.float32)
    params["w1"], params["b1"] = lin(ks[1], ks[2], IN_FEAT, 128)
    params["w2"], params["b2"] = lin(ks[3], ks[4], 128, 256)
    params["w3"], params["b3"] = lin(ks[5], ks[6], 256, 512)
    params["w4"], params["b4"] = lin(ks[7], ks[8], 512, 1024)
    params["w5"], params["b5"] = lin(ks[9], ks[10], 1024, IMG_PROD)
    # BatchNorm affine params (PyTorch default init: gamma=1, beta=0)
    for name, dim in (("2", 256), ("3", 512), ("4", 1024)):
        params["g" + name] = jnp.ones((1, dim), jnp.float32)
        params["be" + name] = jnp.zeros((1, dim), jnp.float32)
    return params


def prepare_params(params):
    """One-time transform into the kernel layout:
       * fold the embedding table into layer 1: T = emb @ w1[:26] (f32 matmul,
         then one bf16 rounding), zero-padded to (128, 128),
       * zero-pad the noise half of w1 to (128, 128),
       * store all linear weights in bfloat16 (halves HBM weight traffic)."""
    w1 = params["w1"]                                               # (126, 128)
    t = jnp.zeros((PAD, 128), jnp.float32).at[:N_CLASSES].set(
        params["emb"] @ w1[:N_CLASSES])
    w1n = jnp.zeros((PAD, 128), jnp.float32).at[:LATENT_DIM].set(w1[N_CLASSES:])

    kp = {
        "t": t.astype(jnp.bfloat16),
        "w1n": w1n.astype(jnp.bfloat16),
        "b1": params["b1"],
        "w5": params["w5"].astype(jnp.bfloat16),
        "b5": params["b5"],
    }
    for i in ("2", "3", "4"):
        kp["w" + i] = params["w" + i].astype(jnp.bfloat16)
        kp["b" + i] = params["b" + i]
        kp["g" + i] = params["g" + i]
        kp["be" + i] = params["be" + i]
    return kp


@jax.jit
def generator_forward(kparams, noise, labels2d):
    """noise: (B, 100) f32, labels2d: (B, 1) int32 -> img (B, 1, 32, 32) f32."""
    B = noise.shape[0]
    assert B % 8 == 0, "batch must be a multiple of 8 (f32 sublane / BN stats)"

    inputs = (
        labels2d, noise,
        kparams["t"], kparams["w1n"], kparams["b1"],
        kparams["w2"], kparams["b2"], kparams["g2"], kparams["be2"],
        kparams["w3"], kparams["b3"], kparams["g3"], kparams["be3"],
        kparams["w4"], kparams["b4"], kparams["g4"], kparams["be4"],
        kparams["w5"], kparams["b5"],
    )
    vmem = pl.BlockSpec(memory_space=pltpu.MemorySpace.VMEM)

    img_flat = pl.pallas_call(
        generator_kernel,
        out_shape=jax.ShapeDtypeStruct((B, IMG_PROD), jnp.float32),
        in_specs=[vmem] * len(inputs),
        out_specs=vmem,
        compiler_params=pltpu.CompilerParams(
            # Actual footprint ~3.5 MiB; 32 MiB is safely under every chip's VMEM.
            vmem_limit_bytes=32 << 20,
        ),
    )(*inputs)

    return img_flat.reshape(B, CHANNELS, IMG_SIZE, IMG_SIZE)


def generator_forward_mirror(kparams, noise, labels):
    """Pure-JAX mirror of the kernel's exact numerics (folded bf16 table,
    bf16-weight / f32-accumulate matmuls, two-pass batch-stat BN)."""
    B = noise.shape[0]
    noise_p = jnp.concatenate(
        [noise, jnp.zeros((B, PAD - LATENT_DIM), jnp.float32)], axis=1)
    h = (
        kparams["t"].astype(jnp.float32)[labels]        # exact row select == onehot @ T
        + jnp.dot(noise_p.astype(jnp.bfloat16), kparams["w1n"],
                  preferred_element_type=jnp.float32)
        + kparams["b1"]
    )
    h = jnp.where(h > 0, h, 0.2 * h)
    for i in ("2", "3", "4"):
        z = jnp.dot(h.astype(jnp.bfloat16), kparams["w" + i],
                    preferred_element_type=jnp.float32) + kparams["b" + i]
        mean = jnp.mean(z, axis=0, keepdims=True)
        var = jnp.mean((z - mean) ** 2, axis=0, keepdims=True)
        zn = (z - mean) * jax.lax.rsqrt(var + BN_EPS)
        zn = zn * kparams["g" + i] + kparams["be" + i]
        h = jnp.where(zn > 0, zn, 0.2 * zn)
    out = jnp.tanh(jnp.dot(h.astype(jnp.bfloat16), kparams["w5"],
                           preferred_element_type=jnp.float32) + kparams["b5"])
    return out.reshape(B, CHANNELS, IMG_SIZE, IMG_SIZE)


def generator_forward_ref(params, noise, labels):
    """Pure-JAX f32 reference of the PyTorch module's forward (training-mode BN)."""
    emb = params["emb"][labels]
    h = jnp.concatenate([emb, noise], axis=-1) @ params["w1"] + params["b1"]
    h = jnp.where(h > 0, h, 0.2 * h)
    for i in ("2", "3", "4"):
        z = h @ params["w" + i] + params["b" + i]
        mean = jnp.mean(z, axis=0, keepdims=True)
        var = jnp.mean((z - mean) ** 2, axis=0, keepdims=True)
        zn = (z - mean) / jnp.sqrt(var + BN_EPS)
        zn = zn * params["g" + i] + params["be" + i]
        h = jnp.where(zn > 0, zn, 0.2 * zn)
    out = jnp.tanh(h @ params["w5"] + params["b5"])
    return out.reshape(noise.shape[0], CHANNELS, IMG_SIZE, IMG_SIZE)


if __name__ == "__main__":
    key = jax.random.PRNGKey(0)
    k_params, k_noise, k_labels = jax.random.split(key, 3)

    B = 8  # multiple of 8: batch rows on the f32 sublane axis; BN needs real rows
    params = init_params(k_params)
    kparams = prepare_params(params)      # one-time: fold emb into w1, pad, cast bf16
    noise = jax.random.normal(k_noise, (B, LATENT_DIM), jnp.float32)
    labels = jax.random.randint(k_labels, (B,), 0, N_CLASSES, jnp.int32)
    labels2d = labels.reshape(B, 1).astype(jnp.int32)   # prepared once, outside hot path

    img = generator_forward(kparams, noise, labels2d)
    jax.block_until_ready(img)
    assert img.shape == (B, CHANNELS, IMG_SIZE, IMG_SIZE)

    # Tight check vs an exact pure-JAX mirror of the kernel's numerics.
    ref_mirror = generator_forward_mirror(kparams, noise, labels)
    err_mirror = float(jnp.max(jnp.abs(img - ref_mirror)))
    assert jnp.allclose(img, ref_mirror, atol=5e-3, rtol=5e-3), err_mirror

    # Loose check vs the f32 math of the PyTorch module (bf16 storage error only).
    ref_f32 = generator_forward_ref(params, noise, labels)
    err_f32 = float(jnp.max(jnp.abs(img - ref_f32)))
    assert jnp.allclose(img, ref_f32, atol=5e-2, rtol=5e-2), err_f32

    print("KERNEL_OK")
</pallas_src>

<mosaic_0001>
module attributes {stable_mosaic.version = 11 : i64} {
  func.func @generator_kernel(%arg0: memref<8x1xi32, #tpu.memory_space<vmem>>, %arg1: memref<8x100xf32, #tpu.memory_space<vmem>>, %arg2: memref<128x128xbf16, #tpu.memory_space<vmem>>, %arg3: memref<128x128xbf16, #tpu.memory_space<vmem>>, %arg4: memref<1x128xf32, #tpu.memory_space<vmem>>, %arg5: memref<128x256xbf16, #tpu.memory_space<vmem>>, %arg6: memref<1x256xf32, #tpu.memory_space<vmem>>, %arg7: memref<1x256xf32, #tpu.memory_space<vmem>>, %arg8: memref<1x256xf32, #tpu.memory_space<vmem>>, %arg9: memref<256x512xbf16, #tpu.memory_space<vmem>>, %arg10: memref<1x512xf32, #tpu.memory_space<vmem>>, %arg11: memref<1x512xf32, #tpu.memory_space<vmem>>, %arg12: memref<1x512xf32, #tpu.memory_space<vmem>>, %arg13: memref<512x1024xbf16, #tpu.memory_space<vmem>>, %arg14: memref<1x1024xf32, #tpu.memory_space<vmem>>, %arg15: memref<1x1024xf32, #tpu.memory_space<vmem>>, %arg16: memref<1x1024xf32, #tpu.memory_space<vmem>>, %arg17: memref<1024x1024xbf16, #tpu.memory_space<vmem>>, %arg18: memref<1x1024xf32, #tpu.memory_space<vmem>>, %arg19: memref<8x1024xf32, #tpu.memory_space<vmem>>) attributes {dimension_semantics = [], scalar_prefetch = 0 : i64, scratch_operands = 0 : i64, tpu.core_type = #tpu.core_type<tc>} {
    %c0 = arith.constant 0 : index
    %c0_0 = arith.constant 0 : index
    %0 = vector.load %arg0[%c0, %c0_0] : memref<8x1xi32, #tpu.memory_space<vmem>>, vector<8x1xi32>
    %1 = tpu.iota {dimensions = array<i32: 1>} : vector<8x128xi32>
    %2 = vector.broadcast %0 : vector<8x1xi32> to vector<8x128xi32>
    %3 = arith.cmpi eq, %2, %1 : vector<8x128xi32>
    %4 = arith.extui %3 : vector<8x128xi1> to vector<8x128xi32>
    %5 = arith.sitofp %4 : vector<8x128xi32> to vector<8x128xf32>
    %6 = arith.truncf %5 : vector<8x128xf32> to vector<8x128xbf16>
    %c0_1 = arith.constant 0 : index
    %c0_2 = arith.constant 0 : index
    %7 = vector.load %arg1[%c0_1, %c0_2] : memref<8x100xf32, #tpu.memory_space<vmem>>, vector<8x100xf32>
    %cst = arith.constant 0.000000e+00 : f32
    %8 = vector.broadcast %cst : f32 to vector<8x28xf32>
    %9 = tpu.concatenate %7, %8 in 1 : vector<8x100xf32>, vector<8x28xf32> -> vector<8x128xf32>
    %c0_3 = arith.constant 0 : index
    %c0_4 = arith.constant 0 : index
    %10 = vector.load %arg2[%c0_3, %c0_4] : memref<128x128xbf16, #tpu.memory_space<vmem>>, vector<128x128xbf16>
    %cst_5 = arith.constant dense<0.000000e+00> : vector<8x128xf32>
    %11 = tpu.matmul %6, %10, %cst_5 {dimension_numbers = #tpu.dot_dimension_numbers<[1], [0], [0], [1], [0, 0, 1, 1], [], []>} : vector<8x128xbf16>, vector<128x128xbf16>, vector<8x128xf32> -> vector<8x128xf32>
    %12 = arith.truncf %9 : vector<8x128xf32> to vector<8x128xbf16>
    %c0_6 = arith.constant 0 : index
    %c0_7 = arith.constant 0 : index
    %13 = vector.load %arg3[%c0_6, %c0_7] : memref<128x128xbf16, #tpu.memory_space<vmem>>, vector<128x128xbf16>
    %cst_8 = arith.constant dense<0.000000e+00> : vector<8x128xf32>
    %14 = tpu.matmul %12, %13, %cst_8 {dimension_numbers = #tpu.dot_dimension_numbers<[1], [0], [0], [1], [0, 0, 1, 1], [], []>} : vector<8x128xbf16>, vector<128x128xbf16>, vector<8x128xf32> -> vector<8x128xf32>
    %15 = arith.addf %11, %14 : vector<8x128xf32>
    %c0_9 = arith.constant 0 : index
    %c0_10 = arith.constant 0 : index
    %16 = vector.load %arg4[%c0_9, %c0_10] : memref<1x128xf32, #tpu.memory_space<vmem>>, vector<1x128xf32>
    %17 = vector.broadcast %16 : vector<1x128xf32> to vector<8x128xf32>
    %18 = arith.addf %15, %17 : vector<8x128xf32>
    %cst_11 = arith.constant 0.000000e+00 : f32
    %19 = vector.broadcast %cst_11 : f32 to vector<8x128xf32>
    %20 = arith.cmpf ogt, %18, %19 : vector<8x128xf32>
    %cst_12 = arith.constant 2.000000e-01 : f32
    %21 = vector.broadcast %cst_12 : f32 to vector<8x128xf32>
    %22 = arith.mulf %21, %18 : vector<8x128xf32>
    %23 = arith.select %20, %18, %22 : vector<8x128xi1>, vector<8x128xf32>
    %c0_13 = arith.constant 0 : index
    %c0_14 = arith.constant 0 : index
    %24 = vector.load %arg5[%c0_13, %c0_14] : memref<128x256xbf16, #tpu.memory_space<vmem>>, vector<128x256xbf16>
    %c0_15 = arith.constant 0 : index
    %c0_16 = arith.constant 0 : index
    %25 = vector.load %arg6[%c0_15, %c0_16] : memref<1x256xf32, #tpu.memory_space<vmem>>, vector<1x256xf32>
    %c0_17 = arith.constant 0 : index
    %c0_18 = arith.constant 0 : index
    %26 = vector.load %arg7[%c0_17, %c0_18] : memref<1x256xf32, #tpu.memory_space<vmem>>, vector<1x256xf32>
    %c0_19 = arith.constant 0 : index
    %c0_20 = arith.constant 0 : index
    %27 = vector.load %arg8[%c0_19, %c0_20] : memref<1x256xf32, #tpu.memory_space<vmem>>, vector<1x256xf32>
    %28 = arith.truncf %23 : vector<8x128xf32> to vector<8x128xbf16>
    %cst_21 = arith.constant dense<0.000000e+00> : vector<8x256xf32>
    %29 = tpu.matmul %28, %24, %cst_21 {dimension_numbers = #tpu.dot_dimension_numbers<[1], [0], [0], [1], [0, 0, 1, 1], [], []>} : vector<8x128xbf16>, vector<128x256xbf16>, vector<8x256xf32> -> vector<8x256xf32>
    %30 = vector.broadcast %25 : vector<1x256xf32> to vector<8x256xf32>
    %31 = arith.addf %29, %30 : vector<8x256xf32>
    %cst_22 = arith.constant dense<0.000000e+00> : vector<256xf32>
    %32 = vector.multi_reduction <add>, %31, %cst_22 [0] : vector<8x256xf32> to vector<256xf32>
    %33 = vector.shape_cast %32 : vector<256xf32> to vector<1x256xf32>
    %cst_23 = arith.constant 8.000000e+00 : f32
    %34 = vector.broadcast %cst_23 : f32 to vector<1x256xf32>
    %35 = arith.divf %33, %34 : vector<1x256xf32>
    %36 = vector.broadcast %35 : vector<1x256xf32> to vector<8x256xf32>
    %37 = arith.subf %31, %36 : vector<8x256xf32>
    %38 = arith.mulf %37, %37 : vector<8x256xf32>
    %cst_24 = arith.constant dense<0.000000e+00> : vector<256xf32>
    %39 = vector.multi_reduction <add>, %38, %cst_24 [0] : vector<8x256xf32> to vector<256xf32>
    %40 = vector.shape_cast %39 : vector<256xf32> to vector<1x256xf32>
    %cst_25 = arith.constant 8.000000e+00 : f32
    %41 = vector.broadcast %cst_25 : f32 to vector<1x256xf32>
    %42 = arith.divf %40, %41 : vector<1x256xf32>
    %cst_26 = arith.constant 8.000000e-01 : f32
    %43 = vector.broadcast %cst_26 : f32 to vector<1x256xf32>
    %44 = arith.addf %42, %43 : vector<1x256xf32>
    %45 = math.rsqrt %44 : vector<1x256xf32>
    %46 = vector.broadcast %45 : vector<1x256xf32> to vector<8x256xf32>
    %47 = arith.mulf %37, %46 : vector<8x256xf32>
    %48 = vector.broadcast %26 : vector<1x256xf32> to vector<8x256xf32>
    %49 = arith.mulf %47, %48 : vector<8x256xf32>
    %50 = vector.broadcast %27 : vector<1x256xf32> to vector<8x256xf32>
    %51 = arith.addf %49, %50 : vector<8x256xf32>
    %cst_27 = arith.constant 0.000000e+00 : f32
    %52 = vector.broadcast %cst_27 : f32 to vector<8x256xf32>
    %53 = arith.cmpf ogt, %51, %52 : vector<8x256xf32>
    %cst_28 = arith.constant 2.000000e-01 : f32
    %54 = vector.broadcast %cst_28 : f32 to vector<8x256xf32>
    %55 = arith.mulf %54, %51 : vector<8x256xf32>
    %56 = arith.select %53, %51, %55 : vector<8x256xi1>, vector<8x256xf32>
    %c0_29 = arith.constant 0 : index
    %c0_30 = arith.constant 0 : index
    %57 = vector.load %arg9[%c0_29, %c0_30] : memref<256x512xbf16, #tpu.memory_space<vmem>>, vector<256x512xbf16>
    %c0_31 = arith.constant 0 : index
    %c0_32 = arith.constant 0 : index
    %58 = vector.load %arg10[%c0_31, %c0_32] : memref<1x512xf32, #tpu.memory_space<vmem>>, vector<1x512xf32>
    %c0_33 = arith.constant 0 : index
    %c0_34 = arith.constant 0 : index
    %59 = vector.load %arg11[%c0_33, %c0_34] : memref<1x512xf32, #tpu.memory_space<vmem>>, vector<1x512xf32>
    %c0_35 = arith.constant 0 : index
    %c0_36 = arith.constant 0 : index
    %60 = vector.load %arg12[%c0_35, %c0_36] : memref<1x512xf32, #tpu.memory_space<vmem>>, vector<1x512xf32>
    %61 = arith.truncf %56 : vector<8x256xf32> to vector<8x256xbf16>
    %cst_37 = arith.constant dense<0.000000e+00> : vector<8x512xf32>
    %62 = tpu.matmul %61, %57, %cst_37 {dimension_numbers = #tpu.dot_dimension_numbers<[1], [0], [0], [1], [0, 0, 1, 1], [], []>} : vector<8x256xbf16>, vector<256x512xbf16>, vector<8x512xf32> -> vector<8x512xf32>
    %63 = vector.broadcast %58 : vector<1x512xf32> to vector<8x512xf32>
    %64 = arith.addf %62, %63 : vector<8x512xf32>
    %cst_38 = arith.constant dense<0.000000e+00> : vector<512xf32>
    %65 = vector.multi_reduction <add>, %64, %cst_38 [0] : vector<8x512xf32> to vector<512xf32>
    %66 = vector.shape_cast %65 : vector<512xf32> to vector<1x512xf32>
    %cst_39 = arith.constant 8.000000e+00 : f32
    %67 = vector.broadcast %cst_39 : f32 to vector<1x512xf32>
    %68 = arith.divf %66, %67 : vector<1x512xf32>
    %69 = vector.broadcast %68 : vector<1x512xf32> to vector<8x512xf32>
    %70 = arith.subf %64, %69 : vector<8x512xf32>
    %71 = arith.mulf %70, %70 : vector<8x512xf32>
    %cst_40 = arith.constant dense<0.000000e+00> : vector<512xf32>
    %72 = vector.multi_reduction <add>, %71, %cst_40 [0] : vector<8x512xf32> to vector<512xf32>
    %73 = vector.shape_cast %72 : vector<512xf32> to vector<1x512xf32>
    %cst_41 = arith.constant 8.000000e+00 : f32
    %74 = vector.broadcast %cst_41 : f32 to vector<1x512xf32>
    %75 = arith.divf %73, %74 : vector<1x512xf32>
    %cst_42 = arith.constant 8.000000e-01 : f32
    %76 = vector.broadcast %cst_42 : f32 to vector<1x512xf32>
    %77 = arith.addf %75, %76 : vector<1x512xf32>
    %78 = math.rsqrt %77 : vector<1x512xf32>
    %79 = vector.broadcast %78 : vector<1x512xf32> to vector<8x512xf32>
    %80 = arith.mulf %70, %79 : vector<8x512xf32>
    %81 = vector.broadcast %59 : vector<1x512xf32> to vector<8x512xf32>
    %82 = arith.mulf %80, %81 : vector<8x512xf32>
    %83 = vector.broadcast %60 : vector<1x512xf32> to vector<8x512xf32>
    %84 = arith.addf %82, %83 : vector<8x512xf32>
    %cst_43 = arith.constant 0.000000e+00 : f32
    %85 = vector.broadcast %cst_43 : f32 to vector<8x512xf32>
    %86 = arith.cmpf ogt, %84, %85 : vector<8x512xf32>
    %cst_44 = arith.constant 2.000000e-01 : f32
    %87 = vector.broadcast %cst_44 : f32 to vector<8x512xf32>
    %88 = arith.mulf %87, %84 : vector<8x512xf32>
    %89 = arith.select %86, %84, %88 : vector<8x512xi1>, vector<8x512xf32>
    %c0_45 = arith.constant 0 : index
    %c0_46 = arith.constant 0 : index
    %90 = vector.load %arg13[%c0_45, %c0_46] : memref<512x1024xbf16, #tpu.memory_space<vmem>>, vector<512x1024xbf16>
    %c0_47 = arith.constant 0 : index
    %c0_48 = arith.constant 0 : index
    %91 = vector.load %arg14[%c0_47, %c0_48] : memref<1x1024xf32, #tpu.memory_space<vmem>>, vector<1x1024xf32>
    %c0_49 = arith.constant 0 : index
    %c0_50 = arith.constant 0 : index
    %92 = vector.load %arg15[%c0_49, %c0_50] : memref<1x1024xf32, #tpu.memory_space<vmem>>, vector<1x1024xf32>
    %c0_51 = arith.constant 0 : index
    %c0_52 = arith.constant 0 : index
    %93 = vector.load %arg16[%c0_51, %c0_52] : memref<1x1024xf32, #tpu.memory_space<vmem>>, vector<1x1024xf32>
    %94 = arith.truncf %89 : vector<8x512xf32> to vector<8x512xbf16>
    %cst_53 = arith.constant dense<0.000000e+00> : vector<8x1024xf32>
    %95 = tpu.matmul %94, %90, %cst_53 {dimension_numbers = #tpu.dot_dimension_numbers<[1], [0], [0], [1], [0, 0, 1, 1], [], []>} : vector<8x512xbf16>, vector<512x1024xbf16>, vector<8x1024xf32> -> vector<8x1024xf32>
    %96 = vector.broadcast %91 : vector<1x1024xf32> to vector<8x1024xf32>
    %97 = arith.addf %95, %96 : vector<8x1024xf32>
    %cst_54 = arith.constant dense<0.000000e+00> : vector<1024xf32>
    %98 = vector.multi_reduction <add>, %97, %cst_54 [0] : vector<8x1024xf32> to vector<1024xf32>
    %99 = vector.shape_cast %98 : vector<1024xf32> to vector<1x1024xf32>
    %cst_55 = arith.constant 8.000000e+00 : f32
    %100 = vector.broadcast %cst_55 : f32 to vector<1x1024xf32>
    %101 = arith.divf %99, %100 : vector<1x1024xf32>
    %102 = vector.broadcast %101 : vector<1x1024xf32> to vector<8x1024xf32>
    %103 = arith.subf %97, %102 : vector<8x1024xf32>
    %104 = arith.mulf %103, %103 : vector<8x1024xf32>
    %cst_56 = arith.constant dense<0.000000e+00> : vector<1024xf32>
    %105 = vector.multi_reduction <add>, %104, %cst_56 [0] : vector<8x1024xf32> to vector<1024xf32>
    %106 = vector.shape_cast %105 : vector<1024xf32> to vector<1x1024xf32>
    %cst_57 = arith.constant 8.000000e+00 : f32
    %107 = vector.broadcast %cst_57 : f32 to vector<1x1024xf32>
    %108 = arith.divf %106, %107 : vector<1x1024xf32>
    %cst_58 = arith.constant 8.000000e-01 : f32
    %109 = vector.broadcast %cst_58 : f32 to vector<1x1024xf32>
    %110 = arith.addf %108, %109 : vector<1x1024xf32>
    %111 = math.rsqrt %110 : vector<1x1024xf32>
    %112 = vector.broadcast %111 : vector<1x1024xf32> to vector<8x1024xf32>
    %113 = arith.mulf %103, %112 : vector<8x1024xf32>
    %114 = vector.broadcast %92 : vector<1x1024xf32> to vector<8x1024xf32>
    %115 = arith.mulf %113, %114 : vector<8x1024xf32>
    %116 = vector.broadcast %93 : vector<1x1024xf32> to vector<8x1024xf32>
    %117 = arith.addf %115, %116 : vector<8x1024xf32>
    %cst_59 = arith.constant 0.000000e+00 : f32
    %118 = vector.broadcast %cst_59 : f32 to vector<8x1024xf32>
    %119 = arith.cmpf ogt, %117, %118 : vector<8x1024xf32>
    %cst_60 = arith.constant 2.000000e-01 : f32
    %120 = vector.broadcast %cst_60 : f32 to vector<8x1024xf32>
    %121 = arith.mulf %120, %117 : vector<8x1024xf32>
    %122 = arith.select %119, %117, %121 : vector<8x1024xi1>, vector<8x1024xf32>
    %123 = arith.truncf %122 : vector<8x1024xf32> to vector<8x1024xbf16>
    %c0_61 = arith.constant 0 : index
    %c0_62 = arith.constant 0 : index
    %124 = vector.load %arg17[%c0_61, %c0_62] : memref<1024x1024xbf16, #tpu.memory_space<vmem>>, vector<1024x1024xbf16>
    %cst_63 = arith.constant dense<0.000000e+00> : vector<8x1024xf32>
    %125 = tpu.matmul %123, %124, %cst_63 {dimension_numbers = #tpu.dot_dimension_numbers<[1], [0], [0], [1], [0, 0, 1, 1], [], []>} : vector<8x1024xbf16>, vector<1024x1024xbf16>, vector<8x1024xf32> -> vector<8x1024xf32>
    %c0_64 = arith.constant 0 : index
    %c0_65 = arith.constant 0 : index
    %126 = vector.load %arg18[%c0_64, %c0_65] : memref<1x1024xf32, #tpu.memory_space<vmem>>, vector<1x1024xf32>
    %127 = vector.broadcast %126 : vector<1x1024xf32> to vector<8x1024xf32>
    %128 = arith.addf %125, %127 : vector<8x1024xf32>
    %129 = math.tanh %128 : vector<8x1024xf32>
    %c0_66 = arith.constant 0 : index
    %c0_67 = arith.constant 0 : index
    %130 = vector.load %arg19[%c0_66, %c0_67] : memref<8x1024xf32, #tpu.memory_space<vmem>>, vector<8x1024xf32>
    tpu.vector_store %arg19[%c0_66, %c0_67], %129 {strides = array<i32>} : memref<8x1024xf32, #tpu.memory_space<vmem>>, vector<8x1024xf32>,
    return
  }
}

</mosaic_0001>

<bundles_post_ra>
// kernel: generator_forward.1
= control target key start
LH: loop header
LB: loop body
LE: loop exit
PB: predicated region body
PF: predicated region fallthrough
CT: control target
= control target key end

     0   :  { %s9701_s0 = inlined_call_operand.vmem [shape: s32[8,1], index: 0, kind: input, shape index: {}]   ;;  %s9702_s1 = inlined_call_operand.hbm [shape: f32[8,100], index: 1, kind: input, shape index: {}]   ;;  %s9703_s2 = inlined_call_operand.hbm [shape: bf16[128,128], index: 2, kind: input, shape index: {}]   ;;  %s9704_s3 = inlined_call_operand.hbm [shape: bf16[128,128], index: 3, kind: input, shape index: {}]   ;;  %s9705_s4 = inlined_call_operand.hbm [shape: f32[1,128], index: 4, kind: input, shape index: {}]   ;;  %s9706_s5 = inlined_call_operand.hbm [shape: bf16[128,256], index: 5, kind: input, shape index: {}]   ;;  %s9707_s6 = inlined_call_operand.hbm [shape: f32[1,256], index: 6, kind: input, shape index: {}]   ;;  %s9708_s7 = inlined_call_operand.hbm [shape: f32[1,256], index: 7, kind: input, shape index: {}]   ;;  %s9709_s8 = inlined_call_operand.hbm [shape: f32[1,256], index: 8, kind: input, shape index: {}]   ;;  %s9710_s9 = inlined_call_operand.hbm [shape: bf16[256,512], index: 9, kind: input, shape index: {}]   ;;  %s9711_s10 = inlined_call_operand.hbm [shape: f32[1,512], index: 10, kind: input, shape index: {}]   ;;  %s9712_s11 = inlined_call_operand.hbm [shape: f32[1,512], index: 11, kind: input, shape index: {}]   ;;  %s9713_s12 = inlined_call_operand.hbm [shape: f32[1,512], index: 12, kind: input, shape index: {}]   ;;  %s9714_s13 = inlined_call_operand.hbm [shape: bf16[512,1024], index: 13, kind: input, shape index: {}]   ;;  %s9715_s14 = inlined_call_operand.hbm [shape: f32[1,1024], index: 14, kind: input, shape index: {}]   ;;  %s9716_s15 = inlined_call_operand.hbm [shape: f32[1,1024], index: 15, kind: input, shape index: {}]   ;;  %s9717_s16 = inlined_call_operand.hbm [shape: f32[1,1024], index: 16, kind: input, shape index: {}]   ;;  %s9718_s17 = inlined_call_operand.hbm [shape: bf16[1024,1024], index: 17, kind: input, shape index: {}]   ;;  %s9719_s18 = inlined_call_operand.hbm [shape: f32[1,1024], index: 18, kind: input, shape index: {}]   ;;  %s9720_s19 = inlined_call_operand.vmem [shape: f32[8,1024], index: 19, kind: output, shape index: {}]  }
   0x1   :  { %9726 = sst [smem:[#allocation40_spill]] %s9701_s0 }
   0x2   :  { %9727 = sst [smem:[#allocation41_spill]] %s9702_s1 }
   0x3   :  { %9728 = sst [smem:[#allocation42_spill]] %s9703_s2 }
   0x4   :  { %9729 = sst [smem:[#allocation43_spill]] %s9704_s3 }
   0x5   :  { %9730 = sst [smem:[#allocation44_spill]] %s9719_s18 }
   0x6   :  { %9731 = sst [smem:[#allocation45_spill]] %s9720_s19 }
   0x7   :  { %24 = vsyncpa [#allocation3], 0 }
   0x8   :  { %25 = vsyncpa [#allocation5], 0 }
   0x9   :  { %26 = vsyncpa [#allocation8], 0 }
   0xa   :  { %27 = vsyncpa [#allocation11], 0 }
   0xb   :  { %28 = vsyncpa [#allocation14], 0 }
   0xc   :  { %29 = vsyncpa [#allocation17], 0 }
   0xd   :  { %30 = vsyncpa [#allocation20], 0 }
   0xe   :  { %31 = vsyncpa [#allocation23], 0 }
   0xf   :  { %32 = vsyncpa [#allocation26], 0 }
  0x10   :  { %33 = vsyncpa [#allocation29], 0  ;;  %s9001_s0 = smov [#allocation4]   ;;  %s9732_s1 = sld [smem:[#allocation42_spill]] }
  0x11   :  { %s51_s30 = sshll.u32 %s9001_s0, 4  ;;  %s52_s30 = int_to_ptr.vmem [resolvable:$true] %s51_s30 }
  0x16   :  { %s8585_s22 = scalar_lea.hbm %s9732_s1, 1024 }
  0x17   :  { %p8586_p0 = scmp.ne.s32.totalorder %s9732_s1, %s8585_s22  ;;  %p8589_p1 = scmp.lt.u32.totalorder %s8585_s22, %s9732_s1 }
  0x19   :  { %p8591_p2 = pnand %p8589_p1, %p8586_p0 }
  0x1b   :  { %8594 = shalt.err (!%p8591_p2)
}
  0x1c   :  { %s8595_s3 = scalar_lea.vmem %s52_s30, 1024  ;;  %p8600_p4 = scmp.lt.s32.totalorder %s52_s30, %s52_s30 }
  0x1d   :  { %p8596_p3 = scmp.ne.s32.totalorder %s52_s30, %s8595_s3  ;;  %p8601_p5 = scmp.lt.s32.totalorder %s8595_s3, %s8595_s3 }
  0x1f   :  { %p8602_p6 = por %p8601_p5, %p8600_p4 }
  0x21   :  { %p8603_p7 = pnand %p8602_p6, %p8596_p3 }
  0x23   :  { %8606 = shalt.err (!%p8603_p7)
}
  0x24   :  { %s9002_s26 = smov 64   ;;  %s9003_s27 = smov 4  }
  0x25   :  { %57 = dma.hbm_to_vmem [thread:$0]  %s9732_s1, 1024, %s52_s30, [#allocation5], %s9002_s26, %s9002_s26, %s9003_s27  }
  0x26   :  { %s9004_s0 = smov [#allocation7]   ;;  %s9005_s21 = smov [#allocation10]  }
  0x27   :  { %s76_s20 = sshll.u32 %s9004_s0, 4  ;;  %s98_s22 = sshll.u32 %s9005_s21, 4  ;;  %s77_s20 = int_to_ptr.vmem [resolvable:$true] %s76_s20  ;;  %s99_s22 = int_to_ptr.vmem [resolvable:$true] %s98_s22 }
  0x28   :  { %s8607_s24 = scalar_lea.hbm %s9705_s4, 16 }
  0x29   :  { %p8608_p8 = scmp.ne.s32.totalorder %s9705_s4, %s8607_s24  ;;  %p8611_p9 = scmp.lt.u32.totalorder %s8607_s24, %s9705_s4 }
  0x2b   :  { %p8613_p10 = pnand %p8611_p9, %p8608_p8 }
  0x2d   :  { %8616 = shalt.err (!%p8613_p10)
}
  0x2e   :  { %s8617_s30 = scalar_lea.vmem %s77_s20, 16  ;;  %s8621_s1 = scalar_lea.vmem %s77_s20, 32 }
  0x2f   :  { %p8618_p11 = scmp.ne.s32.totalorder %s77_s20, %s8617_s30  ;;  %p8622_p12 = scmp.lt.s32.totalorder %s77_s20, %s77_s20 }
  0x30   :  { %p8623_p13 = scmp.lt.s32.totalorder %s8621_s1, %s8617_s30 }
  0x32   :  { %p8624_p0 = por %p8623_p13, %p8622_p12 }
  0x34   :  { %p8625_p1 = pnand %p8624_p0, %p8618_p11 }
  0x36   :  { %8628 = shalt.err (!%p8625_p1)
}
  0x37   :  { %79 = dma.hbm_to_vmem [thread:$0]  %s9705_s4, 16, %s77_s20, [#allocation8]  }
  0x38   :  { %s8629_s18 = scalar_lea.hbm %s9707_s6, 32 }
  0x39   :  { %p8630_p2 = scmp.ne.s32.totalorder %s9707_s6, %s8629_s18  ;;  %p8633_p3 = scmp.lt.u32.totalorder %s8629_s18, %s9707_s6 }
  0x3b   :  { %p8635_p4 = pnand %p8633_p3, %p8630_p2 }
  0x3d   :  { %8638 = shalt.err (!%p8635_p4)
}
  0x3e   :  { %s8639_s25 = scalar_lea.vmem %s99_s22, 32  ;;  %p8644_p6 = scmp.lt.s32.totalorder %s99_s22, %s99_s22 }
  0x3f   :  { %p8640_p5 = scmp.ne.s32.totalorder %s99_s22, %s8639_s25  ;;  %p8645_p7 = scmp.lt.s32.totalorder %s8639_s25, %s8639_s25 }
  0x41   :  { %p8646_p8 = por %p8645_p7, %p8644_p6 }
  0x43   :  { %p8647_p9 = pnand %p8646_p8, %p8640_p5 }
  0x45   :  { %8650 = shalt.err (!%p8647_p9)
}
  0x46   :  { %101 = dma.hbm_to_vmem [thread:$0]  %s9707_s6, 32, %s99_s22, [#allocation11]  }
  0x47   :  { %s9006_s3 = smov [#allocation13]   ;;  %s9007_s1 = smov [#allocation16]  }
  0x48   :  { %s118_s30 = sshll.u32 %s9006_s3, 4  ;;  %s140_s28 = sshll.u32 %s9007_s1, 4  ;;  %s119_s30 = int_to_ptr.vmem [resolvable:$true] %s118_s30  ;;  %s141_s28 = int_to_ptr.vmem [resolvable:$true] %s140_s28 }
  0x49   :  { %s8651_s21 = scalar_lea.hbm %s9709_s8, 32 }
  0x4a   :  { %p8652_p10 = scmp.ne.s32.totalorder %s9709_s8, %s8651_s21  ;;  %p8655_p11 = scmp.lt.u32.totalorder %s8651_s21, %s9709_s8 }
  0x4c   :  { %p8657_p12 = pnand %p8655_p11, %p8652_p10 }
  0x4e   :  { %8660 = shalt.err (!%p8657_p12)
}
  0x4f   :  { %s8661_s6 = scalar_lea.vmem %s119_s30, 32  ;;  %p8666_p0 = scmp.lt.s32.totalorder %s119_s30, %s119_s30 }
  0x50   :  { %p8662_p13 = scmp.ne.s32.totalorder %s119_s30, %s8661_s6  ;;  %p8667_p1 = scmp.lt.s32.totalorder %s8661_s6, %s8661_s6 }
  0x52   :  { %p8668_p2 = por %p8667_p1, %p8666_p0 }
  0x54   :  { %p8669_p3 = pnand %p8668_p2, %p8662_p13 }
  0x56   :  { %8672 = shalt.err (!%p8669_p3)
}
  0x57   :  { %121 = dma.hbm_to_vmem [thread:$0]  %s9709_s8, 32, %s119_s30, [#allocation14]  }
  0x58   :  { %s8673_s20 = scalar_lea.hbm %s9711_s10, 64 }
  0x59   :  { %p8674_p4 = scmp.ne.s32.totalorder %s9711_s10, %s8673_s20  ;;  %p8677_p5 = scmp.lt.u32.totalorder %s8673_s20, %s9711_s10 }
  0x5b   :  { %p8679_p6 = pnand %p8677_p5, %p8674_p4 }
  0x5d   :  { %8682 = shalt.err (!%p8679_p6)
}
  0x5e   :  { %s8683_s21 = scalar_lea.vmem %s141_s28, 64  ;;  %p8688_p8 = scmp.lt.s32.totalorder %s141_s28, %s141_s28 }
  0x5f   :  { %p8684_p7 = scmp.ne.s32.totalorder %s141_s28, %s8683_s21  ;;  %p8689_p9 = scmp.lt.s32.totalorder %s8683_s21, %s8683_s21 }
  0x61   :  { %p8690_p10 = por %p8689_p9, %p8688_p8 }
  0x63   :  { %p8691_p11 = pnand %p8690_p10, %p8684_p7 }
  0x65   :  { %8694 = shalt.err (!%p8691_p11)
}
  0x66   :  { %143 = dma.hbm_to_vmem [thread:$0]  %s9711_s10, 64, %s141_s28, [#allocation17]  }
  0x67   :  { %s9008_s18 = smov [#allocation19]   ;;  %s9009_s2 = smov [#allocation22]  }
  0x68   :  { %s160_s19 = sshll.u32 %s9008_s18, 4  ;;  %s182_s23 = sshll.u32 %s9009_s2, 4  ;;  %s161_s19 = int_to_ptr.vmem [resolvable:$true] %s160_s19  ;;  %s183_s23 = int_to_ptr.vmem [resolvable:$true] %s182_s23 }
  0x69   :  { %s8695_s24 = scalar_lea.hbm %s9713_s12, 64 }
  0x6a   :  { %p8696_p12 = scmp.ne.s32.totalorder %s9713_s12, %s8695_s24  ;;  %p8699_p13 = scmp.lt.u32.totalorder %s8695_s24, %s9713_s12 }
  0x6c   :  { %p8701_p0 = pnand %p8699_p13, %p8696_p12 }
  0x6e   :  { %8704 = shalt.err (!%p8701_p0)
}
  0x6f   :  { %s8705_s10 = scalar_lea.vmem %s161_s19, 64  ;;  %p8710_p2 = scmp.lt.s32.totalorder %s161_s19, %s161_s19 }
  0x70   :  { %p8706_p1 = scmp.ne.s32.totalorder %s161_s19, %s8705_s10  ;;  %p8711_p3 = scmp.lt.s32.totalorder %s8705_s10, %s8705_s10 }
  0x72   :  { %p8712_p4 = por %p8711_p3, %p8710_p2 }
  0x74   :  { %p8713_p5 = pnand %p8712_p4, %p8706_p1 }
  0x76   :  { %8716 = shalt.err (!%p8713_p5)
}
  0x77   :  { %163 = dma.hbm_to_vmem [thread:$0]  %s9713_s12, 64, %s161_s19, [#allocation20]  }
  0x78   :  { %s8717_s21 = scalar_lea.hbm %s9715_s14, 128 }
  0x79   :  { %p8718_p6 = scmp.ne.s32.totalorder %s9715_s14, %s8717_s21  ;;  %p8721_p7 = scmp.lt.u32.totalorder %s8717_s21, %s9715_s14 }
  0x7b   :  { %p8723_p8 = pnand %p8721_p7, %p8718_p6 }
  0x7d   :  { %8726 = shalt.err (!%p8723_p8)
}
  0x7e   :  { %s8727_s6 = scalar_lea.vmem %s183_s23, 128  ;;  %p8732_p10 = scmp.lt.s32.totalorder %s183_s23, %s183_s23 }
  0x7f   :  { %p8728_p9 = scmp.ne.s32.totalorder %s183_s23, %s8727_s6  ;;  %p8733_p11 = scmp.lt.s32.totalorder %s8727_s6, %s8727_s6 }
  0x81   :  { %p8734_p12 = por %p8733_p11, %p8732_p10 }
  0x83   :  { %p8735_p13 = pnand %p8734_p12, %p8728_p9 }
  0x85   :  { %8738 = shalt.err (!%p8735_p13)
}
  0x86   :  { %185 = dma.hbm_to_vmem [thread:$0]  %s9715_s14, 128, %s183_s23, [#allocation23]  }
  0x87   :  { %s9010_s22 = smov [#allocation25]   ;;  %s9011_s25 = smov [#allocation2]  }
  0x88   :  { %s202_s24 = sshll.u32 %s9010_s22, 4  ;;  %s42_s4 = sshll.u32 %s9011_s25, 4  ;;  %s203_s24 = int_to_ptr.vmem [resolvable:$true] %s202_s24  ;;  %s43_s4 = int_to_ptr.vmem [resolvable:$true] %s42_s4 }
  0x89   :  { %s8739_s10 = scalar_lea.hbm %s9717_s16, 128 }
  0x8a   :  { %p8740_p0 = scmp.ne.s32.totalorder %s9717_s16, %s8739_s10  ;;  %p8743_p1 = scmp.lt.u32.totalorder %s8739_s10, %s9717_s16 }
  0x8c   :  { %p8745_p2 = pnand %p8743_p1, %p8740_p0 }
  0x8e   :  { %8748 = shalt.err (!%p8745_p2)
}
  0x8f   :  { %s8749_s14 = scalar_lea.vmem %s203_s24, 128  ;;  %p8754_p4 = scmp.lt.s32.totalorder %s203_s24, %s203_s24 }
  0x90   :  { %p8750_p3 = scmp.ne.s32.totalorder %s203_s24, %s8749_s14  ;;  %p8755_p5 = scmp.lt.s32.totalorder %s8749_s14, %s8749_s14 }
  0x92   :  { %p8756_p6 = por %p8755_p5, %p8754_p4 }
  0x94   :  { %p8757_p7 = pnand %p8756_p6, %p8750_p3 }
  0x96   :  { %8760 = shalt.err (!%p8757_p7)
}
  0x97   :  { %205 = dma.hbm_to_vmem [thread:$0]  %s9717_s16, 128, %s203_s24, [#allocation26]  }
  0x98   :  { %s9733_s18 = sld [smem:[#allocation41_spill]] }
  0x9e   :  { %s8761_s2 = scalar_lea.hbm %s9733_s18, 128 }
  0x9f   :  { %p8762_p8 = scmp.ne.s32.totalorder %s9733_s18, %s8761_s2  ;;  %p8765_p9 = scmp.lt.u32.totalorder %s8761_s2, %s9733_s18 }
  0xa1   :  { %p8767_p10 = pnand %p8765_p9, %p8762_p8 }
  0xa3   :  { %8770 = shalt.err (!%p8767_p10)
}
  0xa4   :  { %s8771_s25 = scalar_lea.vmem %s43_s4, 128  ;;  %p8776_p12 = scmp.lt.s32.totalorder %s43_s4, %s43_s4 }
  0xa5   :  { %p8772_p11 = scmp.ne.s32.totalorder %s43_s4, %s8771_s25  ;;  %p8777_p13 = scmp.lt.s32.totalorder %s8771_s25, %s8771_s25 }
  0xa7   :  { %p8778_p0 = por %p8777_p13, %p8776_p12 }
  0xa9   :  { %p8779_p1 = pnand %p8778_p0, %p8772_p11 }
  0xab   :  { %8782 = shalt.err (!%p8779_p1)
}
  0xac   :  { %45 = dma.hbm_to_vmem [thread:$0]  %s9733_s18, 128, %s43_s4, [#allocation3]  }
  0xad   :  { %s9012_s20 = smov [#allocation6]   ;;  %s9013_s10 = smov [#allocation9]  }
  0xae   :  { %s63_s3 = sshll.u32 %s9012_s20, 4  ;;  %s85_s28 = sshll.u32 %s9013_s10, 4  ;;  %s64_s3 = int_to_ptr.vmem [resolvable:$true] %s63_s3  ;;  %s86_s28 = int_to_ptr.vmem [resolvable:$true] %s85_s28 }
  0xaf   :  { %s9734_s0 = sld [smem:[#allocation43_spill]] }
  0xb5   :  { %s8783_s14 = scalar_lea.hbm %s9734_s0, 1024 }
  0xb6   :  { %p8784_p2 = scmp.ne.s32.totalorder %s9734_s0, %s8783_s14  ;;  %p8787_p3 = scmp.lt.u32.totalorder %s8783_s14, %s9734_s0 }
  0xb8   :  { %p8789_p4 = pnand %p8787_p3, %p8784_p2 }
  0xba   :  { %8792 = shalt.err (!%p8789_p4)
}
  0xbb   :  { %s8793_s4 = scalar_lea.vmem %s64_s3, 1024  ;;  %p8798_p6 = scmp.lt.s32.totalorder %s64_s3, %s64_s3 }
  0xbc   :  { %p8794_p5 = scmp.ne.s32.totalorder %s64_s3, %s8793_s4  ;;  %p8799_p7 = scmp.lt.s32.totalorder %s8793_s4, %s8793_s4 }
  0xbe   :  { %p8800_p8 = por %p8799_p7, %p8798_p6 }
  0xc0   :  { %p8801_p9 = pnand %p8800_p8, %p8794_p5 }
  0xc2   :  { %8804 = shalt.err (!%p8801_p9)
}
  0xc3   :  { %69 = dma.hbm_to_vmem [thread:$0]  %s9734_s0, 1024, %s64_s3, [#allocation5], %s9002_s26, %s9002_s26, %s9003_s27  }
  0xc4   :  { %s8805_s19 = scalar_lea.hbm %s9706_s5, 2048 }
  0xc5   :  { %p8806_p10 = scmp.ne.s32.totalorder %s9706_s5, %s8805_s19  ;;  %p8809_p11 = scmp.lt.u32.totalorder %s8805_s19, %s9706_s5 }
  0xc7   :  { %p8811_p12 = pnand %p8809_p11, %p8806_p10 }
  0xc9   :  { %8814 = shalt.err (!%p8811_p12)
}
  0xca   :  { %s8815_s20 = scalar_lea.vmem %s86_s28, 2048  ;;  %p8820_p0 = scmp.lt.s32.totalorder %s86_s28, %s86_s28 }
  0xcb   :  { %p8816_p13 = scmp.ne.s32.totalorder %s86_s28, %s8815_s20  ;;  %p8821_p1 = scmp.lt.s32.totalorder %s8815_s20, %s8815_s20 }
  0xcd   :  { %p8822_p2 = por %p8821_p1, %p8820_p0 }
  0xcf   :  { %p8823_p3 = pnand %p8822_p2, %p8816_p13 }
  0xd1   :  { %8826 = shalt.err (!%p8823_p3)
}
  0xd2   :  { %s9014_s26 = smov 128   ;;  %s9015_s27 = smov 8  }
  0xd3   :  { %91 = dma.hbm_to_vmem [thread:$0]  %s9706_s5, 2048, %s86_s28, [#allocation8], %s9014_s26, %s9014_s26, %s9015_s27  }
  0xd4   :  { %s9016_s1 = smov [#allocation12]   ;;  %s9017_s0 = smov [#allocation15]  }
  0xd5   :  { %s108_s29 = sshll.u32 %s9016_s1, 4  ;;  %s127_s14 = sshll.u32 %s9017_s0, 4  ;;  %s109_s29 = int_to_ptr.vmem [resolvable:$true] %s108_s29  ;;  %s128_s14 = int_to_ptr.vmem [resolvable:$true] %s127_s14 }
  0xd6   :  { %s8827_s8 = scalar_lea.hbm %s9708_s7, 32 }
  0xd7   :  { %p8828_p4 = scmp.ne.s32.totalorder %s9708_s7, %s8827_s8  ;;  %p8831_p5 = scmp.lt.u32.totalorder %s8827_s8, %s9708_s7 }
  0xd9   :  { %p8833_p6 = pnand %p8831_p5, %p8828_p4 }
  0xdb   :  { %8836 = shalt.err (!%p8833_p6)
}
  0xdc   :  { %s8837_s5 = scalar_lea.vmem %s109_s29, 32  ;;  %p8842_p8 = scmp.lt.s32.totalorder %s109_s29, %s109_s29 }
  0xdd   :  { %p8838_p7 = scmp.ne.s32.totalorder %s109_s29, %s8837_s5  ;;  %p8843_p9 = scmp.lt.s32.totalorder %s8837_s5, %s8837_s5 }
  0xdf   :  { %p8844_p10 = por %p8843_p9, %p8842_p8 }
  0xe1   :  { %p8845_p11 = pnand %p8844_p10, %p8838_p7 }
  0xe3   :  { %8848 = shalt.err (!%p8845_p11)
}
  0xe4   :  { %111 = dma.hbm_to_vmem [thread:$0]  %s9708_s7, 32, %s109_s29, [#allocation11]  }
  0xe5   :  { %s8849_s22 = scalar_lea.hbm %s9710_s9, 8192 }
  0xe6   :  { %p8850_p12 = scmp.ne.s32.totalorder %s9710_s9, %s8849_s22  ;;  %p8853_p13 = scmp.lt.u32.totalorder %s8849_s22, %s9710_s9 }
  0xe8   :  { %p8855_p0 = pnand %p8853_p13, %p8850_p12 }
  0xea   :  { %8858 = shalt.err (!%p8855_p0)
}
  0xeb   :  { %s8859_s26 = scalar_lea.vmem %s128_s14, 8192  ;;  %p8864_p2 = scmp.lt.s32.totalorder %s128_s14, %s128_s14 }
  0xec   :  { %p8860_p1 = scmp.ne.s32.totalorder %s128_s14, %s8859_s26  ;;  %p8865_p3 = scmp.lt.s32.totalorder %s8859_s26, %s8859_s26 }
  0xee   :  { %p8866_p4 = por %p8865_p3, %p8864_p2 }
  0xf0   :  { %p8867_p5 = pnand %p8866_p4, %p8860_p1 }
  0xf2   :  { %8870 = shalt.err (!%p8867_p5)
}
  0xf3   :  { %s9018_s7 = smov 256   ;;  %s9019_s27 = smov 16  }
  0xf4   :  { %133 = dma.hbm_to_vmem [thread:$0]  %s9710_s9, 8192, %s128_s14, [#allocation14], %s9018_s7, %s9018_s7, %s9019_s27  }
  0xf5   :  { %s9020_s1 = smov [#allocation18]   ;;  %s9021_s0 = smov [#allocation21]  }
  0xf6   :  { %s150_s29 = sshll.u32 %s9020_s1, 4  ;;  %s169_s23 = sshll.u32 %s9021_s0, 4  ;;  %s151_s29 = int_to_ptr.vmem [resolvable:$true] %s150_s29  ;;  %s170_s23 = int_to_ptr.vmem [resolvable:$true] %s169_s23 }
  0xf7   :  { %s8871_s30 = scalar_lea.hbm %s9712_s11, 64 }
  0xf8   :  { %p8872_p6 = scmp.ne.s32.totalorder %s9712_s11, %s8871_s30  ;;  %p8875_p7 = scmp.lt.u32.totalorder %s8871_s30, %s9712_s11 }
  0xfa   :  { %p8877_p8 = pnand %p8875_p7, %p8872_p6 }
  0xfc   :  { %8880 = shalt.err (!%p8877_p8)
}
  0xfd   :  { %s8881_s9 = scalar_lea.vmem %s151_s29, 64  ;;  %p8886_p10 = scmp.lt.s32.totalorder %s151_s29, %s151_s29 }
  0xfe   :  { %p8882_p9 = scmp.ne.s32.totalorder %s151_s29, %s8881_s9  ;;  %p8887_p11 = scmp.lt.s32.totalorder %s8881_s9, %s8881_s9 }
 0x100   :  { %p8888_p12 = por %p8887_p11, %p8886_p10 }
 0x102   :  { %p8889_p13 = pnand %p8888_p12, %p8882_p9 }
 0x104   :  { %8892 = shalt.err (!%p8889_p13)
}
 0x105   :  { %153 = dma.hbm_to_vmem [thread:$0]  %s9712_s11, 64, %s151_s29, [#allocation17]  }
 0x106   :  { %s8893_s19 = scalar_lea.hbm %s9714_s13, 32768 }
 0x107   :  { %p8894_p0 = scmp.ne.s32.totalorder %s9714_s13, %s8893_s19  ;;  %p8897_p1 = scmp.lt.u32.totalorder %s8893_s19, %s9714_s13 }
 0x109   :  { %p8899_p2 = pnand %p8897_p1, %p8894_p0 }
 0x10b   :  { %8902 = shalt.err (!%p8899_p2)
}
 0x10c   :  { %s8903_s20 = scalar_lea.vmem %s170_s23, 32768  ;;  %p8908_p4 = scmp.lt.s32.totalorder %s170_s23, %s170_s23 }
 0x10d   :  { %p8904_p3 = scmp.ne.s32.totalorder %s170_s23, %s8903_s20  ;;  %p8909_p5 = scmp.lt.s32.totalorder %s8903_s20, %s8903_s20 }
 0x10f   :  { %p8910_p6 = por %p8909_p5, %p8908_p4 }
 0x111   :  { %p8911_p7 = pnand %p8910_p6, %p8904_p3 }
 0x113   :  { %8914 = shalt.err (!%p8911_p7)
}
 0x114   :  { %s9022_s11 = smov 512   ;;  %s9023_s26 = smov 32  }
 0x115   :  { %175 = dma.hbm_to_vmem [thread:$0]  %s9714_s13, 32768, %s170_s23, [#allocation20], %s9022_s11, %s9022_s11, %s9023_s26  }
 0x116   :  { %s9024_s3 = smov [#allocation24]   ;;  %s9025_s1 = smov [#allocation27]  }
 0x117   :  { %s192_s10 = sshll.u32 %s9024_s3, 4  ;;  %s211_s29 = sshll.u32 %s9025_s1, 4  ;;  %s193_s10 = int_to_ptr.vmem [resolvable:$true] %s192_s10  ;;  %s212_s29 = int_to_ptr.vmem [resolvable:$true] %s211_s29 }
 0x118   :  { %s8915_s8 = scalar_lea.hbm %s9716_s15, 128 }
 0x119   :  { %p8916_p8 = scmp.ne.s32.totalorder %s9716_s15, %s8915_s8  ;;  %p8919_p9 = scmp.lt.u32.totalorder %s8915_s8, %s9716_s15 }
 0x11b   :  { %p8921_p10 = pnand %p8919_p9, %p8916_p8 }
 0x11d   :  { %8924 = shalt.err (!%p8921_p10)
}
 0x11e   :  { %s8925_s13 = scalar_lea.vmem %s193_s10, 128  ;;  %p8930_p12 = scmp.lt.s32.totalorder %s193_s10, %s193_s10 }
 0x11f   :  { %p8926_p11 = scmp.ne.s32.totalorder %s193_s10, %s8925_s13  ;;  %p8931_p13 = scmp.lt.s32.totalorder %s8925_s13, %s8925_s13 }
 0x121   :  { %p8932_p0 = por %p8931_p13, %p8930_p12 }
 0x123   :  { %p8933_p1 = pnand %p8932_p0, %p8926_p11 }
 0x125   :  { %8936 = shalt.err (!%p8933_p1)
}
 0x126   :  { %195 = dma.hbm_to_vmem [thread:$0]  %s9716_s15, 128, %s193_s10, [#allocation23]  }
 0x127   :  { %s8937_s28 = scalar_lea.hbm %s9718_s17, 65536 }
 0x128   :  { %p8938_p2 = scmp.ne.s32.totalorder %s9718_s17, %s8937_s28  ;;  %p8941_p3 = scmp.lt.u32.totalorder %s8937_s28, %s9718_s17 }
 0x12a   :  { %p8943_p4 = pnand %p8941_p3, %p8938_p2 }
 0x12c   :  { %8946 = shalt.err (!%p8943_p4)
}
 0x12d   :  { %s8947_s25 = scalar_lea.vmem %s212_s29, 65536  ;;  %p8952_p6 = scmp.lt.s32.totalorder %s212_s29, %s212_s29 }
 0x12e   :  { %p8948_p5 = scmp.ne.s32.totalorder %s212_s29, %s8947_s25  ;;  %p8953_p7 = scmp.lt.s32.totalorder %s8947_s25, %s8947_s25 }
 0x130   :  { %p8954_p8 = por %p8953_p7, %p8952_p6 }
 0x132   :  { %p8955_p9 = pnand %p8954_p8, %p8948_p5 }
 0x134   :  { %8958 = shalt.err (!%p8955_p9)
}
 0x135   :  { %217 = dma.hbm_to_vmem [thread:$0]  %s9718_s17, 65536, %s212_s29, [#allocation26], %s9022_s11, %s9022_s11, %s9023_s26  }
 0x136   :  { %s9026_s24 = smov [#allocation28]   ;;  %s9735_s3 = sld [smem:[#allocation44_spill]] }
 0x137   :  { %s224_s20 = sshll.u32 %s9026_s24, 4  ;;  %s225_s20 = int_to_ptr.vmem [resolvable:$true] %s224_s20 }
 0x13c   :  { %s8959_s10 = scalar_lea.hbm %s9735_s3, 128 }
 0x13d   :  { %p8960_p10 = scmp.ne.s32.totalorder %s9735_s3, %s8959_s10  ;;  %p8963_p11 = scmp.lt.u32.totalorder %s8959_s10, %s9735_s3 }
 0x13f   :  { %p8965_p12 = pnand %p8963_p11, %p8960_p10 }
 0x141   :  { %8968 = shalt.err (!%p8965_p12)
}
 0x142   :  { %s8969_s30 = scalar_lea.vmem %s225_s20, 128  ;;  %p8974_p0 = scmp.lt.s32.totalorder %s225_s20, %s225_s20 }
 0x143   :  { %p8970_p13 = scmp.ne.s32.totalorder %s225_s20, %s8969_s30  ;;  %p8975_p1 = scmp.lt.s32.totalorder %s8969_s30, %s8969_s30 }
 0x145   :  { %p8976_p2 = por %p8975_p1, %p8974_p0 }
 0x147   :  { %p8977_p3 = pnand %p8976_p2, %p8970_p13 }
 0x149   :  { %8980 = shalt.err (!%p8977_p3)
}
 0x14a   :  { %227 = dma.hbm_to_vmem [thread:$0]  %s9735_s3, 128, %s225_s20, [#allocation29]  }
 0x14b   :  { %8981 = dma.done.wait [#allocation3], 128  }
 0x14c   :  { %8982 = vsyncadd [#allocation3], 4294967168 }
 0x14d   :  { %8983 = dma.done.wait [#allocation5], 2048  }
 0x14e   :  { %8984 = vsyncadd [#allocation5], 4294965248 }
 0x14f   :  { %8985 = dma.done.wait [#allocation8], 2064  }
 0x150   :  { %8986 = vsyncadd [#allocation8], 4294965232 }
 0x151   :  { %8987 = dma.done.wait [#allocation11], 64  }
 0x152   :  { %8988 = vsyncadd [#allocation11], 4294967232 }
 0x153   :  { %8989 = dma.done.wait [#allocation14], 8224  }
 0x154   :  { %8990 = vsyncadd [#allocation14], 4294959072 }
 0x155   :  { %8991 = dma.done.wait [#allocation17], 128  }
 0x156   :  { %8992 = vsyncadd [#allocation17], 4294967168 }
 0x157   :  { %8993 = dma.done.wait [#allocation20], 32832  }
 0x158   :  { %8994 = vsyncadd [#allocation20], 4294934464 }
 0x159   :  { %8995 = dma.done.wait [#allocation23], 256  }
 0x15a   :  { %8996 = vsyncadd [#allocation23], 4294967040 }
 0x15b   :  { %8997 = dma.done.wait [#allocation26], 65664  }
 0x15c   :  { %8998 = vsyncadd [#allocation26], 4294901632 }
 0x15d   :  { %8999 = dma.done.wait [#allocation29], 128  }
 0x15e   :  { %9000 = vsyncadd [#allocation29], 4294967168  ;;  %v9027_v0 = vmov 0   ;;  %v9028_v1 = vmov 0.0   ;;  %vm9029_vm0 = vmmov 0   ;;  %s9736_s4 = sld [smem:[#allocation40_spill]]  ;;  %v284_v34 = vlaneseq }
 0x15f   :  { %8402 = vset.pattern.permute.xlu0 %v9027_v0  ;;  %8252 = vmatprep.subr.bf16.mxu0 %v9028_v1  ;;  %v8403_v3 = vld [vmem:[#allocation6] sm:$0xff]   ;;  %v8405_v5 = vld [vmem:[#allocation6 + $0x8] sm:$0xff]   ;;  %v8407_v7 = vld [vmem:[#allocation6 + $0x10] sm:$0xff]   ;;  %vm294_vm1 = vcmask 818176   ;;  %v9030_v37 = vmov 1.0|1.0  }
 0x160   :  { %8272 = vmatprep.subr.bf16.mxu1 %v9028_v1  ;;  %8268 = vmatprep.mubr.msk.bf16.mxu0 %vm9029_vm0, %v9028_v1  ;;  %v8404_v4 = vld [vmem:[#allocation4] sm:$0xff]   ;;  %v8406_v6 = vld [vmem:[#allocation4 + $0x8] sm:$0xff]   ;;  %v8408_v8 = vld [vmem:[#allocation4 + $0x10] sm:$0xff]   ;;  %v285_v35 = vand.u32 127, %v284_v34  ;;  %s9739_s13 = sld [smem:[#allocation45_spill]] }
 0x161   :  { %8288 = vmatprep.mubr.msk.bf16.mxu1 %vm9029_vm0, %v9028_v1  ;;  %8253 = vmatpush3.bf16.msra.mxu0 %v8403_v3  ;;  %v8409_v9 = vld [vmem:[#allocation6 + $0x18] sm:$0xff]   ;;  %v8411_v11 = vld [vmem:[#allocation6 + $0x20] sm:$0xff]   ;;  %v8413_v13 = vld [vmem:[#allocation6 + $0x28] sm:$0xff]  }
 0x162   :  { %8254 = vmatprep.subr.bf16.mxu0 %v9028_v1  ;;  %8273 = vmatpush3.bf16.msra.mxu1 %v8404_v4  ;;  %v8410_v10 = vld [vmem:[#allocation4 + $0x18] sm:$0xff]   ;;  %v8412_v12 = vld [vmem:[#allocation4 + $0x20] sm:$0xff]   ;;  %v8414_v14 = vld [vmem:[#allocation4 + $0x28] sm:$0xff]  }
 0x163   :  { %8274 = vmatprep.subr.bf16.mxu1 %v9028_v1  ;;  %v8415_v15 = vld [vmem:[#allocation6 + $0x30] sm:$0xff]   ;;  %vm9363_vm2 = vmpackc.low %vm294_vm1, %vm294_vm1  ;;  %v8417_v18 = vld [vmem:[#allocation6 + $0x38] sm:$0xff]  }
 0x164   :  { %v283_v2 = vld [vmem:[%s9736_s4] sm:$0xff]  ;;  %v8416_v16 = vld [vmem:[#allocation4 + $0x30] sm:$0xff]   ;;  %v8419_v22 = vld [vmem:[#allocation9] ss:$8 sps:$4 sm:$0xff]  }
 0x165   :  { %287 = vperm.xlu0 %8402, %v283_v2   ;;  %8255 = vmatpush3.bf16.msra.mxu0 %v8405_v5  ;;  %v293_v19 = vld [vmem:[#allocation2] sm:$0xff]  ;;  %v8421_v21 = vld [vmem:[#allocation9 + $0x4] ss:$8 sps:$4 sm:$0xff]   ;;  %v8425_v27 = vld [vmem:[#allocation9 + $0x20] ss:$8 sps:$4 sm:$0xff]  }
 0x166   :  { %8256 = vmatprep.subr.bf16.mxu0 %v9028_v1  ;;  %8275 = vmatpush3.bf16.msra.mxu1 %v8406_v6  ;;  %v8418_v20 = vld [vmem:[#allocation4 + $0x38] sm:$0xff]   ;;  %v7373_v23 = vpack.c.bf16 %v293_v19, %v293_v19  ;;  %v8427_v26 = vld [vmem:[#allocation9 + $0x24] ss:$8 sps:$4 sm:$0xff]   ;;  %v8431_v31 = vld [vmem:[#allocation9 + $0x40] ss:$8 sps:$4 sm:$0xff]  }
 0x167   :  { %8276 = vmatprep.subr.bf16.mxu1 %v9028_v1  ;;  %v8424_v24 = vld [vmem:[#allocation9 + $0x14] ss:$8 sps:$4 sm:$0xff]   ;;  %v8422_v25 = vld [vmem:[#allocation9 + $0x10] ss:$8 sps:$4 sm:$0xff]   ;;  %v8433_v30 = vld [vmem:[#allocation9 + $0x44] ss:$8 sps:$4 sm:$0xff]  }
 0x168   :  { %v8430_v28 = vld [vmem:[#allocation9 + $0x34] ss:$8 sps:$4 sm:$0xff]   ;;  %v8428_v29 = vld [vmem:[#allocation9 + $0x30] ss:$8 sps:$4 sm:$0xff]   ;;  %v8439_v38 = vld [vmem:[#allocation9 + $0x64] ss:$8 sps:$4 sm:$0xff]  }
 0x169   :  { %8257 = vmatpush3.bf16.msra.mxu0 %v8407_v7  ;;  %v8434_v32 = vld [vmem:[#allocation9 + $0x50] ss:$8 sps:$4 sm:$0xff]   ;;  %v8436_v33 = vld [vmem:[#allocation9 + $0x54] ss:$8 sps:$4 sm:$0xff]   ;;  %v8437_v39 = vld [vmem:[#allocation9 + $0x60] ss:$8 sps:$4 sm:$0xff]  }
 0x16a   :  { %8258 = vmatprep.subr.bf16.mxu0 %v9028_v1  ;;  %8277 = vmatpush3.bf16.msra.mxu1 %v8408_v8  ;;  %v8442_v40 = vld [vmem:[#allocation9 + $0x74] ss:$8 sps:$4 sm:$0xff]   ;;  %v8440_v41 = vld [vmem:[#allocation9 + $0x70] ss:$8 sps:$4 sm:$0xff]  }
 0x16b   :  { %8278 = vmatprep.subr.bf16.mxu1 %v9028_v1  ;;  %v8443_v42 = vld [vmem:[#allocation15] ss:$16 sps:$4 sm:$0xff]   ;;  %v8445_v43 = vld [vmem:[#allocation15 + $0x4] ss:$16 sps:$4 sm:$0xff]   ;;  %v8448_v44 = vld [vmem:[#allocation15 + $0xc] ss:$16 sps:$4 sm:$0xff]  }
 0x16c   :  { %v7385_v50 = vld [vmem:[#allocation7] ss:$0 sm:$0xff]  ;;  %v8451_v60 = vld [vmem:[#allocation15 + $0x24] ss:$16 sps:$4 sm:$0xff]   ;;  %v8454_v61 = vld [vmem:[#allocation15 + $0x2c] ss:$16 sps:$4 sm:$0xff]  }
 0x16d   :  { %8259 = vmatpush3.bf16.msra.mxu0 %v8409_v9  ;;  %v8446_v58 = vld [vmem:[#allocation15 + $0x8] ss:$16 sps:$4 sm:$0xff]   ;;  %v8449_v62 = vld [vmem:[#allocation15 + $0x20] ss:$16 sps:$4 sm:$0xff]   ;;  %v8463_v4 = vld [vmem:[#allocation15 + $0x64] ss:$16 sps:$4 sm:$0xff]  }
 0x16e   :  { %8260 = vmatprep.subr.bf16.mxu0 %v9028_v1  ;;  %8279 = vmatpush3.bf16.msra.mxu1 %v8410_v10  ;;  %v8452_v63 = vld [vmem:[#allocation15 + $0x28] ss:$16 sps:$4 sm:$0xff]   ;;  %v8455_v2 = vld [vmem:[#allocation15 + $0x40] ss:$16 sps:$4 sm:$0xff]   ;;  %v8466_v5 = vld [vmem:[#allocation15 + $0x6c] ss:$16 sps:$4 sm:$0xff]  }
 0x16f   :  { %8280 = vmatprep.subr.bf16.mxu1 %v9028_v1  ;;  %v8458_v3 = vld [vmem:[#allocation15 + $0x48] ss:$16 sps:$4 sm:$0xff]   ;;  %v8461_v6 = vld [vmem:[#allocation15 + $0x60] ss:$16 sps:$4 sm:$0xff]   ;;  %v8469_v8 = vld [vmem:[#allocation15 + $0x84] ss:$16 sps:$4 sm:$0xff]  }
 0x170   :  { %v8464_v7 = vld [vmem:[#allocation15 + $0x68] ss:$16 sps:$4 sm:$0xff]   ;;  %v8472_v9 = vld [vmem:[#allocation15 + $0x8c] ss:$16 sps:$4 sm:$0xff]   ;;  %v8467_v10 = vld [vmem:[#allocation15 + $0x80] ss:$16 sps:$4 sm:$0xff]  }
 0x171   :  { %8261 = vmatpush3.bf16.msra.mxu0 %v8411_v11  ;;  %v8470_v11 = vld [vmem:[#allocation15 + $0x88] ss:$16 sps:$4 sm:$0xff]   ;;  %v8484_v17 = vld [vmem:[#allocation15 + $0xcc] ss:$16 sps:$4 sm:$0xff]  }
 0x172   :  { %8262 = vmatprep.subr.bf16.mxu0 %v9028_v1  ;;  %8281 = vmatpush3.bf16.msra.mxu1 %v8412_v12  ;;  %v8475_v12 = vld [vmem:[#allocation15 + $0xa4] ss:$16 sps:$4 sm:$0xff]   ;;  %v8482_v19 = vld [vmem:[#allocation15 + $0xc8] ss:$16 sps:$4 sm:$0xff]  }
 0x173   :  { %8282 = vmatprep.subr.bf16.mxu1 %v9028_v1 }
 0x175   :  { %8263 = vmatpush3.bf16.msra.mxu0 %v8413_v13  ;;  %v8478_v13 = vld [vmem:[#allocation15 + $0xac] ss:$16 sps:$4 sm:$0xff]  }
 0x176   :  { %8264 = vmatprep.subr.bf16.mxu0 %v9028_v1  ;;  %8283 = vmatpush3.bf16.msra.mxu1 %v8414_v14  ;;  %v8473_v14 = vld [vmem:[#allocation15 + $0xa0] ss:$16 sps:$4 sm:$0xff]  }
 0x177   :  { %8284 = vmatprep.subr.bf16.mxu1 %v9028_v1 }
 0x179   :  { %8265 = vmatpush3.bf16.msra.mxu0 %v8415_v15  ;;  %v8476_v15 = vld [vmem:[#allocation15 + $0xa8] ss:$16 sps:$4 sm:$0xff]  }
 0x17a   :  { %8266 = vmatprep.subr.bf16.mxu0 %v9028_v1  ;;  %8285 = vmatpush3.bf16.msra.mxu1 %v8416_v16  ;;  %v8481_v16 = vld [vmem:[#allocation15 + $0xc4] ss:$16 sps:$4 sm:$0xff]  }
 0x17b   :  { %8286 = vmatprep.subr.bf16.mxu1 %v9028_v1  ;;  %v8460_v1 = vld [vmem:[#allocation15 + $0x4c] ss:$16 sps:$4 sm:$0xff]  }
 0x17d   :  { %8267 = vmatpush3.bf16.msra.mxu0 %v8417_v18  ;;  %v8479_v18 = vld [vmem:[#allocation15 + $0xc0] ss:$16 sps:$4 sm:$0xff]  }
 0x17e   :  { %8287 = vmatpush3.bf16.msra.mxu1 %v8418_v20  ;;  %627 = vmatprep.subr.bf16.mxu0 %v8421_v21  ;;  %v8487_v20 = vld [vmem:[#allocation15 + $0xe4] ss:$16 sps:$4 sm:$0xff]   ;;  %v8490_v21 = vld [vmem:[#allocation15 + $0xec] ss:$16 sps:$4 sm:$0xff]  }
 0x17f   :  { %1149 = vmatprep.subr.bf16.mxu1 %v8445_v43  ;;  %v8515_v43 = vld [vmem:[#allocation15 + $0x180] ss:$16 sps:$4 sm:$0xff]  }
 0x180   :  { %8269 = vmatmul.mubr.msk.bf16.vlgmr.msra.gmra.mrb[0].mxu0 %vm9363_vm2, %v7373_v23  ;;  %v8488_v23 = vld [vmem:[#allocation15 + $0xe8] ss:$16 sps:$4 sm:$0xff]  }
 0x181   :  { %628 = vmatpush1.bf16.msra.mxu0 %v8419_v22  ;;  %659 = vmatprep.mubr.bf16.mxu0 %v9027_v0  ;;  %v8457_v0 = vld [vmem:[#allocation15 + $0x44] ss:$16 sps:$4 sm:$0xff]   ;;  %v8485_v22 = vld [vmem:[#allocation15 + $0xe0] ss:$16 sps:$4 sm:$0xff]  }
 0x182   :  { %629 = vmatprep.subr.bf16.mxu0 %v8424_v24  ;;  %v8493_v24 = vld [vmem:[#allocation15 + $0x104] ss:$16 sps:$4 sm:$0xff]  }
 0x185   :  { %630 = vmatpush1.bf16.msra.mxu0 %v8422_v25  ;;  %v8496_v25 = vld [vmem:[#allocation15 + $0x10c] ss:$16 sps:$4 sm:$0xff]  }
 0x186   :  { %631 = vmatprep.subr.bf16.mxu0 %v8427_v26  ;;  %v8491_v26 = vld [vmem:[#allocation15 + $0x100] ss:$16 sps:$4 sm:$0xff]  }
 0x189   :  { %632 = vmatpush1.bf16.msra.mxu0 %v8425_v27  ;;  %v8494_v27 = vld [vmem:[#allocation15 + $0x108] ss:$16 sps:$4 sm:$0xff]  }
 0x18a   :  { %633 = vmatprep.subr.bf16.mxu0 %v8430_v28  ;;  %v8499_v28 = vld [vmem:[#allocation15 + $0x124] ss:$16 sps:$4 sm:$0xff]  }
 0x18d   :  { %634 = vmatpush1.bf16.msra.mxu0 %v8428_v29  ;;  %v8502_v29 = vld [vmem:[#allocation15 + $0x12c] ss:$16 sps:$4 sm:$0xff]  }
 0x18e   :  { %635 = vmatprep.subr.bf16.mxu0 %v8433_v30  ;;  %v8497_v30 = vld [vmem:[#allocation15 + $0x120] ss:$16 sps:$4 sm:$0xff]  }
 0x191   :  { %636 = vmatpush1.bf16.msra.mxu0 %v8431_v31  ;;  %v8500_v31 = vld [vmem:[#allocation15 + $0x128] ss:$16 sps:$4 sm:$0xff]  }
 0x192   :  { %637 = vmatprep.subr.bf16.mxu0 %v8436_v33  ;;  %v8508_v33 = vld [vmem:[#allocation15 + $0x14c] ss:$16 sps:$4 sm:$0xff]  }
 0x195   :  { %638 = vmatpush1.bf16.msra.mxu0 %v8434_v32  ;;  %v8505_v32 = vld [vmem:[#allocation15 + $0x144] ss:$16 sps:$4 sm:$0xff]  }
 0x196   :  { %639 = vmatprep.subr.bf16.mxu0 %v8439_v38  ;;  %v8514_v38 = vld [vmem:[#allocation15 + $0x16c] ss:$16 sps:$4 sm:$0xff]  }
 0x199   :  { %640 = vmatpush1.bf16.msra.mxu0 %v8437_v39  ;;  %v8509_v39 = vld [vmem:[#allocation15 + $0x160] ss:$16 sps:$4 sm:$0xff]  }
 0x19a   :  { %641 = vmatprep.subr.bf16.mxu0 %v8442_v40  ;;  %v8512_v40 = vld [vmem:[#allocation15 + $0x168] ss:$16 sps:$4 sm:$0xff]  }
 0x19d   :  { %642 = vmatpush1.bf16.msra.mxu0 %v8440_v41  ;;  %v8517_v41 = vld [vmem:[#allocation15 + $0x184] ss:$16 sps:$4 sm:$0xff]  }
 0x19e   :  { %1190 = vmatprep.subr.bf16.mxu0 %v8448_v44  ;;  %v8518_v44 = vld [vmem:[#allocation15 + $0x188] ss:$16 sps:$4 sm:$0xff]  }
 0x1e4   :  { %v288_v36 = vpop.permute.xlu0 %287 }
 0x1e5   :  { %vm289_vm3 = vcmp.eq.s32.totalorder %v288_v36, %v285_v35  ;;  %v8503_v35 = vld [vmem:[#allocation15 + $0x140] ss:$16 sps:$4 sm:$0xff]   ;;  %v8506_v36 = vld [vmem:[#allocation15 + $0x148] ss:$16 sps:$4 sm:$0xff]  }
 0x1e6   :  { %vm7383_vm4 = vmpackc.low %vm289_vm3, %vm289_vm3 }
 0x1e7   :  { %8289 = vmatmul.mubr.msk.bf16.vlgmr.msra.gmra.mrb[0].mxu1 %vm7383_vm4, %v9030_v37  ;;  %v8511_v37 = vld [vmem:[#allocation15 + $0x164] ss:$16 sps:$4 sm:$0xff]  }
 0x1e8   :  { %1150 = vmatpush1.bf16.msra.mxu1 %v8443_v42  ;;  %v8520_v42 = vld [vmem:[#allocation15 + $0x18c] ss:$16 sps:$4 sm:$0xff]  }
 0x1e9   :  { %1151 = vmatprep.subr.bf16.mxu1 %v8451_v60 }
 0x1ec   :  { %1152 = vmatpush1.bf16.msra.mxu1 %v8449_v62  ;;  %v9381_v62 = vld [vmem:[#allocation21 + $0x28] sm:$0xff] }
 0x1ed   :  { %1153 = vmatprep.subr.bf16.mxu1 %v8457_v0 }
 0x1f0   :  { %1154 = vmatpush1.bf16.msra.mxu1 %v8455_v2 }
 0x1f1   :  { %1155 = vmatprep.subr.bf16.mxu1 %v8463_v4  ;;  %v532_v4 = vld [vmem:[#allocation10] sm:$0x3] }
 0x1f4   :  { %1156 = vmatpush1.bf16.msra.mxu1 %v8461_v6 }
 0x1f5   :  { %1157 = vmatprep.subr.bf16.mxu1 %v8469_v8 }
 0x1f8   :  { %1158 = vmatpush1.bf16.msra.mxu1 %v8467_v10 }
 0x1f9   :  { %1159 = vmatprep.subr.bf16.mxu1 %v8475_v12 }
 0x1fc   :  { %1160 = vmatpush1.bf16.msra.mxu1 %v8473_v14 }
 0x1fd   :  { %1161 = vmatprep.subr.bf16.mxu1 %v8481_v16 }
 0x200   :  { %1162 = vmatpush1.bf16.msra.mxu1 %v8479_v18 }
 0x201   :  { %1163 = vmatprep.subr.bf16.mxu1 %v8487_v20 }
 0x204   :  { %1164 = vmatpush1.bf16.msra.mxu1 %v8485_v22 }
 0x205   :  { %1165 = vmatprep.subr.bf16.mxu1 %v8493_v24 }
 0x208   :  { %1166 = vmatpush1.bf16.msra.mxu1 %v8491_v26 }
 0x209   :  { %1167 = vmatprep.subr.bf16.mxu1 %v8499_v28 }
 0x20c   :  { %1168 = vmatpush1.bf16.msra.mxu1 %v8497_v30 }
 0x20d   :  { %1169 = vmatprep.subr.bf16.mxu1 %v8505_v32 }
 0x210   :  { %1170 = vmatpush1.bf16.msra.mxu1 %v8503_v35 }
 0x211   :  { %1171 = vmatprep.subr.bf16.mxu1 %v8511_v37 }
 0x214   :  { %1172 = vmatpush1.bf16.msra.mxu1 %v8509_v39 }
 0x215   :  { %1173 = vmatprep.subr.bf16.mxu1 %v8517_v41 }
 0x218   :  { %1174 = vmatpush1.bf16.msra.mxu1 %v8515_v43 }
 0x253   :  { %v411_v45 = vpop.f32.mrb[0].mxu0 }
 0x254   :  { %v8270_v46 = vpop.f32.mrb[1].mxu0 }
 0x255   :  { %v414_v47 = vpop.f32.mrb[2].mxu0  ;;  %v8526_v46 = vld [vmem:[#allocation15 + $0x1ac] ss:$16 sps:$4 sm:$0xff]  }
 0x256   :  { %v8271_v48 = vpop.f32.mrb[3].mxu0  ;;  %v8521_v47 = vld [vmem:[#allocation15 + $0x1a0] ss:$16 sps:$4 sm:$0xff]  }
 0x257   :  { %v8524_v48 = vld [vmem:[#allocation15 + $0x1a8] ss:$16 sps:$4 sm:$0xff]  }
 0x2ba   :  { %v499_v49 = vpop.f32.mrb[0].mxu1 }
 0x2bb   :  { %v500_v51 = vadd.f32 %v499_v49, %v411_v45  ;;  %v8290_v52 = vpop.f32.mrb[1].mxu1  ;;  %v8523_v45 = vld [vmem:[#allocation15 + $0x1a4] ss:$16 sps:$4 sm:$0xff]  }
 0x2bc   :  { %v502_v53 = vpop.f32.mrb[2].mxu1  ;;  %1175 = vmatprep.subr.bf16.mxu1 %v8523_v45  ;;  %v8529_v49 = vld [vmem:[#allocation15 + $0x1c4] ss:$16 sps:$4 sm:$0xff]   ;;  %v8530_v52 = vld [vmem:[#allocation15 + $0x1c8] ss:$16 sps:$4 sm:$0xff]  }
 0x2bd   :  { %v512_v54 = vadd.f32 %v7385_v50, %v500_v51  ;;  %v8291_v55 = vpop.f32.mrb[3].mxu1  ;;  %1176 = vmatpush1.bf16.msra.mxu1 %v8521_v47  ;;  %v8532_v50 = vld [vmem:[#allocation15 + $0x1cc] ss:$16 sps:$4 sm:$0xff]   ;;  %v8527_v51 = vld [vmem:[#allocation15 + $0x1c0] ss:$16 sps:$4 sm:$0xff]  }
 0x2be   :  { %1177 = vmatprep.subr.bf16.mxu1 %v8529_v49  ;;  %v8535_v53 = vld [vmem:[#allocation15 + $0x1e4] ss:$16 sps:$4 sm:$0xff]   ;;  %v8533_v55 = vld [vmem:[#allocation15 + $0x1e0] ss:$16 sps:$4 sm:$0xff]   ;;  %v533_v47 = vld [vmem:[#allocation12] sm:$0x3] }
 0x2bf   :  { %vm513_vm5 = vcmp.gt.f32.partialorder %v512_v54, 0.0  ;;  %v514_v56 = vmul.f32 0.2, %v512_v54 }
 0x2c1   :  { %v515_v57 = vsel %vm513_vm5, %v512_v54, %v514_v56  ;;  %v8538_v54 = vld [vmem:[#allocation15 + $0x1ec] ss:$16 sps:$4 sm:$0xff]   ;;  %1178 = vmatpush1.bf16.msra.mxu1 %v8527_v51  ;;  %v8536_v56 = vld [vmem:[#allocation15 + $0x1e8] ss:$16 sps:$4 sm:$0xff]  }
 0x2c2   :  { %v535_v59 = vpack.c.bf16 %v515_v57, %v515_v57  ;;  %1179 = vmatprep.subr.bf16.mxu1 %v8535_v53  ;;  %v9371_v57 = vld [vmem:[#allocation21] sm:$0xff] }
 0x2c4   :  { %660 = vmatmul.mubr.bf16.vlgmr.msra.gmra.mrb[4].mxu0 %v535_v59  ;;  %v9375_v59 = vld [vmem:[#allocation21 + $0x8] sm:$0xff] }
 0x2c5   :  { %1191 = vmatpush1.bf16.msra.mxu0 %v8446_v58  ;;  %1180 = vmatpush1.bf16.msra.mxu1 %v8533_v55  ;;  %v9373_v58 = vld [vmem:[#allocation21 + $0x20] sm:$0xff]  ;;  %v7469_v0 = vcombine.high %v9375_v59, %v9381_v62 }
 0x2c6   :  { %1192 = vmatprep.subr.bf16.mxu0 %v8454_v61  ;;  %v7466_v60 = vcombine.low %v9371_v57, %v9373_v58  ;;  %v7467_v61 = vcombine.high %v9371_v57, %v9373_v58  ;;  %v1386_v57 = vld [vmem:[#allocation21 + $0x88] sm:$0xff] }
 0x2c8   :  { %2953 = vmatprep.subr.bf16.mxu1 %v7467_v61 }
 0x2c9   :  { %1193 = vmatpush1.bf16.msra.mxu0 %v8452_v63  ;;  %v7468_v63 = vcombine.low %v9375_v59, %v9381_v62 }
 0x2ca   :  { %1194 = vmatprep.subr.bf16.mxu0 %v8460_v1  ;;  %v9388_v1 = vshrl.u32 %v284_v34, 7 }
 0x2cc   :  { %v9391_v2 = vsub.s32 0, %v9388_v1 }
 0x2cd   :  { %1195 = vmatpush1.bf16.msra.mxu0 %v8458_v3  ;;  %v9394_v3 = vsub.s32 1, %v9388_v1 }
 0x2ce   :  { %1196 = vmatprep.subr.bf16.mxu0 %v8466_v5  ;;  %v540_v5 = vrot.slane %v532_v4, %v9391_v2  ;;  %v711_v49 = vrot.slane %v533_v47, %v9391_v2 }
 0x2cf   :  { %v544_v6 = vrot.slane %v532_v4, %v9394_v3  ;;  %v715_v51 = vrot.slane %v533_v47, %v9394_v3  ;;  %v1421_v47 = vld [vmem:[#allocation21 + $0x1a0] sm:$0xff] }
 0x2d1   :  { %1197 = vmatpush1.bf16.msra.mxu0 %v8464_v7 }
 0x2d2   :  { %1198 = vmatprep.subr.bf16.mxu0 %v8472_v9 }
 0x2d5   :  { %1199 = vmatpush1.bf16.msra.mxu0 %v8470_v11 }
 0x2d6   :  { %1200 = vmatprep.subr.bf16.mxu0 %v8478_v13 }
 0x2d9   :  { %1201 = vmatpush1.bf16.msra.mxu0 %v8476_v15 }
 0x2da   :  { %1202 = vmatprep.subr.bf16.mxu0 %v8484_v17 }
 0x2dd   :  { %1203 = vmatpush1.bf16.msra.mxu0 %v8482_v19 }
 0x2de   :  { %1204 = vmatprep.subr.bf16.mxu0 %v8490_v21 }
 0x2e1   :  { %1205 = vmatpush1.bf16.msra.mxu0 %v8488_v23 }
 0x2e2   :  { %1206 = vmatprep.subr.bf16.mxu0 %v8496_v25 }
 0x2e5   :  { %1207 = vmatpush1.bf16.msra.mxu0 %v8494_v27 }
 0x2e6   :  { %1208 = vmatprep.subr.bf16.mxu0 %v8502_v29 }
 0x2e9   :  { %1209 = vmatpush1.bf16.msra.mxu0 %v8500_v31 }
 0x2ea   :  { %1210 = vmatprep.subr.bf16.mxu0 %v8508_v33 }
 0x2ed   :  { %1211 = vmatpush1.bf16.msra.mxu0 %v8506_v36 }
 0x2ee   :  { %1212 = vmatprep.subr.bf16.mxu0 %v8514_v38 }
 0x2f1   :  { %1213 = vmatpush1.bf16.msra.mxu0 %v8512_v40 }
 0x2f2   :  { %1214 = vmatprep.subr.bf16.mxu0 %v8520_v42 }
 0x2f5   :  { %1215 = vmatpush1.bf16.msra.mxu0 %v8518_v44 }
 0x2f6   :  { %1216 = vmatprep.subr.bf16.mxu0 %v8526_v46 }
 0x2f9   :  { %1217 = vmatpush1.bf16.msra.mxu0 %v8524_v48  ;;  %v534_v48 = vld [vmem:[#allocation13] sm:$0x3] }
 0x2fa   :  { %1218 = vmatprep.subr.bf16.mxu0 %v8532_v50 }
 0x2fd   :  { %1219 = vmatpush1.bf16.msra.mxu0 %v8530_v52 }
 0x2fe   :  { %1220 = vmatprep.subr.bf16.mxu0 %v8538_v54  ;;  %v724_v54 = vrot.slane %v534_v48, %v9391_v2 }
 0x301   :  { %1221 = vmatpush1.bf16.msra.mxu0 %v8536_v56  ;;  %v728_v56 = vrot.slane %v534_v48, %v9394_v3  ;;  %v1418_v48 = vld [vmem:[#allocation21 + $0x188] sm:$0xff] }
 0x302   :  { %3035 = vmatprep.subr.bf16.mxu0 %v7469_v0 }
 0x397   :  { %v661_v7 = vpop.f32.mrb[4].mxu0 }
 0x398   :  { %v662_v8 = vadd.f32 %v661_v7, %v540_v5  ;;  %v663_v9 = vpop.f32.mrb[5].mxu0 }
 0x399   :  { %v664_v10 = vadd.f32 %v663_v9, %v544_v6  ;;  %v665_v11 = vpop.f32.mrb[6].mxu0 }
 0x39a   :  { %v668_v12 = vrot.slane %v662_v8, 4  ;;  %v666_v13 = vpop.f32.mrb[7].mxu0 }
 0x39b   :  { %v674_v34 = vrot.slane %v664_v10, 4  ;;  %v1381_v13 = vld [vmem:[#allocation21 + $0x60] sm:$0xff] }
 0x39c   :  { %v669_v14 = vadd.f32 %v668_v12, %v662_v8  ;;  %v1377_v12 = vld [vmem:[#allocation21 + $0x40] sm:$0xff] }
 0x39d   :  { %v675_v15 = vadd.f32 %v674_v34, %v664_v10  ;;  %v1378_v34 = vld [vmem:[#allocation21 + $0x48] sm:$0xff] }
 0x39e   :  { %v670_v16 = vrot.slane %v669_v14, 2 }
 0x39f   :  { %v676_v17 = vrot.slane %v675_v15, 2 }
 0x3a0   :  { %v671_v18 = vadd.f32 %v670_v16, %v669_v14  ;;  %v7475_v14 = vcombine.high %v1377_v12, %v1381_v13  ;;  %v7474_v16 = vcombine.low %v1377_v12, %v1381_v13 }
 0x3a1   :  { %v677_v19 = vadd.f32 %v676_v17, %v675_v15  ;;  %v1382_v15 = vld [vmem:[#allocation21 + $0x68] sm:$0xff] }
 0x3a2   :  { %v672_v20 = vrot.slane %v671_v18, 1  ;;  %v7476_v17 = vcombine.low %v1378_v34, %v1382_v15 }
 0x3a3   :  { %v678_v21 = vrot.slane %v677_v19, 1 }
 0x3a4   :  { %v673_v22 = vadd.f32 %v672_v20, %v671_v18  ;;  %v7477_v18 = vcombine.high %v1378_v34, %v1382_v15  ;;  %v1389_v20 = vld [vmem:[#allocation21 + $0xa0] sm:$0xff] }
 0x3a5   :  { %v679_v23 = vadd.f32 %v678_v21, %v677_v19  ;;  %v1385_v19 = vld [vmem:[#allocation21 + $0x80] sm:$0xff] }
 0x3a6   :  { %v681_v24 = vmul.f32 0.125, %v673_v22  ;;  %v7483_v58 = vcombine.high %v1385_v19, %v1389_v20  ;;  %v7482_v21 = vcombine.low %v1385_v19, %v1389_v20  ;;  %v1397_v22 = vld [vmem:[#allocation21 + $0xe0] sm:$0xff] }
 0x3a7   :  { %v682_v25 = vmul.f32 0.125, %v679_v23  ;;  %v1394_v23 = vld [vmem:[#allocation21 + $0xc8] sm:$0xff]  ;;  %v1445_v15 = vld [vmem:[#allocation21 + $0x260] sm:$0xff] }
 0x3a8   :  { %v683_v26 = vsub.f32 %v662_v8, %v681_v24 }
 0x3a9   :  { %v684_v27 = vsub.f32 %v664_v10, %v682_v25  ;;  %v1398_v25 = vld [vmem:[#allocation21 + $0xe8] sm:$0xff] }
 0x3aa   :  { %v685_v28 = vmul.f32 %v683_v26, %v683_v26 }
 0x3ab   :  { %v686_v29 = vmul.f32 %v684_v27, %v684_v27 }
 0x3ac   :  { %v687_v30 = vrot.slane %v685_v28, 4 }
 0x3ad   :  { %v693_v31 = vrot.slane %v686_v29, 4 }
 0x3ae   :  { %v688_v32 = vadd.f32 %v687_v30, %v685_v28  ;;  %v7493_v28 = vcombine.high %v1394_v23, %v1398_v25  ;;  %v1405_v30 = vld [vmem:[#allocation21 + $0x120] sm:$0xff] }
 0x3af   :  { %v694_v33 = vadd.f32 %v693_v31, %v686_v29  ;;  %v1401_v29 = vld [vmem:[#allocation21 + $0x100] sm:$0xff]  ;;  %v1402_v31 = vld [vmem:[#allocation21 + $0x108] sm:$0xff] }
 0x3b0   :  { %v689_v35 = vrot.slane %v688_v32, 2 }
 0x3b1   :  { %v695_v36 = vrot.slane %v694_v33, 2 }
 0x3b2   :  { %v690_v37 = vadd.f32 %v689_v35, %v688_v32  ;;  %v7499_v32 = vcombine.high %v1401_v29, %v1405_v30  ;;  %v7498_v35 = vcombine.low %v1401_v29, %v1405_v30 }
 0x3b3   :  { %v696_v38 = vadd.f32 %v695_v36, %v694_v33  ;;  %v1406_v33 = vld [vmem:[#allocation21 + $0x128] sm:$0xff] }
 0x3b4   :  { %v691_v39 = vrot.slane %v690_v37, 1  ;;  %v7500_v36 = vcombine.low %v1402_v31, %v1406_v33 }
 0x3b5   :  { %v697_v40 = vrot.slane %v696_v38, 1 }
 0x3b6   :  { %v692_v41 = vadd.f32 %v691_v39, %v690_v37  ;;  %v7501_v37 = vcombine.high %v1402_v31, %v1406_v33  ;;  %v1413_v39 = vld [vmem:[#allocation21 + $0x160] sm:$0xff] }
 0x3b7   :  { %v698_v42 = vadd.f32 %v697_v40, %v696_v38  ;;  %v1409_v38 = vld [vmem:[#allocation21 + $0x140] sm:$0xff]  ;;  %v1410_v40 = vld [vmem:[#allocation21 + $0x148] sm:$0xff] }
 0x3b8   :  { %v699_v43 = vmul.f32 0.125, %v692_v41  ;;  %v7507_v41 = vcombine.high %v1409_v38, %v1413_v39  ;;  %v1469_v33 = vld [vmem:[#allocation21 + $0x320] sm:$0xff] }
 0x3b9   :  { %v700_v44 = vmul.f32 0.125, %v698_v42  ;;  %v1414_v42 = vld [vmem:[#allocation21 + $0x168] sm:$0xff] }
 0x3ba   :  { %v701_v45 = vadd.f32 0.8, %v699_v43  ;;  %v7506_v43 = vcombine.low %v1409_v38, %v1413_v39 }
 0x3bb   :  { %v702_v46 = vadd.f32 0.8, %v700_v44  ;;  %v7508_v44 = vcombine.low %v1410_v40, %v1414_v42 }
 0x3bc   :  { %8539 = vrsqrt.f32 %v701_v45  ;;  %v7509_v45 = vcombine.high %v1410_v40, %v1414_v42  ;;  %v1477_v42 = vld [vmem:[#allocation21 + $0x360] sm:$0xff] }
 0x3bd   :  { %8541 = vrsqrt.f32 %v702_v46  ;;  %v1417_v46 = vld [vmem:[#allocation21 + $0x180] sm:$0xff] }
 0x3c6   :  { %v8540_v50 = vpop.eup %8539 }
 0x3c7   :  { %v8542_v52 = vpop.eup %8541  ;;  %v705_v53 = vmul.f32 %v8540_v50, %v683_v26  ;;  %v1422_v50 = vld [vmem:[#allocation21 + $0x1a8] sm:$0xff] }
 0x3c8   :  { %v706_v55 = vmul.f32 %v8542_v52, %v684_v27  ;;  %v7492_v27 = vcombine.low %v1394_v23, %v1398_v25  ;;  %v7516_v52 = vcombine.low %v1418_v48, %v1422_v50  ;;  %v1461_v25 = vld [vmem:[#allocation21 + $0x2e0] sm:$0xff] }
 0x3c9   :  { %v718_v61 = vmul.f32 %v711_v49, %v705_v53  ;;  %v7515_v49 = vcombine.high %v1417_v46, %v1421_v47  ;;  %v7517_v53 = vcombine.high %v1418_v48, %v1422_v50  ;;  %v1485_v50 = vld [vmem:[#allocation21 + $0x3a0] sm:$0xff] }
 0x3ca   :  { %v719_v0 = vmul.f32 %v715_v51, %v706_v55  ;;  %v7514_v51 = vcombine.low %v1417_v46, %v1421_v47  ;;  %v1429_v55 = vld [vmem:[#allocation21 + $0x1e0] sm:$0xff] }
 0x3cb   :  { %v731_v4 = vadd.f32 %v724_v54, %v718_v61  ;;  %v1425_v54 = vld [vmem:[#allocation21 + $0x1c0] sm:$0xff] }
 0x3cc   :  { %v732_v5 = vadd.f32 %v728_v56, %v719_v0  ;;  %v1426_v56 = vld [vmem:[#allocation21 + $0x1c8] sm:$0xff]  ;;  %v7523_v61 = vcombine.high %v1425_v54, %v1429_v55 }
 0x3cd   :  { %vm733_vm6 = vcmp.gt.f32.partialorder %v731_v4, 0.0  ;;  %v735_v6 = vmul.f32 0.2, %v731_v4  ;;  %v1430_v0 = vld [vmem:[#allocation21 + $0x1e8] sm:$0xff] }
 0x3ce   :  { %vm734_vm7 = vcmp.gt.f32.partialorder %v732_v5, 0.0  ;;  %v736_v7 = vmul.f32 0.2, %v732_v5 }
 0x3cf   :  { %v737_v8 = vsel %vm733_vm6, %v731_v4, %v735_v6  ;;  %v7522_v4 = vcombine.low %v1425_v54, %v1429_v55  ;;  %v7525_v6 = vcombine.high %v1426_v56, %v1430_v0 }
 0x3d0   :  { %v738_v9 = vsel %vm734_vm7, %v732_v5, %v736_v7  ;;  %v806_v11 = vpack.c.bf16 %v737_v8, %v737_v8  ;;  %v7524_v5 = vcombine.low %v1426_v56, %v1430_v0  ;;  %v1433_v7 = vld [vmem:[#allocation21 + $0x200] sm:$0xff] }
 0x3d1   :  { %v807_v10 = vpack.c.bf16 %v738_v9, %v738_v9  ;;  %v1437_v8 = vld [vmem:[#allocation21 + $0x220] sm:$0xff]  ;;  %v1434_v9 = vld [vmem:[#allocation21 + $0x208] sm:$0xff] }
 0x3d2   :  { %v7530_v12 = vcombine.low %v1433_v7, %v1437_v8  ;;  %v1493_v0 = vld [vmem:[#allocation21 + $0x3e0] sm:$0xff] }
 0x3d3   :  { %1181 = vmatprep.mubr.bf16.mxu1 %v807_v10  ;;  %1222 = vmatprep.mubr.bf16.mxu0 %v807_v10  ;;  %v7531_v10 = vcombine.high %v1433_v7, %v1437_v8  ;;  %v1494_v7 = vld [vmem:[#allocation21 + $0x3e8] sm:$0xff] }
 0x3d4   :  { %1182 = vmatmul.mubr.bf16.vlgmr.msra.gmra.mrb[4].mxu1 %v806_v11  ;;  %1223 = vmatmul.mubr.bf16.vlgmr.msra.gmra.mrb[8].mxu0 %v806_v11  ;;  %v1438_v11 = vld [vmem:[#allocation21 + $0x228] sm:$0xff] }
 0x3d5   :  { %2954 = vmatpush1.bf16.msra.mxu1 %v7466_v60  ;;  %3036 = vmatpush1.bf16.msra.mxu0 %v7468_v63  ;;  %v1390_v60 = vld [vmem:[#allocation21 + $0xa8] sm:$0xff]  ;;  %v1393_v63 = vld [vmem:[#allocation21 + $0xc0] sm:$0xff]  ;;  %v7532_v13 = vcombine.low %v1434_v9, %v1438_v11  ;;  %v7533_v34 = vcombine.high %v1434_v9, %v1438_v11 }
 0x3d6   :  { %2955 = vmatprep.subr.bf16.mxu1 %v7475_v14  ;;  %3037 = vmatprep.subr.bf16.mxu0 %v7477_v18  ;;  %v7484_v59 = vcombine.low %v1386_v57, %v1390_v60  ;;  %v7485_v62 = vcombine.high %v1386_v57, %v1390_v60  ;;  %v7491_v24 = vcombine.high %v1393_v63, %v1397_v22  ;;  %v1441_v14 = vld [vmem:[#allocation21 + $0x240] sm:$0xff]  ;;  %v1446_v18 = vld [vmem:[#allocation21 + $0x268] sm:$0xff] }
 0x3d7   :  { %v7490_v26 = vcombine.low %v1393_v63, %v1397_v22  ;;  %v7538_v19 = vcombine.low %v1441_v14, %v1445_v15  ;;  %v1453_v60 = vld [vmem:[#allocation21 + $0x2a0] sm:$0xff] }
 0x3d8   :  { %v9410_v11 = vld [vmem:[#allocation21 + $0x420] sm:$0xff] }
 0x3d9   :  { %2956 = vmatpush1.bf16.msra.mxu1 %v7474_v16  ;;  %3038 = vmatpush1.bf16.msra.mxu0 %v7476_v17  ;;  %v1442_v16 = vld [vmem:[#allocation21 + $0x248] sm:$0xff]  ;;  %v7539_v17 = vcombine.high %v1441_v14, %v1445_v15 }
 0x3da   :  { %2957 = vmatprep.subr.bf16.mxu1 %v7483_v58  ;;  %3039 = vmatprep.subr.bf16.mxu0 %v7485_v62  ;;  %v7540_v20 = vcombine.low %v1442_v16, %v1446_v18  ;;  %v7541_v57 = vcombine.high %v1442_v16, %v1446_v18  ;;  %v1449_v58 = vld [vmem:[#allocation21 + $0x280] sm:$0xff]  ;;  %v1454_v62 = vld [vmem:[#allocation21 + $0x2a8] sm:$0xff]  ;;  %v803_v18 = vld [vmem:[#allocation16] sm:$0xf] }
 0x3db   :  { %v7546_v63 = vcombine.low %v1449_v58, %v1453_v60 }
 0x3dd   :  { %2958 = vmatpush1.bf16.msra.mxu1 %v7482_v21  ;;  %3040 = vmatpush1.bf16.msra.mxu0 %v7484_v59  ;;  %v1450_v21 = vld [vmem:[#allocation21 + $0x288] sm:$0xff]  ;;  %v7547_v59 = vcombine.high %v1449_v58, %v1453_v60  ;;  %v816_v58 = vrot.slane %v803_v18, %v9394_v3 }
 0x3de   :  { %2959 = vmatprep.subr.bf16.mxu1 %v7491_v24  ;;  %3041 = vmatprep.subr.bf16.mxu0 %v7493_v28  ;;  %v7548_v22 = vcombine.low %v1450_v21, %v1454_v62  ;;  %v7549_v23 = vcombine.high %v1450_v21, %v1454_v62  ;;  %v1457_v24 = vld [vmem:[#allocation21 + $0x2c0] sm:$0xff]  ;;  %v1462_v28 = vld [vmem:[#allocation21 + $0x2e8] sm:$0xff] }
 0x3df   :  { %v7554_v29 = vcombine.low %v1457_v24, %v1461_v25 }
 0x3e1   :  { %2960 = vmatpush1.bf16.msra.mxu1 %v7490_v26  ;;  %3042 = vmatpush1.bf16.msra.mxu0 %v7492_v27  ;;  %v1458_v26 = vld [vmem:[#allocation21 + $0x2c8] sm:$0xff]  ;;  %v7555_v27 = vcombine.high %v1457_v24, %v1461_v25 }
 0x3e2   :  { %2961 = vmatprep.subr.bf16.mxu1 %v7499_v32  ;;  %3043 = vmatprep.subr.bf16.mxu0 %v7501_v37  ;;  %v7556_v30 = vcombine.low %v1458_v26, %v1462_v28  ;;  %v7557_v31 = vcombine.high %v1458_v26, %v1462_v28  ;;  %v1465_v32 = vld [vmem:[#allocation21 + $0x300] sm:$0xff]  ;;  %v1470_v37 = vld [vmem:[#allocation21 + $0x328] sm:$0xff] }
 0x3e3   :  { %v7562_v38 = vcombine.low %v1465_v32, %v1469_v33 }
 0x3e5   :  { %2962 = vmatpush1.bf16.msra.mxu1 %v7498_v35  ;;  %3044 = vmatpush1.bf16.msra.mxu0 %v7500_v36  ;;  %v1466_v35 = vld [vmem:[#allocation21 + $0x308] sm:$0xff]  ;;  %v7563_v36 = vcombine.high %v1465_v32, %v1469_v33 }
 0x3e6   :  { %2963 = vmatprep.subr.bf16.mxu1 %v7507_v41  ;;  %3045 = vmatprep.subr.bf16.mxu0 %v7509_v45  ;;  %v7564_v39 = vcombine.low %v1466_v35, %v1470_v37  ;;  %v7565_v40 = vcombine.high %v1466_v35, %v1470_v37  ;;  %v1473_v41 = vld [vmem:[#allocation21 + $0x340] sm:$0xff]  ;;  %v1478_v45 = vld [vmem:[#allocation21 + $0x368] sm:$0xff] }
 0x3e7   :  { %v7570_v46 = vcombine.low %v1473_v41, %v1477_v42 }
 0x3e9   :  { %2964 = vmatpush1.bf16.msra.mxu1 %v7506_v43  ;;  %3046 = vmatpush1.bf16.msra.mxu0 %v7508_v44  ;;  %v1474_v43 = vld [vmem:[#allocation21 + $0x348] sm:$0xff]  ;;  %v7571_v44 = vcombine.high %v1473_v41, %v1477_v42 }
 0x3ea   :  { %2965 = vmatprep.subr.bf16.mxu1 %v7515_v49  ;;  %3047 = vmatprep.subr.bf16.mxu0 %v7517_v53  ;;  %v7572_v47 = vcombine.low %v1474_v43, %v1478_v45  ;;  %v7573_v48 = vcombine.high %v1474_v43, %v1478_v45  ;;  %v1481_v49 = vld [vmem:[#allocation21 + $0x380] sm:$0xff]  ;;  %v1486_v53 = vld [vmem:[#allocation21 + $0x3a8] sm:$0xff] }
 0x3eb   :  { %v7578_v54 = vcombine.low %v1481_v49, %v1485_v50 }
 0x3ed   :  { %2966 = vmatpush1.bf16.msra.mxu1 %v7514_v51  ;;  %3048 = vmatpush1.bf16.msra.mxu0 %v7516_v52  ;;  %v1482_v51 = vld [vmem:[#allocation21 + $0x388] sm:$0xff]  ;;  %v7579_v52 = vcombine.high %v1481_v49, %v1485_v50 }
 0x3ee   :  { %2967 = vmatprep.subr.bf16.mxu1 %v7523_v61  ;;  %3049 = vmatprep.subr.bf16.mxu0 %v7525_v6  ;;  %v7580_v55 = vcombine.low %v1482_v51, %v1486_v53  ;;  %v7581_v56 = vcombine.high %v1482_v51, %v1486_v53  ;;  %v1489_v61 = vld [vmem:[#allocation21 + $0x3c0] sm:$0xff] }
 0x3ef   :  { %v7587_v6 = vcombine.high %v1489_v61, %v1493_v0 }
 0x3f1   :  { %2968 = vmatpush1.bf16.msra.mxu1 %v7522_v4  ;;  %3050 = vmatpush1.bf16.msra.mxu0 %v7524_v5  ;;  %v1490_v4 = vld [vmem:[#allocation21 + $0x3c8] sm:$0xff]  ;;  %v7586_v5 = vcombine.low %v1489_v61, %v1493_v0 }
 0x3f2   :  { %2969 = vmatprep.subr.bf16.mxu1 %v7531_v10  ;;  %3051 = vmatprep.subr.bf16.mxu0 %v7533_v34  ;;  %v7588_v8 = vcombine.low %v1490_v4, %v1494_v7  ;;  %v7589_v9 = vcombine.high %v1490_v4, %v1494_v7  ;;  %v9408_v10 = vld [vmem:[#allocation21 + $0x400] sm:$0xff]  ;;  %v9416_v34 = vld [vmem:[#allocation21 + $0x428] sm:$0xff] }
 0x3f3   :  { %v7594_v14 = vcombine.low %v9408_v10, %v9410_v11 }
 0x3f5   :  { %2970 = vmatpush1.bf16.msra.mxu1 %v7530_v12  ;;  %3052 = vmatpush1.bf16.msra.mxu0 %v7532_v13  ;;  %v9412_v12 = vld [vmem:[#allocation21 + $0x408] sm:$0xff]  ;;  %v7595_v13 = vcombine.high %v9408_v10, %v9410_v11 }
 0x3f6   :  { %2971 = vmatprep.subr.bf16.mxu1 %v7539_v17  ;;  %3053 = vmatprep.subr.bf16.mxu0 %v7541_v57  ;;  %v7596_v15 = vcombine.low %v9412_v12, %v9416_v34  ;;  %v7597_v16 = vcombine.high %v9412_v12, %v9416_v34  ;;  %v9425_v17 = vsub.s32 2, %v9388_v1 }
 0x3f8   :  { %v820_v57 = vrot.slane %v803_v18, %v9425_v17 }
 0x3f9   :  { %2972 = vmatpush1.bf16.msra.mxu1 %v7538_v19  ;;  %3054 = vmatpush1.bf16.msra.mxu0 %v7540_v20  ;;  %v9428_v19 = vsub.s32 3, %v9388_v1  ;;  %v812_v20 = vrot.slane %v803_v18, %v9391_v2 }
 0x3fa   :  { %2973 = vmatprep.subr.bf16.mxu1 %v7547_v59  ;;  %3055 = vmatprep.subr.bf16.mxu0 %v7549_v23 }
 0x3fb   :  { %v824_v60 = vrot.slane %v803_v18, %v9428_v19 }
 0x3fd   :  { %2974 = vmatpush1.bf16.msra.mxu1 %v7546_v63  ;;  %3056 = vmatpush1.bf16.msra.mxu0 %v7548_v22 }
 0x3fe   :  { %2975 = vmatprep.subr.bf16.mxu1 %v7555_v27  ;;  %3057 = vmatprep.subr.bf16.mxu0 %v7557_v31 }
 0x401   :  { %2976 = vmatpush1.bf16.msra.mxu1 %v7554_v29  ;;  %3058 = vmatpush1.bf16.msra.mxu0 %v7556_v30 }
 0x402   :  { %2977 = vmatprep.subr.bf16.mxu1 %v7563_v36  ;;  %3059 = vmatprep.subr.bf16.mxu0 %v7565_v40 }
 0x405   :  { %2978 = vmatpush1.bf16.msra.mxu1 %v7562_v38  ;;  %3060 = vmatpush1.bf16.msra.mxu0 %v7564_v39 }
 0x406   :  { %2979 = vmatprep.subr.bf16.mxu1 %v7571_v44  ;;  %3061 = vmatprep.subr.bf16.mxu0 %v7573_v48 }
 0x409   :  { %2980 = vmatpush1.bf16.msra.mxu1 %v7570_v46  ;;  %3062 = vmatpush1.bf16.msra.mxu0 %v7572_v47 }
 0x40a   :  { %2981 = vmatprep.subr.bf16.mxu1 %v7579_v52  ;;  %3063 = vmatprep.subr.bf16.mxu0 %v7581_v56 }
 0x40d   :  { %2982 = vmatpush1.bf16.msra.mxu1 %v7578_v54  ;;  %3064 = vmatpush1.bf16.msra.mxu0 %v7580_v55 }
 0x40e   :  { %2983 = vmatprep.subr.bf16.mxu1 %v7587_v6  ;;  %3065 = vmatprep.subr.bf16.mxu0 %v7589_v9 }
 0x411   :  { %2984 = vmatpush1.bf16.msra.mxu1 %v7586_v5  ;;  %3066 = vmatpush1.bf16.msra.mxu0 %v7588_v8 }
 0x412   :  { %2994 = vmatprep.subr.bf16.mxu1 %v7595_v13  ;;  %3076 = vmatprep.subr.bf16.mxu0 %v7597_v16 }
 0x4a7   :  { %v1183_v21 = vpop.f32.mrb[4].mxu1  ;;  %v1224_v59 = vpop.f32.mrb[8].mxu0 }
 0x4a8   :  { %v1184_v62 = vadd.f32 %v1183_v21, %v812_v20  ;;  %v1225_v63 = vadd.f32 %v1224_v59, %v820_v57  ;;  %v1185_v22 = vpop.f32.mrb[5].mxu1  ;;  %v1226_v23 = vpop.f32.mrb[9].mxu0 }
 0x4a9   :  { %v1186_v24 = vadd.f32 %v1185_v22, %v816_v58  ;;  %v1227_v25 = vadd.f32 %v1226_v23, %v824_v60  ;;  %v1187_v26 = vpop.f32.mrb[6].mxu1  ;;  %v1228_v27 = vpop.f32.mrb[10].mxu0 }
 0x4aa   :  { %v1231_v28 = vrot.slane %v1184_v62, 4  ;;  %v1243_v29 = vrot.slane %v1225_v63, 4  ;;  %v1188_v30 = vpop.f32.mrb[7].mxu1  ;;  %v1229_v31 = vpop.f32.mrb[11].mxu0 }
 0x4ab   :  { %v1237_v32 = vrot.slane %v1186_v24, 4  ;;  %v1249_v33 = vrot.slane %v1227_v25, 4 }
 0x4ac   :  { %v1232_v35 = vadd.f32 %v1231_v28, %v1184_v62  ;;  %v1244_v36 = vadd.f32 %v1243_v29, %v1225_v63 }
 0x4ad   :  { %v1238_v37 = vadd.f32 %v1237_v32, %v1186_v24  ;;  %v1250_v38 = vadd.f32 %v1249_v33, %v1227_v25 }
 0x4ae   :  { %v1233_v39 = vrot.slane %v1232_v35, 2  ;;  %v1245_v40 = vrot.slane %v1244_v36, 2 }
 0x4af   :  { %v1239_v41 = vrot.slane %v1238_v37, 2  ;;  %v1251_v42 = vrot.slane %v1250_v38, 2 }
 0x4b0   :  { %v1234_v43 = vadd.f32 %v1233_v39, %v1232_v35  ;;  %v1246_v44 = vadd.f32 %v1245_v40, %v1244_v36 }
 0x4b1   :  { %v1240_v45 = vadd.f32 %v1239_v41, %v1238_v37  ;;  %v1252_v46 = vadd.f32 %v1251_v42, %v1250_v38 }
 0x4b2   :  { %v1235_v47 = vrot.slane %v1234_v43, 1  ;;  %v1247_v48 = vrot.slane %v1246_v44, 1 }
 0x4b3   :  { %v1241_v49 = vrot.slane %v1240_v45, 1  ;;  %v1253_v50 = vrot.slane %v1252_v46, 1 }
 0x4b4   :  { %v1236_v51 = vadd.f32 %v1235_v47, %v1234_v43  ;;  %v1248_v52 = vadd.f32 %v1247_v48, %v1246_v44  ;;  %v805_v47 = vld [vmem:[#allocation19] sm:$0xf] }
 0x4b5   :  { %v1242_v53 = vadd.f32 %v1241_v49, %v1240_v45  ;;  %v1254_v54 = vadd.f32 %v1253_v50, %v1252_v46  ;;  %v804_v46 = vld [vmem:[#allocation18] sm:$0xf] }
 0x4b6   :  { %v1255_v55 = vmul.f32 0.125, %v1236_v51  ;;  %v1257_v56 = vmul.f32 0.125, %v1248_v52  ;;  %v1311_v48 = vrot.slane %v804_v46, %v9391_v2  ;;  %v1319_v50 = vrot.slane %v804_v46, %v9425_v17 }
 0x4b7   :  { %v1256_v61 = vmul.f32 0.125, %v1242_v53  ;;  %v1258_v0 = vmul.f32 0.125, %v1254_v54  ;;  %v1336_v53 = vrot.slane %v805_v47, %v9391_v2  ;;  %v1315_v54 = vrot.slane %v804_v46, %v9394_v3 }
 0x4b8   :  { %v1259_v4 = vsub.f32 %v1184_v62, %v1255_v55  ;;  %v1261_v5 = vsub.f32 %v1225_v63, %v1257_v56 }
 0x4b9   :  { %v1260_v6 = vsub.f32 %v1186_v24, %v1256_v61  ;;  %v1262_v7 = vsub.f32 %v1227_v25, %v1258_v0  ;;  %v1344_v61 = vrot.slane %v805_v47, %v9425_v17  ;;  %v1323_v0 = vrot.slane %v804_v46, %v9428_v19  ;;  %v1530_v46 = vld [vmem:[#allocation21 + $0x508] sm:$0xff] }
 0x4ba   :  { %v1263_v8 = vmul.f32 %v1259_v4, %v1259_v4  ;;  %v1265_v9 = vmul.f32 %v1261_v5, %v1261_v5 }
 0x4bb   :  { %v1264_v13 = vmul.f32 %v1260_v6, %v1260_v6  ;;  %v1266_v16 = vmul.f32 %v1262_v7, %v1262_v7 }
 0x4bc   :  { %v1267_v18 = vrot.slane %v1263_v8, 4  ;;  %v1279_v20 = vrot.slane %v1265_v9, 4 }
 0x4bd   :  { %v1273_v57 = vrot.slane %v1264_v13, 4  ;;  %v1285_v58 = vrot.slane %v1266_v16, 4 }
 0x4be   :  { %v1268_v60 = vadd.f32 %v1267_v18, %v1263_v8  ;;  %v1280_v21 = vadd.f32 %v1279_v20, %v1265_v9 }
 0x4bf   :  { %v1274_v59 = vadd.f32 %v1273_v57, %v1264_v13  ;;  %v1286_v22 = vadd.f32 %v1285_v58, %v1266_v16  ;;  %v1340_v16 = vrot.slane %v805_v47, %v9394_v3  ;;  %v1348_v57 = vrot.slane %v805_v47, %v9428_v19  ;;  %v1534_v47 = vld [vmem:[#allocation21 + $0x528] sm:$0xff] }
 0x4c0   :  { %v1269_v23 = vrot.slane %v1268_v60, 2  ;;  %v1281_v26 = vrot.slane %v1280_v21, 2 }
 0x4c1   :  { %v1275_v27 = vrot.slane %v1274_v59, 2  ;;  %v1287_v28 = vrot.slane %v1286_v22, 2 }
 0x4c2   :  { %v1270_v62 = vadd.f32 %v1269_v23, %v1268_v60  ;;  %v1282_v63 = vadd.f32 %v1281_v26, %v1280_v21 }
 0x4c3   :  { %v1276_v24 = vadd.f32 %v1275_v27, %v1274_v59  ;;  %v1288_v25 = vadd.f32 %v1287_v28, %v1286_v22  ;;  %v1505_v27 = vld [vmem:[#allocation21 + $0x440] sm:$0xff] }
 0x4c4   :  { %v1271_v29 = vrot.slane %v1270_v62, 1  ;;  %v1283_v30 = vrot.slane %v1282_v63, 1 }
 0x4c5   :  { %v1277_v31 = vrot.slane %v1276_v24, 1  ;;  %v1289_v32 = vrot.slane %v1288_v25, 1 }
 0x4c6   :  { %v1272_v33 = vadd.f32 %v1271_v29, %v1270_v62  ;;  %v1284_v35 = vadd.f32 %v1283_v30, %v1282_v63  ;;  %v1509_v62 = vld [vmem:[#allocation21 + $0x460] sm:$0xff]  ;;  %v1510_v63 = vld [vmem:[#allocation21 + $0x468] sm:$0xff] }
 0x4c7   :  { %v1278_v36 = vadd.f32 %v1277_v31, %v1276_v24  ;;  %v1290_v37 = vadd.f32 %v1289_v32, %v1288_v25  ;;  %v1513_v30 = vld [vmem:[#allocation21 + $0x480] sm:$0xff]  ;;  %v7603_v31 = vcombine.high %v1505_v27, %v1509_v62 }
 0x4c8   :  { %v1291_v38 = vmul.f32 0.125, %v1272_v33  ;;  %v1293_v39 = vmul.f32 0.125, %v1284_v35  ;;  %v1517_v33 = vld [vmem:[#allocation21 + $0x4a0] sm:$0xff]  ;;  %v1514_v35 = vld [vmem:[#allocation21 + $0x488] sm:$0xff] }
 0x4c9   :  { %v1292_v40 = vmul.f32 0.125, %v1278_v36  ;;  %v1294_v41 = vmul.f32 0.125, %v1290_v37  ;;  %v1518_v36 = vld [vmem:[#allocation21 + $0x4a8] sm:$0xff]  ;;  %v7610_v10 = vcombine.low %v1513_v30, %v1517_v33 }
 0x4ca   :  { %v1295_v42 = vadd.f32 0.8, %v1291_v38  ;;  %v1297_v43 = vadd.f32 0.8, %v1293_v39  ;;  %v7602_v38 = vcombine.low %v1505_v27, %v1509_v62  ;;  %v7612_v11 = vcombine.low %v1514_v35, %v1518_v36  ;;  %v1565_v62 = vld [vmem:[#allocation21 + $0x620] sm:$0xff] }
 0x4cb   :  { %v1296_v44 = vadd.f32 0.8, %v1292_v40  ;;  %v1298_v45 = vadd.f32 0.8, %v1294_v41  ;;  %v7611_v40 = vcombine.high %v1513_v30, %v1517_v33  ;;  %v7613_v41 = vcombine.high %v1514_v35, %v1518_v36  ;;  %v1569_v33 = vld [vmem:[#allocation21 + $0x640] sm:$0xff]  ;;  %v1570_v36 = vld [vmem:[#allocation21 + $0x648] sm:$0xff] }
 0x4cc   :  { %8543 = vrsqrt.f32 %v1295_v42  ;;  %v1521_v42 = vld [vmem:[#allocation21 + $0x4c0] sm:$0xff] }
 0x4cd   :  { %8545 = vrsqrt.f32 %v1297_v43  ;;  %v1525_v43 = vld [vmem:[#allocation21 + $0x4e0] sm:$0xff] }
 0x4ce   :  { %8547 = vrsqrt.f32 %v1296_v44  ;;  %v1522_v44 = vld [vmem:[#allocation21 + $0x4c8] sm:$0xff]  ;;  %v7619_v12 = vcombine.high %v1521_v42, %v1525_v43  ;;  %v1573_v35 = vld [vmem:[#allocation21 + $0x660] sm:$0xff] }
 0x4cf   :  { %8549 = vrsqrt.f32 %v1298_v45  ;;  %v1526_v45 = vld [vmem:[#allocation21 + $0x4e8] sm:$0xff] }
 0x4d0   :  { %v7621_v34 = vcombine.high %v1522_v44, %v1526_v45 }
 0x4d6   :  { %v8544_v49 = vpop.eup %8543 }
 0x4d7   :  { %v8546_v51 = vpop.eup %8545  ;;  %v1303_v52 = vmul.f32 %v8544_v49, %v1259_v4  ;;  %v7620_v49 = vcombine.low %v1522_v44, %v1526_v45  ;;  %v1581_v44 = vld [vmem:[#allocation21 + $0x6a0] sm:$0xff]  ;;  %v1578_v45 = vld [vmem:[#allocation21 + $0x688] sm:$0xff] }
 0x4d8   :  { %v8548_v55 = vpop.eup %8547  ;;  %v1305_v56 = vmul.f32 %v8546_v51, %v1261_v5  ;;  %v7629_v51 = vcombine.high %v1530_v46, %v1534_v47 }
 0x4d9   :  { %v8550_v8 = vpop.eup %8549  ;;  %v1328_v9 = vmul.f32 %v1311_v48, %v1303_v52  ;;  %v1304_v13 = vmul.f32 %v8548_v55, %v1260_v6  ;;  %v7618_v48 = vcombine.low %v1521_v42, %v1525_v43  ;;  %v1537_v52 = vld [vmem:[#allocation21 + $0x540] sm:$0xff]  ;;  %v1542_v55 = vld [vmem:[#allocation21 + $0x568] sm:$0xff] }
 0x4da   :  { %v1330_v18 = vmul.f32 %v1319_v50, %v1305_v56  ;;  %v1306_v20 = vmul.f32 %v8550_v8, %v1262_v7  ;;  %v1506_v7 = vld [vmem:[#allocation21 + $0x448] sm:$0xff]  ;;  %v1577_v43 = vld [vmem:[#allocation21 + $0x680] sm:$0xff] }
 0x4db   :  { %v1353_v4 = vadd.f32 %v1336_v53, %v1328_v9  ;;  %v1329_v58 = vmul.f32 %v1315_v54, %v1304_v13  ;;  %v7605_v32 = vcombine.high %v1506_v7, %v1510_v63  ;;  %v7604_v39 = vcombine.low %v1506_v7, %v1510_v63  ;;  %v1541_v53 = vld [vmem:[#allocation21 + $0x560] sm:$0xff]  ;;  %v1538_v54 = vld [vmem:[#allocation21 + $0x548] sm:$0xff] }
 0x4dc   :  { %v9442_v60 = vadd.f32 %v1344_v61, %v1330_v18  ;;  %v1331_v21 = vmul.f32 %v1323_v0, %v1306_v20  ;;  %v7628_v61 = vcombine.low %v1530_v46, %v1534_v47  ;;  %v7635_v0 = vcombine.high %v1537_v52, %v1541_v53  ;;  %v1545_v9 = vld [vmem:[#allocation21 + $0x580] sm:$0xff]  ;;  %v1550_v18 = vld [vmem:[#allocation21 + $0x5a8] sm:$0xff] }
 0x4dd   :  { %v1354_v59 = vadd.f32 %v1340_v16, %v1329_v58  ;;  %vm1357_vm8 = vcmp.gt.f32.partialorder %v1353_v4, 0.0  ;;  %v1361_v5 = vmul.f32 0.2, %v1353_v4  ;;  %v7637_v8 = vcombine.high %v1538_v54, %v1542_v55  ;;  %v1549_v13 = vld [vmem:[#allocation21 + $0x5a0] sm:$0xff]  ;;  %v1546_v16 = vld [vmem:[#allocation21 + $0x588] sm:$0xff] }
 0x4de   :  { %v1356_v22 = vadd.f32 %v1348_v57, %v1331_v21  ;;  %v7634_v20 = vcombine.low %v1537_v52, %v1541_v53  ;;  %v7636_v57 = vcombine.low %v1538_v54, %v1542_v55  ;;  %v7645_v58 = vcombine.high %v1546_v16, %v1550_v18  ;;  %v1553_v21 = vld [vmem:[#allocation21 + $0x5c0] sm:$0xff]  ;;  %v1562_v7 = vld [vmem:[#allocation21 + $0x608] sm:$0xff] }
 0x4df   :  { %vm1358_vm9 = vcmp.gt.f32.partialorder %v1354_v59, 0.0  ;;  %v1362_v23 = vmul.f32 0.2, %v1354_v59  ;;  %v1365_v26 = vsel %vm1357_vm8, %v1353_v4, %v1361_v5  ;;  %v7643_v4 = vcombine.high %v1545_v9, %v1549_v13  ;;  %v1554_v5 = vld [vmem:[#allocation21 + $0x5c8] sm:$0xff]  ;;  %v1589_v46 = vld [vmem:[#allocation21 + $0x6e0] sm:$0xff] }
 0x4e0   :  { %vm1360_vm10 = vcmp.gt.f32.partialorder %v1356_v22, 0.0  ;;  %v1364_v6 = vmul.f32 0.2, %v1356_v22  ;;  %v9446_v29 = vpack.c.bf16 %v1365_v26, %v1365_v26  ;;  %v7644_v26 = vcombine.low %v1546_v16, %v1550_v18  ;;  %v1566_v63 = vld [vmem:[#allocation21 + $0x628] sm:$0xff]  ;;  %v1593_v53 = vld [vmem:[#allocation21 + $0x700] sm:$0xff] }
 0x4e1   :  { %v1366_v28 = vsel %vm1358_vm9, %v1354_v59, %v1362_v23  ;;  %v1557_v59 = vld [vmem:[#allocation21 + $0x5e0] sm:$0xff]  ;;  %v7642_v23 = vcombine.low %v1545_v9, %v1549_v13  ;;  %v1586_v47 = vld [vmem:[#allocation21 + $0x6c8] sm:$0xff]  ;;  %vm1359_vm11 = vcmp.gt.f32.partialorder %v9442_v60, 0.0 }
 0x4e2   :  { %v9444_v24 = vpack.c.bf16 %v1366_v28, %v1366_v28  ;;  %v1368_v25 = vsel %vm1360_vm10, %v1356_v22, %v1364_v6  ;;  %v1558_v22 = vld [vmem:[#allocation21 + $0x5e8] sm:$0xff]  ;;  %v7651_v6 = vcombine.high %v1553_v21, %v1557_v59  ;;  %v1561_v28 = vld [vmem:[#allocation21 + $0x600] sm:$0xff] }
 0x4e3   :  { %v9452_v37 = vpack.c.bf16 %v1368_v25, %v1368_v25  ;;  %v7653_v27 = vcombine.high %v1554_v5, %v1558_v22  ;;  %v7650_v25 = vcombine.low %v1553_v21, %v1557_v59  ;;  %v7652_v30 = vcombine.low %v1554_v5, %v1558_v22  ;;  %v1597_v54 = vld [vmem:[#allocation21 + $0x720] sm:$0xff]  ;;  %v1594_v55 = vld [vmem:[#allocation21 + $0x708] sm:$0xff] }
 0x4e4   :  { %2985 = vmatprep.mubr.bf16.mxu1 %v9444_v24  ;;  %3067 = vmatprep.mubr.bf16.mxu0 %v9444_v24  ;;  %v1601_v13 = vld [vmem:[#allocation21 + $0x740] sm:$0xff]  ;;  %v1602_v18 = vld [vmem:[#allocation21 + $0x748] sm:$0xff] }
 0x4e5   :  { %2986 = vmatmul.mubr.bf16.vlgmr.msra.gmra.mrb[8].mxu1 %v9446_v29  ;;  %3068 = vmatmul.mubr.bf16.vlgmr.msra.gmra.mrb[12].mxu0 %v9446_v29  ;;  %v1605_v16 = vld [vmem:[#allocation21 + $0x760] sm:$0xff]  ;;  %v1610_v22 = vld [vmem:[#allocation21 + $0x788] sm:$0xff] }
 0x4e6   :  { %2995 = vmatpush1.bf16.msra.mxu1 %v7594_v14  ;;  %3077 = vmatpush1.bf16.msra.mxu0 %v7596_v15  ;;  %v1529_v14 = vld [vmem:[#allocation21 + $0x500] sm:$0xff] }
 0x4e7   :  { %3026 = vmatprep.mubr.bf16.mxu1 %v9452_v37  ;;  %3108 = vmatprep.mubr.bf16.mxu0 %v9452_v37  ;;  %v1533_v15 = vld [vmem:[#allocation21 + $0x520] sm:$0xff] }
 0x4e8   :  { %2996 = vmatprep.subr.bf16.mxu1 %v7603_v31  ;;  %3078 = vmatprep.subr.bf16.mxu0 %v7605_v32  ;;  %v7627_v50 = vcombine.high %v1529_v14, %v1533_v15  ;;  %v7626_v56 = vcombine.low %v1529_v14, %v1533_v15  ;;  %v7659_v31 = vcombine.high %v1561_v28, %v1565_v62  ;;  %v1585_v15 = vld [vmem:[#allocation21 + $0x6c0] sm:$0xff] }
 0x4e9   :  { %v7661_v32 = vcombine.high %v1562_v7, %v1566_v63  ;;  %v1609_v59 = vld [vmem:[#allocation21 + $0x780] sm:$0xff] }
 0x4ea   :  { %2997 = vmatpush1.bf16.msra.mxu1 %v7602_v38  ;;  %3079 = vmatpush1.bf16.msra.mxu0 %v7604_v39  ;;  %v1574_v38 = vld [vmem:[#allocation21 + $0x668] sm:$0xff]  ;;  %v7658_v39 = vcombine.low %v1561_v28, %v1565_v62  ;;  %v1613_v5 = vld [vmem:[#allocation21 + $0x7a0] sm:$0xff] }
 0x4eb   :  { %2998 = vmatprep.subr.bf16.mxu1 %v7611_v40  ;;  %3080 = vmatprep.subr.bf16.mxu0 %v7613_v41  ;;  %v7660_v40 = vcombine.low %v1562_v7, %v1566_v63  ;;  %v7667_v41 = vcombine.high %v1569_v33, %v1573_v35  ;;  %v7669_v42 = vcombine.high %v1570_v36, %v1574_v38  ;;  %v1617_v62 = vld [vmem:[#allocation21 + $0x7c0] sm:$0xff]  ;;  %v1618_v63 = vld [vmem:[#allocation21 + $0x7c8] sm:$0xff] }
 0x4ec   :  { %v1621_v7 = vld [vmem:[#allocation21 + $0x7e0] sm:$0xff] }
 0x4ee   :  { %2999 = vmatpush1.bf16.msra.mxu1 %v7610_v10  ;;  %3081 = vmatpush1.bf16.msra.mxu0 %v7612_v11  ;;  %v1582_v10 = vld [vmem:[#allocation21 + $0x6a8] sm:$0xff]  ;;  %v7666_v11 = vcombine.low %v1569_v33, %v1573_v35  ;;  %v1371_v35 = vld [vmem:[#allocation21 + $0x10] sm:$0xff] }
 0x4ef   :  { %3000 = vmatprep.subr.bf16.mxu1 %v7619_v12  ;;  %3082 = vmatprep.subr.bf16.mxu0 %v7621_v34  ;;  %v7668_v12 = vcombine.low %v1570_v36, %v1574_v38  ;;  %v7675_v34 = vcombine.high %v1577_v43, %v1581_v44  ;;  %v7677_v14 = vcombine.high %v1578_v45, %v1582_v10  ;;  %v1363_v36 = vmul.f32 0.2, %v9442_v60  ;;  %v1375_v38 = vld [vmem:[#allocation21 + $0x30] sm:$0xff] }
 0x4f2   :  { %3001 = vmatpush1.bf16.msra.mxu1 %v7618_v48  ;;  %3083 = vmatpush1.bf16.msra.mxu0 %v7620_v49  ;;  %v1590_v48 = vld [vmem:[#allocation21 + $0x6e8] sm:$0xff]  ;;  %v7674_v49 = vcombine.low %v1577_v43, %v1581_v44  ;;  %v7471_v43 = vcombine.high %v1371_v35, %v1375_v38 }
 0x4f3   :  { %3002 = vmatprep.subr.bf16.mxu1 %v7627_v50  ;;  %3084 = vmatprep.subr.bf16.mxu0 %v7629_v51  ;;  %v7676_v50 = vcombine.low %v1578_v45, %v1582_v10  ;;  %v7683_v51 = vcombine.high %v1585_v15, %v1589_v46  ;;  %v7685_v52 = vcombine.high %v1586_v47, %v1590_v48  ;;  %v1379_v10 = vld [vmem:[#allocation21 + $0x50] sm:$0xff] }
 0x4f4   :  { %v1367_v45 = vsel %vm1359_vm11, %v9442_v60, %v1363_v36  ;;  %v1388_v60 = vld [vmem:[#allocation21 + $0x98] sm:$0xff] }
 0x4f6   :  { %3003 = vmatpush1.bf16.msra.mxu1 %v7626_v56  ;;  %3085 = vmatpush1.bf16.msra.mxu0 %v7628_v61  ;;  %v1598_v56 = vld [vmem:[#allocation21 + $0x728] sm:$0xff]  ;;  %v7682_v61 = vcombine.low %v1585_v15, %v1589_v46  ;;  %v9465_v15 = vpack.c.bf16 %v1367_v45, %v1367_v45 }
 0x4f7   :  { %3004 = vmatprep.subr.bf16.mxu1 %v7635_v0  ;;  %3086 = vmatprep.subr.bf16.mxu0 %v7637_v8  ;;  %v7684_v0 = vcombine.low %v1586_v47, %v1590_v48  ;;  %v7691_v8 = vcombine.high %v1593_v53, %v1597_v54  ;;  %v7693_v9 = vcombine.high %v1594_v55, %v1598_v56 }
 0x4fa   :  { %3005 = vmatpush1.bf16.msra.mxu1 %v7634_v20  ;;  %3087 = vmatpush1.bf16.msra.mxu0 %v7636_v57  ;;  %v1606_v20 = vld [vmem:[#allocation21 + $0x768] sm:$0xff]  ;;  %v7690_v57 = vcombine.low %v1593_v53, %v1597_v54 }
 0x4fb   :  { %3006 = vmatprep.subr.bf16.mxu1 %v7643_v4  ;;  %3088 = vmatprep.subr.bf16.mxu0 %v7645_v58  ;;  %v7692_v4 = vcombine.low %v1594_v55, %v1598_v56  ;;  %v7699_v58 = vcombine.high %v1601_v13, %v1605_v16  ;;  %v7701_v21 = vcombine.high %v1602_v18, %v1606_v20  ;;  %v1395_v56 = vld [vmem:[#allocation21 + $0xd0] sm:$0xff] }
 0x4fe   :  { %3007 = vmatpush1.bf16.msra.mxu1 %v7642_v23  ;;  %3089 = vmatpush1.bf16.msra.mxu0 %v7644_v26  ;;  %v1614_v23 = vld [vmem:[#allocation21 + $0x7a8] sm:$0xff]  ;;  %v7698_v26 = vcombine.low %v1601_v13, %v1605_v16 }
 0x4ff   :  { %3008 = vmatprep.subr.bf16.mxu1 %v7651_v6  ;;  %3090 = vmatprep.subr.bf16.mxu0 %v7653_v27  ;;  %v7700_v6 = vcombine.low %v1602_v18, %v1606_v20  ;;  %v7707_v27 = vcombine.high %v1609_v59, %v1613_v5  ;;  %v7709_v28 = vcombine.high %v1610_v22, %v1614_v23  ;;  %v1403_v20 = vld [vmem:[#allocation21 + $0x110] sm:$0xff] }
 0x502   :  { %3009 = vmatpush1.bf16.msra.mxu1 %v7650_v25  ;;  %3091 = vmatpush1.bf16.msra.mxu0 %v7652_v30  ;;  %v1622_v25 = vld [vmem:[#allocation21 + $0x7e8] sm:$0xff]  ;;  %v7706_v30 = vcombine.low %v1609_v59, %v1613_v5 }
 0x503   :  { %3010 = vmatprep.subr.bf16.mxu1 %v7659_v31  ;;  %3092 = vmatprep.subr.bf16.mxu0 %v7661_v32  ;;  %v7708_v31 = vcombine.low %v1610_v22, %v1614_v23  ;;  %v7715_v32 = vcombine.high %v1617_v62, %v1621_v7  ;;  %v7717_v33 = vcombine.high %v1618_v63, %v1622_v25  ;;  %v1411_v22 = vld [vmem:[#allocation21 + $0x150] sm:$0xff] }
 0x504   :  { %v1415_v23 = vld [vmem:[#allocation21 + $0x170] sm:$0xff] }
 0x506   :  { %3011 = vmatpush1.bf16.msra.mxu1 %v7658_v39  ;;  %3093 = vmatpush1.bf16.msra.mxu0 %v7660_v40  ;;  %v1372_v39 = vld [vmem:[#allocation21 + $0x18] sm:$0xff] }
 0x507   :  { %3012 = vmatprep.subr.bf16.mxu1 %v7667_v41  ;;  %3094 = vmatprep.subr.bf16.mxu0 %v7669_v42  ;;  %v1376_v40 = vld [vmem:[#allocation21 + $0x38] sm:$0xff]  ;;  %v7714_v41 = vcombine.low %v1617_v62, %v1621_v7  ;;  %v7716_v42 = vcombine.low %v1618_v63, %v1622_v25  ;;  %v7511_v62 = vcombine.high %v1411_v22, %v1415_v23  ;;  %v1419_v63 = vld [vmem:[#allocation21 + $0x190] sm:$0xff] }
 0x508   :  { %v7473_v44 = vcombine.high %v1372_v39, %v1376_v40  ;;  %v7472_v46 = vcombine.low %v1372_v39, %v1376_v40  ;;  %v1423_v25 = vld [vmem:[#allocation21 + $0x1b0] sm:$0xff]  ;;  %v1428_v40 = vld [vmem:[#allocation21 + $0x1d8] sm:$0xff] }
 0x509   :  { %v1431_v39 = vld [vmem:[#allocation21 + $0x1f0] sm:$0xff] }
 0x50a   :  { %3013 = vmatpush1.bf16.msra.mxu1 %v7666_v11  ;;  %3095 = vmatpush1.bf16.msra.mxu0 %v7668_v12  ;;  %v1383_v11 = vld [vmem:[#allocation21 + $0x70] sm:$0xff]  ;;  %v1380_v12 = vld [vmem:[#allocation21 + $0x58] sm:$0xff] }
 0x50b   :  { %3014 = vmatprep.subr.bf16.mxu1 %v7675_v34  ;;  %3096 = vmatprep.subr.bf16.mxu0 %v7677_v14  ;;  %v1384_v34 = vld [vmem:[#allocation21 + $0x78] sm:$0xff]  ;;  %v7470_v14 = vcombine.low %v1371_v35, %v1375_v38  ;;  %v7479_v47 = vcombine.high %v1379_v10, %v1383_v11  ;;  %v7519_v35 = vcombine.high %v1419_v63, %v1423_v25  ;;  %v1427_v38 = vld [vmem:[#allocation21 + $0x1d0] sm:$0xff] }
 0x50c   :  { %v7481_v48 = vcombine.high %v1380_v12, %v1384_v34  ;;  %v7480_v53 = vcombine.low %v1380_v12, %v1384_v34  ;;  %v1436_v12 = vld [vmem:[#allocation21 + $0x218] sm:$0xff] }
 0x50d   :  { %v1440_v34 = vld [vmem:[#allocation21 + $0x238] sm:$0xff] }
 0x50e   :  { %3015 = vmatpush1.bf16.msra.mxu1 %v7674_v49  ;;  %3097 = vmatpush1.bf16.msra.mxu0 %v7676_v50  ;;  %v1387_v49 = vld [vmem:[#allocation21 + $0x90] sm:$0xff] }
 0x50f   :  { %3016 = vmatprep.subr.bf16.mxu1 %v7683_v51  ;;  %3098 = vmatprep.subr.bf16.mxu0 %v7685_v52  ;;  %v1391_v50 = vld [vmem:[#allocation21 + $0xb0] sm:$0xff]  ;;  %v1392_v51 = vld [vmem:[#allocation21 + $0xb8] sm:$0xff]  ;;  %v7478_v52 = vcombine.low %v1379_v10, %v1383_v11 }
 0x510   :  { %v7487_v54 = vcombine.high %v1387_v49, %v1391_v50  ;;  %v7489_v55 = vcombine.high %v1388_v60, %v1392_v51  ;;  %v7488_v13 = vcombine.low %v1388_v60, %v1392_v51  ;;  %v1435_v10 = vld [vmem:[#allocation21 + $0x210] sm:$0xff]  ;;  %v1444_v60 = vld [vmem:[#allocation21 + $0x258] sm:$0xff] }
 0x511   :  { %v1439_v11 = vld [vmem:[#allocation21 + $0x230] sm:$0xff]  ;;  %v1448_v51 = vld [vmem:[#allocation21 + $0x278] sm:$0xff] }
 0x512   :  { %3017 = vmatpush1.bf16.msra.mxu1 %v7682_v61  ;;  %3099 = vmatpush1.bf16.msra.mxu0 %v7684_v0  ;;  %v1399_v61 = vld [vmem:[#allocation21 + $0xf0] sm:$0xff]  ;;  %v1396_v0 = vld [vmem:[#allocation21 + $0xd8] sm:$0xff] }
 0x513   :  { %3018 = vmatprep.subr.bf16.mxu1 %v7691_v8  ;;  %3100 = vmatprep.subr.bf16.mxu0 %v7693_v9  ;;  %v1400_v8 = vld [vmem:[#allocation21 + $0xf8] sm:$0xff]  ;;  %v7486_v9 = vcombine.low %v1387_v49, %v1391_v50  ;;  %v7495_v16 = vcombine.high %v1395_v56, %v1399_v61  ;;  %v1443_v49 = vld [vmem:[#allocation21 + $0x250] sm:$0xff] }
 0x514   :  { %v7497_v18 = vcombine.high %v1396_v0, %v1400_v8  ;;  %v1447_v50 = vld [vmem:[#allocation21 + $0x270] sm:$0xff] }
 0x516   :  { %3019 = vmatpush1.bf16.msra.mxu1 %v7690_v57  ;;  %3101 = vmatpush1.bf16.msra.mxu0 %v7692_v4  ;;  %v1407_v57 = vld [vmem:[#allocation21 + $0x130] sm:$0xff]  ;;  %v1408_v4 = vld [vmem:[#allocation21 + $0x138] sm:$0xff] }
 0x517   :  { %3020 = vmatprep.subr.bf16.mxu1 %v7699_v58  ;;  %3102 = vmatprep.subr.bf16.mxu0 %v7701_v21  ;;  %v7494_v58 = vcombine.low %v1395_v56, %v1399_v61  ;;  %v7496_v21 = vcombine.low %v1396_v0, %v1400_v8  ;;  %v7503_v59 = vcombine.high %v1403_v20, %v1407_v57  ;;  %v1451_v56 = vld [vmem:[#allocation21 + $0x290] sm:$0xff]  ;;  %v1452_v0 = vld [vmem:[#allocation21 + $0x298] sm:$0xff] }
 0x518   :  { %v1455_v61 = vld [vmem:[#allocation21 + $0x2b0] sm:$0xff]  ;;  %v1456_v8 = vld [vmem:[#allocation21 + $0x2b8] sm:$0xff] }
 0x51a   :  { %3021 = vmatpush1.bf16.msra.mxu1 %v7698_v26  ;;  %3103 = vmatpush1.bf16.msra.mxu0 %v7700_v6  ;;  %v1412_v26 = vld [vmem:[#allocation21 + $0x158] sm:$0xff] }
 0x51b   :  { %3022 = vmatprep.subr.bf16.mxu1 %v7707_v27  ;;  %3104 = vmatprep.subr.bf16.mxu0 %v7709_v28  ;;  %v1416_v6 = vld [vmem:[#allocation21 + $0x178] sm:$0xff]  ;;  %v7502_v27 = vcombine.low %v1403_v20, %v1407_v57  ;;  %v1459_v20 = vld [vmem:[#allocation21 + $0x2d0] sm:$0xff] }
 0x51c   :  { %v7513_v7 = vcombine.high %v1412_v26, %v1416_v6  ;;  %v1463_v57 = vld [vmem:[#allocation21 + $0x2f0] sm:$0xff] }
 0x51e   :  { %3023 = vmatpush1.bf16.msra.mxu1 %v7706_v30  ;;  %3105 = vmatpush1.bf16.msra.mxu0 %v7708_v31  ;;  %v1420_v30 = vld [vmem:[#allocation21 + $0x198] sm:$0xff] }
 0x51f   :  { %3024 = vmatprep.subr.bf16.mxu1 %v7715_v32  ;;  %3106 = vmatprep.subr.bf16.mxu0 %v7717_v33  ;;  %v1424_v31 = vld [vmem:[#allocation21 + $0x1b8] sm:$0xff]  ;;  %v7510_v32 = vcombine.low %v1411_v22, %v1415_v23  ;;  %v7512_v33 = vcombine.low %v1412_v26, %v1416_v6  ;;  %v1467_v22 = vld [vmem:[#allocation21 + $0x310] sm:$0xff] }
 0x520   :  { %v7521_v36 = vcombine.high %v1420_v30, %v1424_v31  ;;  %v1471_v23 = vld [vmem:[#allocation21 + $0x330] sm:$0xff]  ;;  %v1468_v26 = vld [vmem:[#allocation21 + $0x318] sm:$0xff] }
 0x521   :  { %v1472_v6 = vld [vmem:[#allocation21 + $0x338] sm:$0xff] }
 0x522   :  { %3025 = vmatpush1.bf16.msra.mxu1 %v7714_v41  ;;  %3107 = vmatpush1.bf16.msra.mxu0 %v7716_v42  ;;  %v1432_v41 = vld [vmem:[#allocation21 + $0x1f8] sm:$0xff]  ;;  %v7518_v42 = vcombine.low %v1419_v63, %v1423_v25  ;;  %v1475_v63 = vld [vmem:[#allocation21 + $0x350] sm:$0xff] }
 0x523   :  { %3117 = vmatprep.subr.bf16.mxu1 %v7471_v43  ;;  %3199 = vmatprep.subr.bf16.mxu0 %v7473_v44  ;;  %v7520_v43 = vcombine.low %v1420_v30, %v1424_v31  ;;  %v7527_v44 = vcombine.high %v1427_v38, %v1431_v39  ;;  %v7529_v45 = vcombine.high %v1428_v40, %v1432_v41  ;;  %v1479_v25 = vld [vmem:[#allocation21 + $0x370] sm:$0xff]  ;;  %v1476_v30 = vld [vmem:[#allocation21 + $0x358] sm:$0xff] }
 0x524   :  { %v1480_v31 = vld [vmem:[#allocation21 + $0x378] sm:$0xff] }
 0x525   :  { %3027 = vmatmul.mubr.bf16.vlgmr.msra.gmra.mrb[8].mxu1 %v9465_v15  ;;  %3109 = vmatmul.mubr.bf16.vlgmr.msra.gmra.mrb[12].mxu0 %v9465_v15 }
 0x526   :  { %3118 = vmatpush1.bf16.msra.mxu1 %v7470_v14  ;;  %3149 = vmatprep.mubr.bf16.mxu1 %v9444_v24  ;;  %v7526_v14 = vcombine.low %v1427_v38, %v1431_v39  ;;  %v1483_v38 = vld [vmem:[#allocation21 + $0x390] sm:$0xff] }
 0x527   :  { %3200 = vmatpush1.bf16.msra.mxu0 %v7472_v46  ;;  %3231 = vmatprep.mubr.bf16.mxu0 %v9444_v24  ;;  %v1404_v24 = vld [vmem:[#allocation21 + $0x118] sm:$0xff]  ;;  %v7528_v46 = vcombine.low %v1428_v40, %v1432_v41  ;;  %v1487_v39 = vld [vmem:[#allocation21 + $0x3b0] sm:$0xff] }
 0x528   :  { %3119 = vmatprep.subr.bf16.mxu1 %v7479_v47  ;;  %3201 = vmatprep.subr.bf16.mxu0 %v7481_v48  ;;  %v7505_v5 = vcombine.high %v1404_v24, %v1408_v4  ;;  %v7504_v28 = vcombine.low %v1404_v24, %v1408_v4  ;;  %v7535_v47 = vcombine.high %v1435_v10, %v1439_v11  ;;  %v1460_v24 = vld [vmem:[#allocation21 + $0x2d8] sm:$0xff] }
 0x529   :  { %v7537_v48 = vcombine.high %v1436_v12, %v1440_v34  ;;  %v1464_v4 = vld [vmem:[#allocation21 + $0x2f8] sm:$0xff] }
 0x52a   :  { %3120 = vmatpush1.bf16.msra.mxu1 %v7478_v52  ;;  %v7534_v52 = vcombine.low %v1435_v10, %v1439_v11  ;;  %v1484_v40 = vld [vmem:[#allocation21 + $0x398] sm:$0xff]  ;;  %v1491_v10 = vld [vmem:[#allocation21 + $0x3d0] sm:$0xff] }
 0x52b   :  { %3202 = vmatpush1.bf16.msra.mxu0 %v7480_v53  ;;  %3121 = vmatprep.subr.bf16.mxu1 %v7487_v54  ;;  %v7536_v53 = vcombine.low %v1436_v12, %v1440_v34  ;;  %v7543_v54 = vcombine.high %v1443_v49, %v1447_v50  ;;  %v1488_v41 = vld [vmem:[#allocation21 + $0x3b8] sm:$0xff]  ;;  %v1495_v11 = vld [vmem:[#allocation21 + $0x3f0] sm:$0xff] }
 0x52c   :  { %3203 = vmatprep.subr.bf16.mxu0 %v7489_v55  ;;  %v7545_v55 = vcombine.high %v1444_v60, %v1448_v51  ;;  %v1492_v12 = vld [vmem:[#allocation21 + $0x3d8] sm:$0xff] }
 0x52d   :  { %v1496_v34 = vld [vmem:[#allocation21 + $0x3f8] sm:$0xff] }
 0x52e   :  { %3122 = vmatpush1.bf16.msra.mxu1 %v7486_v9  ;;  %v7542_v9 = vcombine.low %v1443_v49, %v1447_v50  ;;  %v1499_v49 = vld [vmem:[#allocation21 + $0x410] sm:$0xff] }
 0x52f   :  { %3204 = vmatpush1.bf16.msra.mxu0 %v7488_v13  ;;  %3123 = vmatprep.subr.bf16.mxu1 %v7495_v16  ;;  %v7544_v13 = vcombine.low %v1444_v60, %v1448_v51  ;;  %v7551_v16 = vcombine.high %v1451_v56, %v1455_v61  ;;  %v1503_v50 = vld [vmem:[#allocation21 + $0x430] sm:$0xff]  ;;  %v1500_v60 = vld [vmem:[#allocation21 + $0x418] sm:$0xff] }
 0x530   :  { %3205 = vmatprep.subr.bf16.mxu0 %v7497_v18  ;;  %v7553_v18 = vcombine.high %v1452_v0, %v1456_v8  ;;  %v1504_v51 = vld [vmem:[#allocation21 + $0x438] sm:$0xff] }
 0x532   :  { %3124 = vmatpush1.bf16.msra.mxu1 %v7494_v58  ;;  %v7550_v58 = vcombine.low %v1451_v56, %v1455_v61  ;;  %v1507_v56 = vld [vmem:[#allocation21 + $0x450] sm:$0xff] }
 0x533   :  { %3206 = vmatpush1.bf16.msra.mxu0 %v7496_v21  ;;  %3125 = vmatprep.subr.bf16.mxu1 %v7503_v59  ;;  %v7552_v21 = vcombine.low %v1452_v0, %v1456_v8  ;;  %v7559_v59 = vcombine.high %v1459_v20, %v1463_v57  ;;  %v1511_v61 = vld [vmem:[#allocation21 + $0x470] sm:$0xff]  ;;  %v7598_v0 = vcombine.low %v1499_v49, %v1503_v50  ;;  %v1508_v8 = vld [vmem:[#allocation21 + $0x458] sm:$0xff] }
 0x534   :  { %3207 = vmatprep.subr.bf16.mxu0 %v7505_v5  ;;  %v7561_v5 = vcombine.high %v1460_v24, %v1464_v4 }
 0x536   :  { %3126 = vmatpush1.bf16.msra.mxu1 %v7502_v27  ;;  %v7558_v27 = vcombine.low %v1459_v20, %v1463_v57  ;;  %v1519_v20 = vld [vmem:[#allocation21 + $0x4b0] sm:$0xff] }
 0x537   :  { %3208 = vmatpush1.bf16.msra.mxu0 %v7504_v28  ;;  %3127 = vmatprep.subr.bf16.mxu1 %v7511_v62  ;;  %v7560_v28 = vcombine.low %v1460_v24, %v1464_v4  ;;  %v7567_v62 = vcombine.high %v1467_v22, %v1471_v23  ;;  %v1516_v24 = vld [vmem:[#allocation21 + $0x498] sm:$0xff] }
 0x538   :  { %3209 = vmatprep.subr.bf16.mxu0 %v7513_v7  ;;  %v7569_v7 = vcombine.high %v1468_v26, %v1472_v6  ;;  %v1520_v4 = vld [vmem:[#allocation21 + $0x4b8] sm:$0xff] }
 0x53a   :  { %3128 = vmatpush1.bf16.msra.mxu1 %v7510_v32  ;;  %v7566_v32 = vcombine.low %v1467_v22, %v1471_v23  ;;  %v1523_v22 = vld [vmem:[#allocation21 + $0x4d0] sm:$0xff] }
 0x53b   :  { %3210 = vmatpush1.bf16.msra.mxu0 %v7512_v33  ;;  %3129 = vmatprep.subr.bf16.mxu1 %v7519_v35  ;;  %v7568_v33 = vcombine.low %v1468_v26, %v1472_v6  ;;  %v7575_v35 = vcombine.high %v1475_v63, %v1479_v25  ;;  %v1527_v23 = vld [vmem:[#allocation21 + $0x4f0] sm:$0xff]  ;;  %v1524_v26 = vld [vmem:[#allocation21 + $0x4d8] sm:$0xff] }
 0x53c   :  { %3211 = vmatprep.subr.bf16.mxu0 %v7521_v36  ;;  %v7577_v36 = vcombine.high %v1476_v30, %v1480_v31  ;;  %v1528_v6 = vld [vmem:[#allocation21 + $0x4f8] sm:$0xff] }
 0x53e   :  { %3130 = vmatpush1.bf16.msra.mxu1 %v7518_v42  ;;  %v7574_v42 = vcombine.low %v1475_v63, %v1479_v25  ;;  %v1535_v63 = vld [vmem:[#allocation21 + $0x530] sm:$0xff]  ;;  %v1532_v25 = vld [vmem:[#allocation21 + $0x518] sm:$0xff] }
 0x53f   :  { %3212 = vmatpush1.bf16.msra.mxu0 %v7520_v43  ;;  %3131 = vmatprep.subr.bf16.mxu1 %v7527_v44  ;;  %v7576_v43 = vcombine.low %v1476_v30, %v1480_v31  ;;  %v7583_v44 = vcombine.high %v1483_v38, %v1487_v39  ;;  %v1536_v30 = vld [vmem:[#allocation21 + $0x538] sm:$0xff]  ;;  %v7624_v31 = vcombine.low %v1524_v26, %v1528_v6 }
 0x540   :  { %3213 = vmatprep.subr.bf16.mxu0 %v7529_v45  ;;  %v7585_v45 = vcombine.high %v1484_v40, %v1488_v41 }
 0x542   :  { %3132 = vmatpush1.bf16.msra.mxu1 %v7526_v14  ;;  %v7582_v14 = vcombine.low %v1483_v38, %v1487_v39  ;;  %v1540_v38 = vld [vmem:[#allocation21 + $0x558] sm:$0xff] }
 0x543   :  { %3214 = vmatpush1.bf16.msra.mxu0 %v7528_v46  ;;  %3133 = vmatprep.subr.bf16.mxu1 %v7535_v47  ;;  %v7584_v46 = vcombine.low %v1484_v40, %v1488_v41  ;;  %v7591_v47 = vcombine.high %v1491_v10, %v1495_v11  ;;  %v1544_v39 = vld [vmem:[#allocation21 + $0x578] sm:$0xff]  ;;  %v7632_v41 = vcombine.low %v1532_v25, %v1536_v30 }
 0x544   :  { %3215 = vmatprep.subr.bf16.mxu0 %v7537_v48  ;;  %v7593_v48 = vcombine.high %v1492_v12, %v1496_v34 }
 0x546   :  { %3134 = vmatpush1.bf16.msra.mxu1 %v7534_v52  ;;  %v7590_v52 = vcombine.low %v1491_v10, %v1495_v11  ;;  %v1548_v10 = vld [vmem:[#allocation21 + $0x598] sm:$0xff] }
 0x547   :  { %3216 = vmatpush1.bf16.msra.mxu0 %v7536_v53  ;;  %3135 = vmatprep.subr.bf16.mxu1 %v7543_v54  ;;  %v7592_v53 = vcombine.low %v1492_v12, %v1496_v34  ;;  %v7599_v54 = vcombine.high %v1499_v49, %v1503_v50  ;;  %v1552_v11 = vld [vmem:[#allocation21 + $0x5b8] sm:$0xff]  ;;  %v7640_v34 = vcombine.low %v1540_v38, %v1544_v39 }
 0x548   :  { %3217 = vmatprep.subr.bf16.mxu0 %v7545_v55  ;;  %v7601_v55 = vcombine.high %v1500_v60, %v1504_v51  ;;  %v1556_v49 = vld [vmem:[#allocation21 + $0x5d8] sm:$0xff] }
 0x549   :  { %v1560_v50 = vld [vmem:[#allocation21 + $0x5f8] sm:$0xff] }
 0x54a   :  { %3136 = vmatpush1.bf16.msra.mxu1 %v7542_v9  ;;  %v1512_v9 = vld [vmem:[#allocation21 + $0x478] sm:$0xff] }
 0x54b   :  { %3218 = vmatpush1.bf16.msra.mxu0 %v7544_v13  ;;  %3137 = vmatprep.subr.bf16.mxu1 %v7551_v16  ;;  %v7600_v13 = vcombine.low %v1500_v60, %v1504_v51  ;;  %v7607_v16 = vcombine.high %v1507_v56, %v1511_v61  ;;  %v7609_v57 = vcombine.high %v1508_v8, %v1512_v9 }
 0x54c   :  { %3219 = vmatprep.subr.bf16.mxu0 %v7553_v18  ;;  %v1515_v18 = vld [vmem:[#allocation21 + $0x490] sm:$0xff]  ;;  %v7648_v51 = vcombine.low %v1548_v10, %v1552_v11 }
 0x54e   :  { %3138 = vmatpush1.bf16.msra.mxu1 %v7550_v58  ;;  %v7606_v58 = vcombine.low %v1507_v56, %v1511_v61  ;;  %v1564_v56 = vld [vmem:[#allocation21 + $0x618] sm:$0xff] }
 0x54f   :  { %3220 = vmatpush1.bf16.msra.mxu0 %v7552_v21  ;;  %3139 = vmatprep.subr.bf16.mxu1 %v7559_v59  ;;  %v7608_v21 = vcombine.low %v1508_v8, %v1512_v9  ;;  %v7615_v59 = vcombine.high %v1515_v18, %v1519_v20  ;;  %v1568_v61 = vld [vmem:[#allocation21 + $0x638] sm:$0xff]  ;;  %v7656_v8 = vcombine.low %v1556_v49, %v1560_v50 }
 0x550   :  { %3221 = vmatprep.subr.bf16.mxu0 %v7561_v5  ;;  %v7617_v5 = vcombine.high %v1516_v24, %v1520_v4 }
 0x552   :  { %3140 = vmatpush1.bf16.msra.mxu1 %v7558_v27  ;;  %v7614_v27 = vcombine.low %v1515_v18, %v1519_v20  ;;  %v1575_v18 = vld [vmem:[#allocation21 + $0x670] sm:$0xff]  ;;  %v1572_v20 = vld [vmem:[#allocation21 + $0x658] sm:$0xff] }
 0x553   :  { %3222 = vmatpush1.bf16.msra.mxu0 %v7560_v28  ;;  %3141 = vmatprep.subr.bf16.mxu1 %v7567_v62  ;;  %v7623_v28 = vcombine.high %v1523_v22, %v1527_v23  ;;  %v7625_v62 = vcombine.high %v1524_v26, %v1528_v6 }
 0x554   :  { %3223 = vmatprep.subr.bf16.mxu0 %v7569_v7  ;;  %v1531_v7 = vld [vmem:[#allocation21 + $0x510] sm:$0xff] }
 0x555   :  { %v7630_v40 = vcombine.low %v1531_v7, %v1535_v63 }
 0x556   :  { %3142 = vmatpush1.bf16.msra.mxu1 %v7566_v32  ;;  %v7631_v32 = vcombine.high %v1531_v7, %v1535_v63  ;;  %v1588_v7 = vld [vmem:[#allocation21 + $0x6d8] sm:$0xff] }
 0x557   :  { %3224 = vmatpush1.bf16.msra.mxu0 %v7568_v33  ;;  %3143 = vmatprep.subr.bf16.mxu1 %v7575_v35  ;;  %v7633_v33 = vcombine.high %v1532_v25, %v1536_v30  ;;  %v1539_v35 = vld [vmem:[#allocation21 + $0x550] sm:$0xff]  ;;  %v1592_v63 = vld [vmem:[#allocation21 + $0x6f8] sm:$0xff] }
 0x558   :  { %3225 = vmatprep.subr.bf16.mxu0 %v7577_v36  ;;  %v1543_v36 = vld [vmem:[#allocation21 + $0x570] sm:$0xff] }
 0x559   :  { %v7638_v12 = vcombine.low %v1539_v35, %v1543_v36 }
 0x55a   :  { %3144 = vmatpush1.bf16.msra.mxu1 %v7574_v42  ;;  %v7639_v42 = vcombine.high %v1539_v35, %v1543_v36  ;;  %v1596_v35 = vld [vmem:[#allocation21 + $0x718] sm:$0xff] }
 0x55b   :  { %3226 = vmatpush1.bf16.msra.mxu0 %v7576_v43  ;;  %3145 = vmatprep.subr.bf16.mxu1 %v7583_v44  ;;  %v7641_v43 = vcombine.high %v1540_v38, %v1544_v39  ;;  %v1547_v44 = vld [vmem:[#allocation21 + $0x590] sm:$0xff]  ;;  %v1600_v36 = vld [vmem:[#allocation21 + $0x738] sm:$0xff]  ;;  %v7688_v39 = vcombine.low %v1588_v7, %v1592_v63 }
 0x55c   :  { %3227 = vmatprep.subr.bf16.mxu0 %v7585_v45  ;;  %v1551_v45 = vld [vmem:[#allocation21 + $0x5b0] sm:$0xff] }
 0x55d   :  { %v7646_v60 = vcombine.low %v1547_v44, %v1551_v45 }
 0x55e   :  { %3146 = vmatpush1.bf16.msra.mxu1 %v7582_v14  ;;  %v7647_v14 = vcombine.high %v1547_v44, %v1551_v45  ;;  %v1604_v44 = vld [vmem:[#allocation21 + $0x758] sm:$0xff] }
 0x55f   :  { %3228 = vmatpush1.bf16.msra.mxu0 %v7584_v46  ;;  %3147 = vmatprep.subr.bf16.mxu1 %v7591_v47  ;;  %v7649_v46 = vcombine.high %v1548_v10, %v1552_v11  ;;  %v1555_v47 = vld [vmem:[#allocation21 + $0x5d0] sm:$0xff]  ;;  %v1608_v45 = vld [vmem:[#allocation21 + $0x778] sm:$0xff]  ;;  %v7696_v11 = vcombine.low %v1596_v35, %v1600_v36 }
 0x560   :  { %3229 = vmatprep.subr.bf16.mxu0 %v7593_v48  ;;  %v1559_v48 = vld [vmem:[#allocation21 + $0x5f0] sm:$0xff] }
 0x562   :  { %3148 = vmatpush1.bf16.msra.mxu1 %v7590_v52  ;;  %v7655_v52 = vcombine.high %v1555_v47, %v1559_v48 }
 0x563   :  { %3230 = vmatpush1.bf16.msra.mxu0 %v7592_v53  ;;  %3158 = vmatprep.subr.bf16.mxu1 %v7599_v54  ;;  %v7657_v53 = vcombine.high %v1556_v49, %v1560_v50  ;;  %v1563_v54 = vld [vmem:[#allocation21 + $0x610] sm:$0xff]  ;;  %v7704_v50 = vcombine.low %v1604_v44, %v1608_v45 }
 0x564   :  { %3240 = vmatprep.subr.bf16.mxu0 %v7601_v55  ;;  %v1567_v55 = vld [vmem:[#allocation21 + $0x630] sm:$0xff] }
 0x565   :  { %3150 = vmatmul.mubr.bf16.vlgmr.msra.gmra.mrb[12].mxu1 %v9446_v29  ;;  %v7663_v9 = vcombine.high %v1563_v54, %v1567_v55 }
 0x566   :  { %3232 = vmatmul.mubr.bf16.vlgmr.msra.gmra.mrb[16].mxu0 %v9446_v29  ;;  %3159 = vmatpush1.bf16.msra.mxu1 %v7598_v0  ;;  %v7616_v29 = vcombine.low %v1516_v24, %v1520_v4  ;;  %v7654_v0 = vcombine.low %v1555_v47, %v1559_v48  ;;  %v7662_v24 = vcombine.low %v1563_v54, %v1567_v55  ;;  %v1612_v47 = vld [vmem:[#allocation21 + $0x798] sm:$0xff] }
 0x567   :  { %3190 = vmatprep.mubr.bf16.mxu1 %v9452_v37  ;;  %3241 = vmatpush1.bf16.msra.mxu0 %v7600_v13  ;;  %v7665_v13 = vcombine.high %v1564_v56, %v1568_v61  ;;  %v7664_v4 = vcombine.low %v1564_v56, %v1568_v61  ;;  %v1616_v48 = vld [vmem:[#allocation21 + $0x7b8] sm:$0xff] }
 0x568   :  { %3272 = vmatprep.mubr.bf16.mxu0 %v9452_v37  ;;  %3160 = vmatprep.subr.bf16.mxu1 %v7607_v16  ;;  %v7622_v37 = vcombine.low %v1523_v22, %v1527_v23  ;;  %v1571_v16 = vld [vmem:[#allocation21 + $0x650] sm:$0xff]  ;;  %v1580_v22 = vld [vmem:[#allocation21 + $0x698] sm:$0xff]  ;;  %v7712_v61 = vcombine.low %v1612_v47, %v1616_v48 }
 0x569   :  { %3242 = vmatprep.subr.bf16.mxu0 %v7609_v57  ;;  %v1576_v57 = vld [vmem:[#allocation21 + $0x678] sm:$0xff]  ;;  %v7670_v26 = vcombine.low %v1571_v16, %v1575_v18 }
 0x56a   :  { %3161 = vmatpush1.bf16.msra.mxu1 %v7606_v58  ;;  %v7671_v58 = vcombine.high %v1571_v16, %v1575_v18  ;;  %v1584_v23 = vld [vmem:[#allocation21 + $0x6b8] sm:$0xff]  ;;  %v7672_v6 = vcombine.low %v1572_v20, %v1576_v57  ;;  %v3564_v16 = vld [vmem:[#allocation27 + $0x8] sm:$0xff] }
 0x56b   :  { %3243 = vmatpush1.bf16.msra.mxu0 %v7608_v21  ;;  %3162 = vmatprep.subr.bf16.mxu1 %v7615_v59  ;;  %v7673_v21 = vcombine.high %v1572_v20, %v1576_v57  ;;  %v1579_v59 = vld [vmem:[#allocation21 + $0x690] sm:$0xff]  ;;  %v7680_v30 = vcombine.low %v1580_v22, %v1584_v23  ;;  %v1620_v54 = vld [vmem:[#allocation21 + $0x7d8] sm:$0xff]  ;;  %v3568_v18 = vld [vmem:[#allocation27 + $0x28] sm:$0xff] }
 0x56c   :  { %3244 = vmatprep.subr.bf16.mxu0 %v7617_v5  ;;  %v1583_v5 = vld [vmem:[#allocation21 + $0x6b0] sm:$0xff]  ;;  %v1624_v55 = vld [vmem:[#allocation21 + $0x7f8] sm:$0xff] }
 0x56d   :  { %v7678_v25 = vcombine.low %v1579_v59, %v1583_v5  ;;  %v7720_v57 = vcombine.low %v1620_v54, %v1624_v55 }
 0x56e   :  { %3163 = vmatpush1.bf16.msra.mxu1 %v7614_v27  ;;  %v7679_v27 = vcombine.high %v1579_v59, %v1583_v5  ;;  %v3572_v59 = vld [vmem:[#allocation27 + $0x48] sm:$0xff] }
 0x56f   :  { %3245 = vmatpush1.bf16.msra.mxu0 %v7616_v29  ;;  %3164 = vmatprep.subr.bf16.mxu1 %v7623_v28  ;;  %v7681_v29 = vcombine.high %v1580_v22, %v1584_v23  ;;  %v1587_v28 = vld [vmem:[#allocation21 + $0x6d0] sm:$0xff]  ;;  %v3576_v5 = vld [vmem:[#allocation27 + $0x68] sm:$0xff]  ;;  %v7724_v23 = vcombine.low %v3564_v16, %v3568_v18 }
 0x570   :  { %3246 = vmatprep.subr.bf16.mxu0 %v7625_v62  ;;  %v1591_v62 = vld [vmem:[#allocation21 + $0x6f0] sm:$0xff] }
 0x571   :  { %v7686_v38 = vcombine.low %v1587_v28, %v1591_v62 }
 0x572   :  { %3165 = vmatpush1.bf16.msra.mxu1 %v7622_v37  ;;  %v7687_v37 = vcombine.high %v1587_v28, %v1591_v62  ;;  %v3580_v28 = vld [vmem:[#allocation27 + $0x88] sm:$0xff] }
 0x573   :  { %3247 = vmatpush1.bf16.msra.mxu0 %v7624_v31  ;;  %3166 = vmatprep.subr.bf16.mxu1 %v7631_v32  ;;  %v7689_v31 = vcombine.high %v1588_v7, %v1592_v63  ;;  %v1595_v32 = vld [vmem:[#allocation21 + $0x710] sm:$0xff]  ;;  %v3584_v62 = vld [vmem:[#allocation27 + $0xa8] sm:$0xff]  ;;  %v7732_v63 = vcombine.low %v3572_v59, %v3576_v5 }
 0x574   :  { %3248 = vmatprep.subr.bf16.mxu0 %v7633_v33  ;;  %v1599_v33 = vld [vmem:[#allocation21 + $0x730] sm:$0xff] }
 0x575   :  { %v7694_v10 = vcombine.low %v1595_v32, %v1599_v33 }
 0x576   :  { %3167 = vmatpush1.bf16.msra.mxu1 %v7630_v40  ;;  %v7695_v40 = vcombine.high %v1595_v32, %v1599_v33  ;;  %v3588_v32 = vld [vmem:[#allocation27 + $0xc8] sm:$0xff] }
 0x577   :  { %3249 = vmatpush1.bf16.msra.mxu0 %v7632_v41  ;;  %3168 = vmatprep.subr.bf16.mxu1 %v7639_v42  ;;  %v7697_v41 = vcombine.high %v1596_v35, %v1600_v36  ;;  %v1603_v42 = vld [vmem:[#allocation21 + $0x750] sm:$0xff]  ;;  %v3592_v33 = vld [vmem:[#allocation27 + $0xe8] sm:$0xff]  ;;  %v7740_v36 = vcombine.low %v3580_v28, %v3584_v62 }
 0x578   :  { %3250 = vmatprep.subr.bf16.mxu0 %v7641_v43  ;;  %v1607_v43 = vld [vmem:[#allocation21 + $0x770] sm:$0xff] }
 0x579   :  { %v7702_v49 = vcombine.low %v1603_v42, %v1607_v43 }
 0x57a   :  { %3169 = vmatpush1.bf16.msra.mxu1 %v7638_v12  ;;  %v7703_v12 = vcombine.high %v1603_v42, %v1607_v43  ;;  %v3600_v42 = vld [vmem:[#allocation27 + $0x128] sm:$0xff] }
 0x57b   :  { %3251 = vmatpush1.bf16.msra.mxu0 %v7640_v34  ;;  %3170 = vmatprep.subr.bf16.mxu1 %v7647_v14  ;;  %v7705_v34 = vcombine.high %v1604_v44, %v1608_v45  ;;  %v1611_v14 = vld [vmem:[#allocation21 + $0x790] sm:$0xff]  ;;  %v7748_v44 = vcombine.low %v3588_v32, %v3592_v33 }
 0x57c   :  { %3252 = vmatprep.subr.bf16.mxu0 %v7649_v46  ;;  %v1615_v46 = vld [vmem:[#allocation21 + $0x7b0] sm:$0xff] }
 0x57d   :  { %v7710_v56 = vcombine.low %v1611_v14, %v1615_v46 }
 0x57e   :  { %3171 = vmatpush1.bf16.msra.mxu1 %v7646_v60  ;;  %v7711_v60 = vcombine.high %v1611_v14, %v1615_v46  ;;  %v3608_v14 = vld [vmem:[#allocation27 + $0x168] sm:$0xff] }
 0x57f   :  { %3253 = vmatpush1.bf16.msra.mxu0 %v7648_v51  ;;  %3172 = vmatprep.subr.bf16.mxu1 %v7655_v52  ;;  %v7713_v51 = vcombine.high %v1612_v47, %v1616_v48  ;;  %v1619_v52 = vld [vmem:[#allocation21 + $0x7d0] sm:$0xff] }
 0x580   :  { %3254 = vmatprep.subr.bf16.mxu0 %v7657_v53  ;;  %v1623_v53 = vld [vmem:[#allocation21 + $0x7f0] sm:$0xff] }
 0x581   :  { %v7718_v20 = vcombine.low %v1619_v52, %v1623_v53 }
 0x582   :  { %3173 = vmatpush1.bf16.msra.mxu1 %v7654_v0  ;;  %v7719_v0 = vcombine.high %v1619_v52, %v1623_v53  ;;  %v3611_v52 = vld [vmem:[#allocation27 + $0x180] sm:$0xff] }
 0x583   :  { %3255 = vmatpush1.bf16.msra.mxu0 %v7656_v8  ;;  %3174 = vmatprep.subr.bf16.mxu1 %v7663_v9  ;;  %v7721_v8 = vcombine.high %v1620_v54, %v1624_v55  ;;  %v3563_v9 = vld [vmem:[#allocation27] sm:$0xff]  ;;  %v9483_v54 = vld [vmem:[#allocation27 + $0x428] sm:$0xff] }
 0x584   :  { %3256 = vmatprep.subr.bf16.mxu0 %v7665_v13  ;;  %v3567_v13 = vld [vmem:[#allocation27 + $0x20] sm:$0xff]  ;;  %v3612_v55 = vld [vmem:[#allocation27 + $0x188] sm:$0xff] }
 0x585   :  { %v7722_v22 = vcombine.low %v3563_v9, %v3567_v13  ;;  %v3615_v53 = vld [vmem:[#allocation27 + $0x1a0] sm:$0xff] }
 0x586   :  { %3175 = vmatpush1.bf16.msra.mxu1 %v7662_v24  ;;  %v7723_v24 = vcombine.high %v3563_v9, %v3567_v13  ;;  %v7771_v13 = vcombine.high %v3611_v52, %v3615_v53 }
 0x587   :  { %3257 = vmatpush1.bf16.msra.mxu0 %v7664_v4  ;;  %3176 = vmatprep.subr.bf16.mxu1 %v7671_v58  ;;  %v7725_v4 = vcombine.high %v3564_v16, %v3568_v18  ;;  %v3571_v58 = vld [vmem:[#allocation27 + $0x40] sm:$0xff] }
 0x588   :  { %3258 = vmatprep.subr.bf16.mxu0 %v7673_v21  ;;  %v3575_v21 = vld [vmem:[#allocation27 + $0x60] sm:$0xff] }
 0x589   :  { %v7730_v7 = vcombine.low %v3571_v58, %v3575_v21  ;;  %v3619_v18 = vld [vmem:[#allocation27 + $0x1c0] sm:$0xff] }
 0x58a   :  { %3177 = vmatpush1.bf16.msra.mxu1 %v7670_v26  ;;  %v7731_v26 = vcombine.high %v3571_v58, %v3575_v21 }
 0x58b   :  { %3259 = vmatpush1.bf16.msra.mxu0 %v7672_v6  ;;  %3178 = vmatprep.subr.bf16.mxu1 %v7679_v27  ;;  %v7733_v6 = vcombine.high %v3572_v59, %v3576_v5  ;;  %v3579_v27 = vld [vmem:[#allocation27 + $0x80] sm:$0xff] }
 0x58c   :  { %3260 = vmatprep.subr.bf16.mxu0 %v7681_v29  ;;  %v3583_v29 = vld [vmem:[#allocation27 + $0xa0] sm:$0xff] }
 0x58d   :  { %v7738_v35 = vcombine.low %v3579_v27, %v3583_v29  ;;  %v3627_v5 = vld [vmem:[#allocation27 + $0x200] sm:$0xff] }
 0x58e   :  { %3179 = vmatpush1.bf16.msra.mxu1 %v7678_v25  ;;  %v7739_v25 = vcombine.high %v3579_v27, %v3583_v29 }
 0x58f   :  { %3261 = vmatpush1.bf16.msra.mxu0 %v7680_v30  ;;  %3180 = vmatprep.subr.bf16.mxu1 %v7687_v37  ;;  %v7741_v30 = vcombine.high %v3580_v28, %v3584_v62  ;;  %v3587_v37 = vld [vmem:[#allocation27 + $0xc0] sm:$0xff] }
 0x590   :  { %3262 = vmatprep.subr.bf16.mxu0 %v7689_v31  ;;  %v3591_v31 = vld [vmem:[#allocation27 + $0xe0] sm:$0xff] }
 0x591   :  { %v7746_v43 = vcombine.low %v3587_v37, %v3591_v31  ;;  %v3635_v62 = vld [vmem:[#allocation27 + $0x240] sm:$0xff] }
 0x592   :  { %3181 = vmatpush1.bf16.msra.mxu1 %v7686_v38  ;;  %v7747_v38 = vcombine.high %v3587_v37, %v3591_v31 }
 0x593   :  { %3263 = vmatpush1.bf16.msra.mxu0 %v7688_v39  ;;  %3182 = vmatprep.subr.bf16.mxu1 %v7695_v40  ;;  %v3595_v39 = vld [vmem:[#allocation27 + $0x100] sm:$0xff] }
 0x594   :  { %3264 = vmatprep.subr.bf16.mxu0 %v7697_v41  ;;  %v3599_v40 = vld [vmem:[#allocation27 + $0x120] sm:$0xff]  ;;  %v3596_v41 = vld [vmem:[#allocation27 + $0x108] sm:$0xff] }
 0x595   :  { %v7755_v45 = vcombine.high %v3595_v39, %v3599_v40  ;;  %v7754_v46 = vcombine.low %v3595_v39, %v3599_v40  ;;  %v7756_v47 = vcombine.low %v3596_v41, %v3600_v42 }
 0x596   :  { %3183 = vmatpush1.bf16.msra.mxu1 %v7694_v10  ;;  %v7757_v10 = vcombine.high %v3596_v41, %v3600_v42  ;;  %v3651_v42 = vld [vmem:[#allocation27 + $0x2c0] sm:$0xff] }
 0x597   :  { %3265 = vmatpush1.bf16.msra.mxu0 %v7696_v11  ;;  %3184 = vmatprep.subr.bf16.mxu1 %v7703_v12  ;;  %v3603_v11 = vld [vmem:[#allocation27 + $0x140] sm:$0xff] }
 0x598   :  { %3266 = vmatprep.subr.bf16.mxu0 %v7705_v34  ;;  %v3607_v12 = vld [vmem:[#allocation27 + $0x160] sm:$0xff]  ;;  %v3604_v34 = vld [vmem:[#allocation27 + $0x148] sm:$0xff] }
 0x599   :  { %v7763_v48 = vcombine.high %v3603_v11, %v3607_v12  ;;  %v7764_v9 = vcombine.low %v3604_v34, %v3608_v14 }
 0x59a   :  { %3185 = vmatpush1.bf16.msra.mxu1 %v7702_v49  ;;  %v9477_v49 = vld [vmem:[#allocation27 + $0x400] sm:$0xff] }
 0x59b   :  { %3267 = vmatpush1.bf16.msra.mxu0 %v7704_v50  ;;  %3186 = vmatprep.subr.bf16.mxu1 %v7711_v60  ;;  %v9479_v50 = vld [vmem:[#allocation27 + $0x420] sm:$0xff]  ;;  %v9481_v60 = vld [vmem:[#allocation27 + $0x408] sm:$0xff] }
 0x59c   :  { %3268 = vmatprep.subr.bf16.mxu0 %v7713_v51  ;;  %v7765_v51 = vcombine.high %v3604_v34, %v3608_v14  ;;  %v3659_v14 = vld [vmem:[#allocation27 + $0x300] sm:$0xff] }
 0x59e   :  { %3187 = vmatpush1.bf16.msra.mxu1 %v7710_v56  ;;  %v3616_v56 = vld [vmem:[#allocation27 + $0x1a8] sm:$0xff] }
 0x59f   :  { %3269 = vmatpush1.bf16.msra.mxu0 %v7712_v61  ;;  %3188 = vmatprep.subr.bf16.mxu1 %v7719_v0  ;;  %v7850_v61 = vcombine.low %v9477_v49, %v9479_v50  ;;  %v7852_v0 = vcombine.low %v9481_v60, %v9483_v54  ;;  %v7773_v16 = vcombine.high %v3612_v55, %v3616_v56 }
 0x5a0   :  { %3270 = vmatprep.subr.bf16.mxu0 %v7721_v8  ;;  %v7762_v8 = vcombine.low %v3603_v11, %v3607_v12  ;;  %v7772_v58 = vcombine.low %v3612_v55, %v3616_v56  ;;  %v3667_v56 = vld [vmem:[#allocation27 + $0x340] sm:$0xff] }
 0x5a2   :  { %3189 = vmatpush1.bf16.msra.mxu1 %v7718_v20  ;;  %v3623_v20 = vld [vmem:[#allocation27 + $0x1e0] sm:$0xff] }
 0x5a3   :  { %3271 = vmatpush1.bf16.msra.mxu0 %v7720_v57  ;;  %6677 = vmatprep.subr.bf16.mxu1 %v7723_v24  ;;  %v3620_v57 = vld [vmem:[#allocation27 + $0x1c8] sm:$0xff]  ;;  %v7779_v21 = vcombine.high %v3619_v18, %v3623_v20 }
 0x5a4   :  { %6841 = vmatprep.subr.bf16.mxu0 %v7725_v4  ;;  %v3624_v24 = vld [vmem:[#allocation27 + $0x1e8] sm:$0xff]  ;;  %v7770_v4 = vcombine.low %v3611_v52, %v3615_v53 }
 0x5a5   :  { %3191 = vmatmul.mubr.bf16.vlgmr.msra.gmra.mrb[12].mxu1 %v9465_v15  ;;  %v7781_v59 = vcombine.high %v3620_v57, %v3624_v24  ;;  %v7780_v27 = vcombine.low %v3620_v57, %v3624_v24  ;;  %v3675_v24 = vld [vmem:[#allocation27 + $0x380] sm:$0xff] }
 0x5a6   :  { %3273 = vmatmul.mubr.bf16.vlgmr.msra.gmra.mrb[16].mxu0 %v9465_v15  ;;  %6678 = vmatpush1.bf16.msra.mxu1 %v7722_v22  ;;  %v7749_v15 = vcombine.high %v3588_v32, %v3592_v33  ;;  %v3631_v22 = vld [vmem:[#allocation27 + $0x220] sm:$0xff] }
 0x5a7   :  { %6842 = vmatpush1.bf16.msra.mxu0 %v7724_v23  ;;  %6679 = vmatprep.subr.bf16.mxu1 %v7731_v26  ;;  %v3628_v23 = vld [vmem:[#allocation27 + $0x208] sm:$0xff]  ;;  %v7787_v29 = vcombine.high %v3627_v5, %v3631_v22  ;;  %v3643_v33 = vld [vmem:[#allocation27 + $0x280] sm:$0xff] }
 0x5a8   :  { %6843 = vmatprep.subr.bf16.mxu0 %v7733_v6  ;;  %v3632_v26 = vld [vmem:[#allocation27 + $0x228] sm:$0xff]  ;;  %v7778_v6 = vcombine.low %v3619_v18, %v3623_v20 }
 0x5a9   :  { %v7789_v28 = vcombine.high %v3628_v23, %v3632_v26  ;;  %v7788_v37 = vcombine.low %v3628_v23, %v3632_v26  ;;  %v3683_v26 = vld [vmem:[#allocation27 + $0x3c0] sm:$0xff] }
 0x5aa   :  { %6680 = vmatpush1.bf16.msra.mxu1 %v7730_v7  ;;  %v3639_v7 = vld [vmem:[#allocation27 + $0x260] sm:$0xff] }
 0x5ab   :  { %6844 = vmatpush1.bf16.msra.mxu0 %v7732_v63  ;;  %6681 = vmatprep.subr.bf16.mxu1 %v7739_v25  ;;  %v3636_v63 = vld [vmem:[#allocation27 + $0x248] sm:$0xff]  ;;  %v7795_v31 = vcombine.high %v3635_v62, %v3639_v7 }
 0x5ac   :  { %6845 = vmatprep.subr.bf16.mxu0 %v7741_v30  ;;  %v3640_v25 = vld [vmem:[#allocation27 + $0x268] sm:$0xff]  ;;  %v7786_v30 = vcombine.low %v3627_v5, %v3631_v22 }
 0x5ad   :  { %v7797_v32 = vcombine.high %v3636_v63, %v3640_v25  ;;  %v7796_v39 = vcombine.low %v3636_v63, %v3640_v25 }
 0x5ae   :  { %6682 = vmatpush1.bf16.msra.mxu1 %v7738_v35  ;;  %v3647_v35 = vld [vmem:[#allocation27 + $0x2a0] sm:$0xff] }
 0x5af   :  { %6846 = vmatpush1.bf16.msra.mxu0 %v7740_v36  ;;  %6683 = vmatprep.subr.bf16.mxu1 %v7747_v38  ;;  %v3644_v36 = vld [vmem:[#allocation27 + $0x288] sm:$0xff]  ;;  %v7803_v40 = vcombine.high %v3643_v33, %v3647_v35 }
 0x5b0   :  { %6847 = vmatprep.subr.bf16.mxu0 %v7749_v15  ;;  %v3648_v38 = vld [vmem:[#allocation27 + $0x2a8] sm:$0xff]  ;;  %v7794_v15 = vcombine.low %v3635_v62, %v3639_v7 }
 0x5b1   :  { %v7805_v41 = vcombine.high %v3644_v36, %v3648_v38  ;;  %v7804_v11 = vcombine.low %v3644_v36, %v3648_v38 }
 0x5b2   :  { %6684 = vmatpush1.bf16.msra.mxu1 %v7746_v43  ;;  %v3655_v43 = vld [vmem:[#allocation27 + $0x2e0] sm:$0xff] }
 0x5b3   :  { %6848 = vmatpush1.bf16.msra.mxu0 %v7748_v44  ;;  %6685 = vmatprep.subr.bf16.mxu1 %v7755_v45  ;;  %v3652_v44 = vld [vmem:[#allocation27 + $0x2c8] sm:$0xff]  ;;  %v7811_v12 = vcombine.high %v3651_v42, %v3655_v43 }
 0x5b4   :  { %6849 = vmatprep.subr.bf16.mxu0 %v7757_v10  ;;  %v3656_v45 = vld [vmem:[#allocation27 + $0x2e8] sm:$0xff]  ;;  %v7802_v10 = vcombine.low %v3643_v33, %v3647_v35 }
 0x5b5   :  { %v7813_v34 = vcombine.high %v3652_v44, %v3656_v45  ;;  %v7812_v52 = vcombine.low %v3652_v44, %v3656_v45 }
 0x5b6   :  { %6686 = vmatpush1.bf16.msra.mxu1 %v7754_v46  ;;  %v3663_v46 = vld [vmem:[#allocation27 + $0x320] sm:$0xff] }
 0x5b7   :  { %6850 = vmatpush1.bf16.msra.mxu0 %v7756_v47  ;;  %6687 = vmatprep.subr.bf16.mxu1 %v7763_v48  ;;  %v3660_v47 = vld [vmem:[#allocation27 + $0x308] sm:$0xff]  ;;  %v7819_v53 = vcombine.high %v3659_v14, %v3663_v46 }
 0x5b8   :  { %6851 = vmatprep.subr.bf16.mxu0 %v7765_v51  ;;  %v3664_v48 = vld [vmem:[#allocation27 + $0x328] sm:$0xff]  ;;  %v7810_v51 = vcombine.low %v3651_v42, %v3655_v43 }
 0x5b9   :  { %v7821_v55 = vcombine.high %v3660_v47, %v3664_v48  ;;  %v7820_v18 = vcombine.low %v3660_v47, %v3664_v48 }
 0x5ba   :  { %6688 = vmatpush1.bf16.msra.mxu1 %v7762_v8  ;;  %v3671_v8 = vld [vmem:[#allocation27 + $0x360] sm:$0xff] }
 0x5bb   :  { %6852 = vmatpush1.bf16.msra.mxu0 %v7764_v9  ;;  %6689 = vmatprep.subr.bf16.mxu1 %v7771_v13  ;;  %v3668_v9 = vld [vmem:[#allocation27 + $0x348] sm:$0xff]  ;;  %v7827_v20 = vcombine.high %v3667_v56, %v3671_v8 }
 0x5bc   :  { %6853 = vmatprep.subr.bf16.mxu0 %v7773_v16  ;;  %v3672_v13 = vld [vmem:[#allocation27 + $0x368] sm:$0xff]  ;;  %v7818_v16 = vcombine.low %v3659_v14, %v3663_v46 }
 0x5bd   :  { %v7829_v57 = vcombine.high %v3668_v9, %v3672_v13  ;;  %v7828_v5 = vcombine.low %v3668_v9, %v3672_v13 }
 0x5be   :  { %6690 = vmatpush1.bf16.msra.mxu1 %v7770_v4  ;;  %v3679_v4 = vld [vmem:[#allocation27 + $0x3a0] sm:$0xff] }
 0x5bf   :  { %6854 = vmatpush1.bf16.msra.mxu0 %v7772_v58  ;;  %6691 = vmatprep.subr.bf16.mxu1 %v7779_v21  ;;  %v3676_v58 = vld [vmem:[#allocation27 + $0x388] sm:$0xff]  ;;  %v7835_v22 = vcombine.high %v3675_v24, %v3679_v4 }
 0x5c0   :  { %6855 = vmatprep.subr.bf16.mxu0 %v7781_v59  ;;  %v3680_v21 = vld [vmem:[#allocation27 + $0x3a8] sm:$0xff]  ;;  %v7826_v59 = vcombine.low %v3667_v56, %v3671_v8 }
 0x5c1   :  { %v7837_v23 = vcombine.high %v3676_v58, %v3680_v21  ;;  %v7836_v62 = vcombine.low %v3676_v58, %v3680_v21 }
 0x5c2   :  { %6692 = vmatpush1.bf16.msra.mxu1 %v7778_v6  ;;  %v3687_v6 = vld [vmem:[#allocation27 + $0x3e0] sm:$0xff] }
 0x5c3   :  { %6856 = vmatpush1.bf16.msra.mxu0 %v7780_v27  ;;  %6693 = vmatprep.subr.bf16.mxu1 %v7787_v29  ;;  %v3684_v27 = vld [vmem:[#allocation27 + $0x3c8] sm:$0xff]  ;;  %v7843_v7 = vcombine.high %v3683_v26, %v3687_v6  ;;  %v7842_v25 = vcombine.low %v3683_v26, %v3687_v6 }
 0x5c4   :  { %6857 = vmatprep.subr.bf16.mxu0 %v7789_v28  ;;  %v3688_v29 = vld [vmem:[#allocation27 + $0x3e8] sm:$0xff]  ;;  %v7834_v28 = vcombine.low %v3675_v24, %v3679_v4 }
 0x5c5   :  { %v7845_v63 = vcombine.high %v3684_v27, %v3688_v29 }
 0x5c6   :  { %6694 = vmatpush1.bf16.msra.mxu1 %v7786_v30  ;;  %v7844_v30 = vcombine.low %v3684_v27, %v3688_v29 }
 0x5c7   :  { %6858 = vmatpush1.bf16.msra.mxu0 %v7788_v37  ;;  %6695 = vmatprep.subr.bf16.mxu1 %v7795_v31  ;;  %v7851_v37 = vcombine.high %v9477_v49, %v9479_v50  ;;  %v7853_v31 = vcombine.high %v9481_v60, %v9483_v54  ;;  %v3720_v49 = vld [vmem:[#allocation27 + $0x4e8] sm:$0xff] }
 0x5c8   :  { %6859 = vmatprep.subr.bf16.mxu0 %v7797_v32  ;;  %v9493_v32 = vld [vmem:[#allocation22] sm:$0xff] }
 0x5c9   :  { %v1636_v33 = vrot.slane %v9493_v32, %v9391_v2  ;;  %v1640_v35 = vrot.slane %v9493_v32, %v9394_v3  ;;  %v1648_v36 = vrot.slane %v9493_v32, %v9428_v19  ;;  %v1644_v4 = vrot.slane %v9493_v32, %v9425_v17 }
 0x5ca   :  { %6696 = vmatpush1.bf16.msra.mxu1 %v7794_v15 }
 0x5cb   :  { %6860 = vmatpush1.bf16.msra.mxu0 %v7796_v39  ;;  %6697 = vmatprep.subr.bf16.mxu1 %v7803_v40 }
 0x5cc   :  { %6861 = vmatprep.subr.bf16.mxu0 %v7805_v41 }
 0x5ce   :  { %6698 = vmatpush1.bf16.msra.mxu1 %v7802_v10 }
 0x5cf   :  { %6862 = vmatpush1.bf16.msra.mxu0 %v7804_v11  ;;  %6699 = vmatprep.subr.bf16.mxu1 %v7811_v12 }
 0x5d0   :  { %6863 = vmatprep.subr.bf16.mxu0 %v7813_v34 }
 0x5d2   :  { %6700 = vmatpush1.bf16.msra.mxu1 %v7810_v51 }
 0x5d3   :  { %6864 = vmatpush1.bf16.msra.mxu0 %v7812_v52  ;;  %6701 = vmatprep.subr.bf16.mxu1 %v7819_v53 }
 0x5d4   :  { %6865 = vmatprep.subr.bf16.mxu0 %v7821_v55 }
 0x5d6   :  { %6702 = vmatpush1.bf16.msra.mxu1 %v7818_v16 }
 0x5d7   :  { %6866 = vmatpush1.bf16.msra.mxu0 %v7820_v18  ;;  %6703 = vmatprep.subr.bf16.mxu1 %v7827_v20 }
 0x5d8   :  { %6867 = vmatprep.subr.bf16.mxu0 %v7829_v57 }
 0x5da   :  { %6704 = vmatpush1.bf16.msra.mxu1 %v7826_v59 }
 0x5db   :  { %6868 = vmatpush1.bf16.msra.mxu0 %v7828_v5  ;;  %6705 = vmatprep.subr.bf16.mxu1 %v7835_v22 }
 0x5dc   :  { %6869 = vmatprep.subr.bf16.mxu0 %v7837_v23 }
 0x5de   :  { %6706 = vmatpush1.bf16.msra.mxu1 %v7834_v28 }
 0x5df   :  { %6870 = vmatpush1.bf16.msra.mxu0 %v7836_v62  ;;  %6707 = vmatprep.subr.bf16.mxu1 %v7843_v7 }
 0x5e0   :  { %6871 = vmatprep.subr.bf16.mxu0 %v7845_v63 }
 0x5e2   :  { %6708 = vmatpush1.bf16.msra.mxu1 %v7842_v25 }
 0x5e3   :  { %6872 = vmatpush1.bf16.msra.mxu0 %v7844_v30  ;;  %6718 = vmatprep.subr.bf16.mxu1 %v7851_v37 }
 0x5e4   :  { %6882 = vmatprep.subr.bf16.mxu0 %v7853_v31 }
 0x5f8   :  { %v3028_v38 = vpop.f32.mrb[8].mxu1  ;;  %v3110_v15 = vpop.f32.mrb[12].mxu0 }
 0x5f9   :  { %v8292_v39 = vadd.f32 %v3028_v38, %v1636_v33  ;;  %v3030_v40 = vpop.f32.mrb[9].mxu1  ;;  %v3112_v41 = vpop.f32.mrb[13].mxu0  ;;  %v8294_v26 = vadd.f32 %v3110_v15, %v1644_v4 }
 0x5fa   :  { %v8293_v42 = vadd.f32 %v3030_v40, %v1640_v35  ;;  %v8295_v43 = vadd.f32 %v3112_v41, %v1648_v36  ;;  %v3032_v44 = vpop.f32.mrb[10].mxu1  ;;  %v3114_v45 = vpop.f32.mrb[14].mxu0 }
 0x5fb   :  { %v3281_v10 = vrot.slane %v8292_v39, 4  ;;  %v3033_v11 = vpop.f32.mrb[11].mxu1  ;;  %v3115_v12 = vpop.f32.mrb[15].mxu0  ;;  %v3293_v63 = vrot.slane %v8294_v26, 4 }
 0x5fc   :  { %v3287_v34 = vrot.slane %v8293_v42, 4  ;;  %v3299_v14 = vrot.slane %v8295_v43, 4 }
 0x5fd   :  { %v3282_v46 = vadd.f32 %v8292_v39, %v3281_v10  ;;  %v3294_v36 = vadd.f32 %v8294_v26, %v3293_v63 }
 0x5fe   :  { %v3288_v47 = vadd.f32 %v8293_v42, %v3287_v34  ;;  %v3300_v48 = vadd.f32 %v8295_v43, %v3299_v14 }
 0x5ff   :  { %v3283_v51 = vrot.slane %v3282_v46, 2 }
 0x600   :  { %v3289_v52 = vrot.slane %v3288_v47, 2  ;;  %v3301_v53 = vrot.slane %v3300_v48, 2 }
 0x601   :  { %v3284_v55 = vadd.f32 %v3283_v51, %v3282_v46  ;;  %v9503_v51 = vld [vmem:[#allocation24] sm:$0xff] }
 0x602   :  { %v3290_v56 = vadd.f32 %v3289_v52, %v3288_v47  ;;  %v3302_v8 = vadd.f32 %v3301_v53, %v3300_v48  ;;  %v9505_v53 = vld [vmem:[#allocation25] sm:$0xff] }
 0x603   :  { %v3285_v9 = vrot.slane %v3284_v55, 1 }
 0x604   :  { %v3291_v13 = vrot.slane %v3290_v56, 1  ;;  %v3303_v16 = vrot.slane %v3302_v8, 1 }
 0x605   :  { %v3286_v18 = vadd.f32 %v3285_v9, %v3284_v55  ;;  %v3437_v55 = vrot.slane %v9503_v51, %v9391_v2  ;;  %v3486_v9 = vrot.slane %v9505_v53, %v9391_v2 }
 0x606   :  { %v3292_v20 = vadd.f32 %v3291_v13, %v3290_v56  ;;  %v3304_v57 = vadd.f32 %v3303_v16, %v3302_v8  ;;  %v3441_v16 = vrot.slane %v9503_v51, %v9394_v3 }
 0x607   :  { %v3329_v24 = vmul.f32 0.125, %v3286_v18 }
 0x608   :  { %v3330_v58 = vmul.f32 0.125, %v3292_v20  ;;  %v3332_v21 = vmul.f32 0.125, %v3304_v57  ;;  %v3449_v20 = vrot.slane %v9503_v51, %v9428_v19 }
 0x609   :  { %v3337_v59 = vsub.f32 %v8292_v39, %v3329_v24 }
 0x60a   :  { %v3338_v5 = vsub.f32 %v8293_v42, %v3330_v58  ;;  %v3340_v22 = vsub.f32 %v8295_v43, %v3332_v21  ;;  %v3295_v43 = vrot.slane %v3294_v36, 2  ;;  %v3490_v58 = vrot.slane %v9505_v53, %v9394_v3 }
 0x60b   :  { %v3345_v23 = vmul.f32 %v3337_v59, %v3337_v59 }
 0x60c   :  { %v3346_v6 = vmul.f32 %v3338_v5, %v3338_v5  ;;  %v3348_v27 = vmul.f32 %v3340_v22, %v3340_v22  ;;  %v3296_v14 = vadd.f32 %v3295_v43, %v3294_v36  ;;  %v3708_v43 = vld [vmem:[#allocation27 + $0x488] sm:$0xff] }
 0x60d   :  { %v3353_v29 = vrot.slane %v3345_v23, 4 }
 0x60e   :  { %v3359_v28 = vrot.slane %v3346_v6, 4  ;;  %v3371_v62 = vrot.slane %v3348_v27, 4  ;;  %v3297_v48 = vrot.slane %v3296_v14, 1 }
 0x60f   :  { %v3354_v7 = vadd.f32 %v3353_v29, %v3345_v23 }
 0x610   :  { %v3360_v25 = vadd.f32 %v3359_v28, %v3346_v6  ;;  %v3372_v30 = vadd.f32 %v3371_v62, %v3348_v27  ;;  %v3298_v52 = vadd.f32 %v3297_v48, %v3296_v14  ;;  %v3716_v48 = vld [vmem:[#allocation27 + $0x4c8] sm:$0xff] }
 0x611   :  { %v3355_v37 = vrot.slane %v3354_v7, 2 }
 0x612   :  { %v3361_v31 = vrot.slane %v3360_v25, 2  ;;  %v3373_v33 = vrot.slane %v3372_v30, 2  ;;  %v3331_v13 = vmul.f32 0.125, %v3298_v52  ;;  %v3723_v52 = vld [vmem:[#allocation27 + $0x500] sm:$0xff] }
 0x613   :  { %v3356_v35 = vadd.f32 %v3355_v37, %v3354_v7 }
 0x614   :  { %v3362_v38 = vadd.f32 %v3361_v31, %v3360_v25  ;;  %v3374_v39 = vadd.f32 %v3373_v33, %v3372_v30  ;;  %v9519_v6 = vsub.f32 %v8294_v26, %v3331_v13  ;;  %v3699_v30 = vld [vmem:[#allocation27 + $0x440] sm:$0xff]  ;;  %v3700_v33 = vld [vmem:[#allocation27 + $0x448] sm:$0xff]  ;;  %v7876_v13 = vcombine.low %v3716_v48, %v3720_v49 }
 0x615   :  { %v3357_v40 = vrot.slane %v3356_v35, 1  ;;  %v3703_v31 = vld [vmem:[#allocation27 + $0x460] sm:$0xff]  ;;  %v3704_v26 = vld [vmem:[#allocation27 + $0x468] sm:$0xff] }
 0x616   :  { %v3363_v41 = vrot.slane %v3362_v38, 1  ;;  %v3375_v42 = vrot.slane %v3374_v39, 1  ;;  %v3347_v63 = vmul.f32 %v9519_v6, %v9519_v6 }
 0x617   :  { %v3358_v15 = vadd.f32 %v3357_v40, %v3356_v35  ;;  %v3707_v40 = vld [vmem:[#allocation27 + $0x480] sm:$0xff] }
 0x618   :  { %v3364_v44 = vadd.f32 %v3363_v41, %v3362_v38  ;;  %v3376_v45 = vadd.f32 %v3375_v42, %v3374_v39  ;;  %v3365_v38 = vrot.slane %v3347_v63, 4  ;;  %v7859_v41 = vcombine.high %v3699_v30, %v3703_v31 }
 0x619   :  { %v3401_v10 = vmul.f32 0.125, %v3358_v15  ;;  %v7861_v42 = vcombine.high %v3700_v33, %v3704_v26  ;;  %v3711_v15 = vld [vmem:[#allocation27 + $0x4a0] sm:$0xff] }
 0x61a   :  { %v3402_v11 = vmul.f32 0.125, %v3364_v44  ;;  %v3404_v12 = vmul.f32 0.125, %v3376_v45  ;;  %v3712_v44 = vld [vmem:[#allocation27 + $0x4a8] sm:$0xff]  ;;  %v7866_v50 = vcombine.low %v3707_v40, %v3711_v15 }
 0x61b   :  { %v3409_v34 = vadd.f32 0.8, %v3401_v10  ;;  %v7858_v10 = vcombine.low %v3699_v30, %v3703_v31  ;;  %v7869_v14 = vcombine.high %v3708_v43, %v3712_v44  ;;  %v7868_v60 = vcombine.low %v3708_v43, %v3712_v44  ;;  %v3747_v31 = vld [vmem:[#allocation27 + $0x5c0] sm:$0xff] }
 0x61c   :  { %v3410_v46 = vadd.f32 0.8, %v3402_v11  ;;  %v3412_v47 = vadd.f32 0.8, %v3404_v12  ;;  %v7860_v11 = vcombine.low %v3700_v33, %v3704_v26  ;;  %v3366_v12 = vadd.f32 %v3365_v38, %v3347_v63  ;;  %v3744_v63 = vld [vmem:[#allocation27 + $0x5a8] sm:$0xff]  ;;  %v3751_v33 = vld [vmem:[#allocation27 + $0x5e0] sm:$0xff] }
 0x61d   :  { %8551 = vrsqrt.f32 %v3409_v34  ;;  %v7867_v34 = vcombine.high %v3707_v40, %v3711_v15  ;;  %v3748_v26 = vld [vmem:[#allocation27 + $0x5c8] sm:$0xff]  ;;  %v3755_v43 = vld [vmem:[#allocation27 + $0x600] sm:$0xff] }
 0x61e   :  { %8553 = vrsqrt.f32 %v3410_v46  ;;  %v3715_v46 = vld [vmem:[#allocation27 + $0x4c0] sm:$0xff]  ;;  %v3367_v54 = vrot.slane %v3366_v12, 2 }
 0x61f   :  { %8555 = vrsqrt.f32 %v3412_v47  ;;  %v3719_v47 = vld [vmem:[#allocation27 + $0x4e0] sm:$0xff] }
 0x620   :  { %v3759_v44 = vld [vmem:[#allocation27 + $0x620] sm:$0xff] }
 0x627   :  { %v8552_v56 = vpop.eup %8551 }
 0x628   :  { %v3425_v8 = vmul.f32 %v8552_v56, %v3337_v59  ;;  %v8554_v18 = vpop.eup %8553  ;;  %v3498_v59 = vrot.slane %v9505_v53, %v9428_v19  ;;  %v3724_v56 = vld [vmem:[#allocation27 + $0x508] sm:$0xff] }
 0x629   :  { %v8556_v57 = vpop.eup %8555  ;;  %v3426_v4 = vmul.f32 %v8554_v18, %v3338_v5 }
 0x62a   :  { %v3474_v24 = vmul.f32 %v3437_v55, %v3425_v8  ;;  %v3428_v21 = vmul.f32 %v8556_v57, %v3340_v22  ;;  %v3727_v55 = vld [vmem:[#allocation27 + $0x520] sm:$0xff]  ;;  %v3728_v8 = vld [vmem:[#allocation27 + $0x528] sm:$0xff] }
 0x62b   :  { %v3475_v27 = vmul.f32 %v3441_v16, %v3426_v4  ;;  %v3368_v16 = vadd.f32 %v3367_v54, %v3366_v12  ;;  %v7883_v18 = vcombine.high %v3723_v52, %v3727_v55  ;;  %v3731_v57 = vld [vmem:[#allocation27 + $0x540] sm:$0xff]  ;;  %v3732_v4 = vld [vmem:[#allocation27 + $0x548] sm:$0xff]  ;;  %v7906_v12 = vcombine.low %v3747_v31, %v3751_v33 }
 0x62c   :  { %v3523_v23 = vadd.f32 %v3486_v9, %v3474_v24  ;;  %v3477_v29 = vmul.f32 %v3449_v20, %v3428_v21  ;;  %v7874_v9 = vcombine.low %v3715_v46, %v3719_v47  ;;  %v7885_v20 = vcombine.high %v3724_v56, %v3728_v8  ;;  %v3735_v24 = vld [vmem:[#allocation27 + $0x560] sm:$0xff] }
 0x62d   :  { %v3524_v28 = vadd.f32 %v3490_v58, %v3475_v27  ;;  %v3736_v58 = vld [vmem:[#allocation27 + $0x568] sm:$0xff]  ;;  %v7882_v21 = vcombine.low %v3723_v52, %v3727_v55  ;;  %v7891_v27 = vcombine.high %v3731_v57, %v3735_v24  ;;  %v7914_v54 = vcombine.low %v3755_v43, %v3759_v44  ;;  %v3771_v55 = vld [vmem:[#allocation27 + $0x680] sm:$0xff] }
 0x62e   :  { %vm3531_vm12 = vcmp.gt.f32.partialorder %v3523_v23, 0.0  ;;  %v3539_v62 = vmul.f32 0.2, %v3523_v23  ;;  %v3526_v7 = vadd.f32 %v3498_v59, %v3477_v29  ;;  %v7884_v59 = vcombine.low %v3724_v56, %v3728_v8  ;;  %v3775_v56 = vld [vmem:[#allocation27 + $0x6a0] sm:$0xff]  ;;  %v3772_v8 = vld [vmem:[#allocation27 + $0x688] sm:$0xff] }
 0x62f   :  { %vm3532_vm13 = vcmp.gt.f32.partialorder %v3524_v28, 0.0  ;;  %v3540_v5 = vmul.f32 0.2, %v3524_v28  ;;  %v7893_v29 = vcombine.high %v3732_v4, %v3736_v58 }
 0x630   :  { %v3547_v25 = vsel %vm3531_vm12, %v3523_v23, %v3539_v62  ;;  %vm3534_vm14 = vcmp.gt.f32.partialorder %v3526_v7, 0.0  ;;  %v3542_v22 = vmul.f32 0.2, %v3526_v7  ;;  %v3369_v23 = vrot.slane %v3368_v16, 1  ;;  %v3743_v62 = vld [vmem:[#allocation27 + $0x5a0] sm:$0xff] }
 0x631   :  { %v3548_v37 = vsel %vm3532_vm13, %v3524_v28, %v3540_v5  ;;  %v9525_v39 = vpack.c.bf16 %v3547_v25, %v3547_v25  ;;  %v3739_v28 = vld [vmem:[#allocation27 + $0x580] sm:$0xff]  ;;  %v7890_v5 = vcombine.low %v3731_v57, %v3735_v24  ;;  %v7892_v25 = vcombine.low %v3732_v4, %v3736_v58  ;;  %v3780_v4 = vld [vmem:[#allocation27 + $0x6c8] sm:$0xff] }
 0x632   :  { %v9523_v35 = vpack.c.bf16 %v3548_v37, %v3548_v37  ;;  %v3550_v36 = vsel %vm3534_vm14, %v3526_v7, %v3542_v22  ;;  %v3740_v7 = vld [vmem:[#allocation27 + $0x588] sm:$0xff]  ;;  %v3370_v22 = vadd.f32 %v3369_v23, %v3368_v16  ;;  %v7899_v30 = vcombine.high %v3739_v28, %v3743_v62  ;;  %v3779_v57 = vld [vmem:[#allocation27 + $0x6c0] sm:$0xff] }
 0x633   :  { %v9531_v45 = vpack.c.bf16 %v3550_v36, %v3550_v36  ;;  %v7901_v37 = vcombine.high %v3740_v7, %v3744_v63  ;;  %v3752_v36 = vld [vmem:[#allocation27 + $0x5e8] sm:$0xff]  ;;  %v7898_v38 = vcombine.low %v3739_v28, %v3743_v62  ;;  %v7900_v40 = vcombine.low %v3740_v7, %v3744_v63  ;;  %v3783_v24 = vld [vmem:[#allocation27 + $0x6e0] sm:$0xff] }
 0x634   :  { %6709 = vmatprep.mubr.bf16.mxu1 %v9523_v35  ;;  %6873 = vmatprep.mubr.bf16.mxu0 %v9523_v35  ;;  %v7909_v15 = vcombine.high %v3748_v26, %v3752_v36  ;;  %v3784_v58 = vld [vmem:[#allocation27 + $0x6e8] sm:$0xff]  ;;  %v7939_v23 = vcombine.high %v3779_v57, %v3783_v24  ;;  %v3791_v28 = vld [vmem:[#allocation27 + $0x720] sm:$0xff] }
 0x635   :  { %6710 = vmatmul.mubr.bf16.vlgmr.msra.gmra.mrb[16].mxu1 %v9525_v39  ;;  %6874 = vmatmul.mubr.bf16.vlgmr.msra.gmra.mrb[20].mxu0 %v9525_v39  ;;  %v3788_v62 = vld [vmem:[#allocation27 + $0x708] sm:$0xff] }
 0x636   :  { %6719 = vmatpush1.bf16.msra.mxu1 %v7850_v61  ;;  %6883 = vmatpush1.bf16.msra.mxu0 %v7852_v0  ;;  %v7875_v61 = vcombine.high %v3715_v46, %v3719_v47  ;;  %v7877_v0 = vcombine.high %v3716_v48, %v3720_v49  ;;  %v7915_v46 = vcombine.high %v3755_v43, %v3759_v44  ;;  %v3763_v48 = vld [vmem:[#allocation27 + $0x640] sm:$0xff]  ;;  %v3792_v7 = vld [vmem:[#allocation27 + $0x728] sm:$0xff] }
 0x637   :  { %6750 = vmatprep.mubr.bf16.mxu1 %v9531_v45  ;;  %6914 = vmatprep.mubr.bf16.mxu0 %v9531_v45  ;;  %v3767_v49 = vld [vmem:[#allocation27 + $0x660] sm:$0xff] }
 0x638   :  { %6720 = vmatprep.subr.bf16.mxu1 %v7859_v41  ;;  %6884 = vmatprep.subr.bf16.mxu0 %v7861_v42  ;;  %v3403_v41 = vmul.f32 0.125, %v3370_v22  ;;  %v7907_v42 = vcombine.high %v3747_v31, %v3751_v33  ;;  %v3445_v33 = vrot.slane %v9503_v51, %v9425_v17  ;;  %v3803_v43 = vld [vmem:[#allocation27 + $0x780] sm:$0xff] }
 0x63a   :  { %6721 = vmatpush1.bf16.msra.mxu1 %v7858_v10  ;;  %6885 = vmatpush1.bf16.msra.mxu0 %v7860_v11  ;;  %v3756_v10 = vld [vmem:[#allocation27 + $0x608] sm:$0xff] }
 0x63b   :  { %6722 = vmatprep.subr.bf16.mxu1 %v7867_v34  ;;  %6886 = vmatprep.subr.bf16.mxu0 %v7869_v14  ;;  %v3760_v11 = vld [vmem:[#allocation27 + $0x628] sm:$0xff]  ;;  %v7908_v34 = vcombine.low %v3748_v26, %v3752_v36  ;;  %v3411_v14 = vadd.f32 0.8, %v3403_v41  ;;  %v3799_v26 = vld [vmem:[#allocation27 + $0x760] sm:$0xff]  ;;  %v7948_v41 = vcombine.low %v3788_v62, %v3792_v7 }
 0x63c   :  { %v7917_v47 = vcombine.high %v3756_v10, %v3760_v11  ;;  %v3796_v36 = vld [vmem:[#allocation27 + $0x748] sm:$0xff] }
 0x63d   :  { %8557 = vrsqrt.f32 %v3411_v14 }
 0x63e   :  { %6723 = vmatpush1.bf16.msra.mxu1 %v7866_v50  ;;  %6887 = vmatpush1.bf16.msra.mxu0 %v7868_v60  ;;  %v3764_v50 = vld [vmem:[#allocation27 + $0x648] sm:$0xff] }
 0x63f   :  { %6724 = vmatprep.subr.bf16.mxu1 %v7875_v61  ;;  %6888 = vmatprep.subr.bf16.mxu0 %v7877_v0  ;;  %v3768_v60 = vld [vmem:[#allocation27 + $0x668] sm:$0xff]  ;;  %v7916_v61 = vcombine.low %v3756_v10, %v3760_v11  ;;  %v7923_v0 = vcombine.high %v3763_v48, %v3767_v49  ;;  %v3494_v10 = vrot.slane %v9505_v53, %v9425_v17 }
 0x640   :  { %v7925_v52 = vcombine.high %v3764_v50, %v3768_v60  ;;  %v7924_v16 = vcombine.low %v3764_v50, %v3768_v60  ;;  %v3804_v11 = vld [vmem:[#allocation27 + $0x788] sm:$0xff]  ;;  %v3815_v50 = vld [vmem:[#allocation27 + $0x7e0] sm:$0xff] }
 0x641   :  { %v3812_v60 = vld [vmem:[#allocation27 + $0x7c8] sm:$0xff] }
 0x642   :  { %6725 = vmatpush1.bf16.msra.mxu1 %v7874_v9  ;;  %6889 = vmatpush1.bf16.msra.mxu0 %v7876_v13  ;;  %v3776_v9 = vld [vmem:[#allocation27 + $0x6a8] sm:$0xff]  ;;  %v7922_v13 = vcombine.low %v3763_v48, %v3767_v49  ;;  %v3811_v48 = vld [vmem:[#allocation27 + $0x7c0] sm:$0xff] }
 0x643   :  { %6726 = vmatprep.subr.bf16.mxu1 %v7883_v18  ;;  %6890 = vmatprep.subr.bf16.mxu0 %v7885_v20  ;;  %v7931_v18 = vcombine.high %v3771_v55, %v3775_v56  ;;  %v7933_v20 = vcombine.high %v3772_v8, %v3776_v9 }
 0x646   :  { %6727 = vmatpush1.bf16.msra.mxu1 %v7882_v21  ;;  %6891 = vmatpush1.bf16.msra.mxu0 %v7884_v59  ;;  %v7930_v21 = vcombine.low %v3771_v55, %v3775_v56  ;;  %v7932_v59 = vcombine.low %v3772_v8, %v3776_v9  ;;  %v3819_v56 = vld [vmem:[#allocation27 + $0x800] sm:$0xff] }
 0x647   :  { %6728 = vmatprep.subr.bf16.mxu1 %v7891_v27  ;;  %6892 = vmatprep.subr.bf16.mxu0 %v7893_v29  ;;  %v7941_v27 = vcombine.high %v3780_v4, %v3784_v58  ;;  %v3787_v29 = vld [vmem:[#allocation27 + $0x700] sm:$0xff]  ;;  %v8558_v63 = vpop.eup %8557 }
 0x648   :  { %v7947_v22 = vcombine.high %v3787_v29, %v3791_v28  ;;  %v3427_v31 = vmul.f32 %v8558_v63, %v9519_v6  ;;  %v3807_v6 = vld [vmem:[#allocation27 + $0x7a0] sm:$0xff] }
 0x649   :  { %v3823_v9 = vld [vmem:[#allocation27 + $0x820] sm:$0xff] }
 0x64a   :  { %6729 = vmatpush1.bf16.msra.mxu1 %v7890_v5  ;;  %6893 = vmatpush1.bf16.msra.mxu0 %v7892_v25  ;;  %v7938_v5 = vcombine.low %v3779_v57, %v3783_v24  ;;  %v7940_v25 = vcombine.low %v3780_v4, %v3784_v58  ;;  %v3476_v44 = vmul.f32 %v3445_v33, %v3427_v31  ;;  %v3827_v4 = vld [vmem:[#allocation27 + $0x840] sm:$0xff]  ;;  %v3836_v31 = vld [vmem:[#allocation27 + $0x888] sm:$0xff] }
 0x64b   :  { %6730 = vmatprep.subr.bf16.mxu1 %v7899_v30  ;;  %6894 = vmatprep.subr.bf16.mxu0 %v7901_v37  ;;  %v7949_v30 = vcombine.high %v3788_v62, %v3792_v7  ;;  %v3795_v37 = vld [vmem:[#allocation27 + $0x740] sm:$0xff]  ;;  %v7979_v57 = vcombine.high %v3819_v56, %v3823_v9  ;;  %v9553_v7 = vsub.s32 7, %v9388_v1  ;;  %v3840_v33 = vld [vmem:[#allocation27 + $0x8a8] sm:$0xff] }
 0x64c   :  { %v3525_v49 = vadd.f32 %v3494_v10, %v3476_v44 }
 0x64e   :  { %6731 = vmatpush1.bf16.msra.mxu1 %v7898_v38  ;;  %6895 = vmatpush1.bf16.msra.mxu0 %v7900_v40  ;;  %v3800_v38 = vld [vmem:[#allocation27 + $0x768] sm:$0xff]  ;;  %v7946_v40 = vcombine.low %v3787_v29, %v3791_v28  ;;  %v3541_v8 = vmul.f32 0.2, %v3525_v49  ;;  %vm3533_vm15 = vcmp.gt.f32.partialorder %v3525_v49, 0.0  ;;  %v9550_v29 = vsub.s32 5, %v9388_v1 }
 0x64f   :  { %6732 = vmatprep.subr.bf16.mxu1 %v7907_v42  ;;  %6896 = vmatprep.subr.bf16.mxu0 %v7909_v15  ;;  %v7955_v42 = vcombine.high %v3795_v37, %v3799_v26  ;;  %v7957_v15 = vcombine.high %v3796_v36, %v3800_v38  ;;  %v7956_v14 = vcombine.low %v3796_v36, %v3800_v38 }
 0x650   :  { %v3549_v58 = vsel %vm3533_vm15, %v3525_v49, %v3541_v8  ;;  %v7978_v28 = vcombine.low %v3819_v56, %v3823_v9  ;;  %v3851_v8 = vld [vmem:[#allocation27 + $0x900] sm:$0xff] }
 0x651   :  { %v9555_v63 = vpack.c.bf16 %v3549_v58, %v3549_v58 }
 0x652   :  { %6733 = vmatpush1.bf16.msra.mxu1 %v7906_v12  ;;  %6897 = vmatpush1.bf16.msra.mxu0 %v7908_v34  ;;  %v3808_v12 = vld [vmem:[#allocation27 + $0x7a8] sm:$0xff]  ;;  %v7954_v34 = vcombine.low %v3795_v37, %v3799_v26  ;;  %v3839_v37 = vld [vmem:[#allocation27 + $0x8a0] sm:$0xff]  ;;  %v1656_v26 = vrot.slane %v9493_v32, %v9550_v29 }
 0x653   :  { %6734 = vmatprep.subr.bf16.mxu1 %v7915_v46  ;;  %6898 = vmatprep.subr.bf16.mxu0 %v7917_v47  ;;  %v7963_v46 = vcombine.high %v3803_v43, %v3807_v6  ;;  %v7965_v47 = vcombine.high %v3804_v11, %v3808_v12 }
 0x656   :  { %6735 = vmatpush1.bf16.msra.mxu1 %v7914_v54  ;;  %6899 = vmatpush1.bf16.msra.mxu0 %v7916_v61  ;;  %v3816_v54 = vld [vmem:[#allocation27 + $0x7e8] sm:$0xff]  ;;  %v7962_v61 = vcombine.low %v3803_v43, %v3807_v6  ;;  %v3843_v43 = vld [vmem:[#allocation27 + $0x8c0] sm:$0xff] }
 0x657   :  { %6736 = vmatprep.subr.bf16.mxu1 %v7923_v0  ;;  %6900 = vmatprep.subr.bf16.mxu0 %v7925_v52  ;;  %v7964_v0 = vcombine.low %v3804_v11, %v3808_v12  ;;  %v7971_v52 = vcombine.high %v3811_v48, %v3815_v50  ;;  %v7973_v55 = vcombine.high %v3812_v60, %v3816_v54  ;;  %v3847_v11 = vld [vmem:[#allocation27 + $0x8e0] sm:$0xff]  ;;  %v3844_v12 = vld [vmem:[#allocation27 + $0x8c8] sm:$0xff] }
 0x658   :  { %v8002_v58 = vcombine.low %v3843_v43, %v3847_v11 }
 0x65a   :  { %6737 = vmatpush1.bf16.msra.mxu1 %v7922_v13  ;;  %6901 = vmatpush1.bf16.msra.mxu0 %v7924_v16  ;;  %v3820_v13 = vld [vmem:[#allocation27 + $0x808] sm:$0xff] }
 0x65b   :  { %6738 = vmatprep.subr.bf16.mxu1 %v7931_v18  ;;  %6902 = vmatprep.subr.bf16.mxu0 %v7933_v20  ;;  %v3824_v16 = vld [vmem:[#allocation27 + $0x828] sm:$0xff]  ;;  %v7970_v18 = vcombine.low %v3811_v48, %v3815_v50  ;;  %v7972_v20 = vcombine.low %v3812_v60, %v3816_v54 }
 0x65c   :  { %v7981_v24 = vcombine.high %v3820_v13, %v3824_v16  ;;  %v7980_v62 = vcombine.low %v3820_v13, %v3824_v16  ;;  %v3855_v16 = vld [vmem:[#allocation27 + $0x920] sm:$0xff] }
 0x65e   :  { %6739 = vmatpush1.bf16.msra.mxu1 %v7930_v21  ;;  %6903 = vmatpush1.bf16.msra.mxu0 %v7932_v59  ;;  %v9547_v21 = vsub.s32 4, %v9388_v1  ;;  %v3831_v59 = vld [vmem:[#allocation27 + $0x860] sm:$0xff] }
 0x65f   :  { %6740 = vmatprep.subr.bf16.mxu1 %v7939_v23  ;;  %6904 = vmatprep.subr.bf16.mxu0 %v7941_v27  ;;  %v3828_v23 = vld [vmem:[#allocation27 + $0x848] sm:$0xff]  ;;  %v7986_v36 = vcombine.low %v3827_v4, %v3831_v59 }
 0x660   :  { %v3832_v27 = vld [vmem:[#allocation27 + $0x868] sm:$0xff] }
 0x661   :  { %v7988_v38 = vcombine.low %v3828_v23, %v3832_v27 }
 0x662   :  { %6741 = vmatpush1.bf16.msra.mxu1 %v7938_v5  ;;  %6905 = vmatpush1.bf16.msra.mxu0 %v7940_v25  ;;  %v7987_v5 = vcombine.high %v3827_v4, %v3831_v59  ;;  %v7989_v25 = vcombine.high %v3828_v23, %v3832_v27  ;;  %v8011_v27 = vcombine.high %v3851_v8, %v3855_v16 }
 0x663   :  { %6742 = vmatprep.subr.bf16.mxu1 %v7947_v22  ;;  %6906 = vmatprep.subr.bf16.mxu0 %v7949_v30  ;;  %v3835_v22 = vld [vmem:[#allocation27 + $0x880] sm:$0xff]  ;;  %v1652_v30 = vrot.slane %v9493_v32, %v9547_v21 }
 0x664   :  { %v7994_v54 = vcombine.low %v3835_v22, %v3839_v37 }
 0x666   :  { %6743 = vmatpush1.bf16.msra.mxu1 %v7946_v40  ;;  %6907 = vmatpush1.bf16.msra.mxu0 %v7948_v41  ;;  %v1664_v40 = vrot.slane %v9493_v32, %v9553_v7 }
 0x667   :  { %6744 = vmatprep.subr.bf16.mxu1 %v7955_v42  ;;  %6908 = vmatprep.subr.bf16.mxu0 %v7957_v15  ;;  %v7995_v42 = vcombine.high %v3835_v22, %v3839_v37  ;;  %v7997_v15 = vcombine.high %v3836_v31, %v3840_v33  ;;  %v3863_v22 = vld [vmem:[#allocation27 + $0x960] sm:$0xff]  ;;  %v3864_v37 = vld [vmem:[#allocation27 + $0x968] sm:$0xff] }
 0x66a   :  { %6745 = vmatpush1.bf16.msra.mxu1 %v7954_v34  ;;  %6909 = vmatpush1.bf16.msra.mxu0 %v7956_v14  ;;  %v3848_v34 = vld [vmem:[#allocation27 + $0x8e8] sm:$0xff] }
 0x66b   :  { %6746 = vmatprep.subr.bf16.mxu1 %v7963_v46  ;;  %6910 = vmatprep.subr.bf16.mxu0 %v7965_v47  ;;  %v8005_v56 = vcombine.high %v3844_v12, %v3848_v34  ;;  %v8004_v59 = vcombine.low %v3844_v12, %v3848_v34  ;;  %v3871_v12 = vld [vmem:[#allocation27 + $0x9a0] sm:$0xff]  ;;  %v3868_v34 = vld [vmem:[#allocation27 + $0x988] sm:$0xff] }
 0x66e   :  { %6747 = vmatpush1.bf16.msra.mxu1 %v7962_v61  ;;  %6911 = vmatpush1.bf16.msra.mxu0 %v7964_v0  ;;  %v7996_v61 = vcombine.low %v3836_v31, %v3840_v33 }
 0x66f   :  { %6748 = vmatprep.subr.bf16.mxu1 %v7971_v52  ;;  %6912 = vmatprep.subr.bf16.mxu0 %v7973_v55  ;;  %v8003_v55 = vcombine.high %v3843_v43, %v3847_v11  ;;  %v3867_v43 = vld [vmem:[#allocation27 + $0x980] sm:$0xff] }
 0x672   :  { %6749 = vmatpush1.bf16.msra.mxu1 %v7970_v18  ;;  %6913 = vmatpush1.bf16.msra.mxu0 %v7972_v20  ;;  %v3852_v18 = vld [vmem:[#allocation27 + $0x908] sm:$0xff] }
 0x673   :  { %6759 = vmatprep.subr.bf16.mxu1 %v7979_v57  ;;  %6923 = vmatprep.subr.bf16.mxu0 %v7981_v24  ;;  %v3856_v20 = vld [vmem:[#allocation27 + $0x928] sm:$0xff] }
 0x675   :  { %6751 = vmatmul.mubr.bf16.vlgmr.msra.gmra.mrb[16].mxu1 %v9555_v63  ;;  %6915 = vmatmul.mubr.bf16.vlgmr.msra.gmra.mrb[20].mxu0 %v9555_v63 }
 0x676   :  { %6760 = vmatpush1.bf16.msra.mxu1 %v7978_v28  ;;  %6924 = vmatpush1.bf16.msra.mxu0 %v7980_v62  ;;  %v8013_v28 = vcombine.high %v3852_v18, %v3856_v20  ;;  %v3859_v62 = vld [vmem:[#allocation27 + $0x940] sm:$0xff] }
 0x677   :  { %6761 = vmatprep.subr.bf16.mxu1 %v7987_v5  ;;  %6925 = vmatprep.subr.bf16.mxu0 %v7989_v25 }
 0x678   :  { %v3192_v41 = vpop.f32.mrb[12].mxu1 }
 0x679   :  { %v9565_v44 = vadd.f32 %v3192_v41, %v1652_v30  ;;  %v9567_v10 = vpop.f32.mrb[16].mxu0  ;;  %v3194_v6 = vpop.f32.mrb[13].mxu1  ;;  %v3860_v30 = vld [vmem:[#allocation27 + $0x948] sm:$0xff] }
 0x67a   :  { %v9569_v14 = vadd.f32 %v3194_v6, %v1656_v26  ;;  %v3276_v46 = vpop.f32.mrb[17].mxu0  ;;  %v3196_v47 = vpop.f32.mrb[14].mxu1  ;;  %6762 = vmatpush1.bf16.msra.mxu1 %v7986_v36  ;;  %6926 = vmatpush1.bf16.msra.mxu0 %v7988_v38  ;;  %v8010_v36 = vcombine.low %v3851_v8, %v3855_v16  ;;  %v8012_v38 = vcombine.low %v3852_v18, %v3856_v20  ;;  %v3880_v16 = vld [vmem:[#allocation27 + $0x9e8] sm:$0xff] }
 0x67b   :  { %v3305_v48 = vrot.slane %v9565_v44, 4  ;;  %v9572_v49 = vadd.f32 %v3276_v46, %v1664_v40  ;;  %v3278_v50 = vpop.f32.mrb[18].mxu0  ;;  %v3197_v60 = vpop.f32.mrb[15].mxu1  ;;  %6763 = vmatprep.subr.bf16.mxu1 %v7995_v42  ;;  %6927 = vmatprep.subr.bf16.mxu0 %v7997_v15  ;;  %v9580_v40 = vsub.s32 6, %v9388_v1  ;;  %v8019_v42 = vcombine.high %v3859_v62, %v3863_v22  ;;  %v3872_v46 = vld [vmem:[#allocation27 + $0x9a8] sm:$0xff] }
 0x67c   :  { %v3311_v0 = vrot.slane %v9569_v14, 4  ;;  %v3279_v52 = vpop.f32.mrb[19].mxu0  ;;  %v8021_v15 = vcombine.high %v3860_v30, %v3864_v37  ;;  %v8018_v60 = vcombine.low %v3859_v62, %v3863_v22  ;;  %v8026_v20 = vcombine.low %v3867_v43, %v3871_v12  ;;  %v3888_v62 = vld [vmem:[#allocation27 + $0xa28] sm:$0xff] }
 0x67d   :  { %v3306_v9 = vadd.f32 %v9565_v44, %v3305_v48  ;;  %v3323_v13 = vrot.slane %v9572_v49, 4  ;;  %v1660_v1 = vrot.slane %v9493_v32, %v9580_v40  ;;  %v8029_v52 = vcombine.high %v3868_v34, %v3872_v46 }
 0x67e   :  { %v3312_v57 = vadd.f32 %v9569_v14, %v3311_v0  ;;  %6764 = vmatpush1.bf16.msra.mxu1 %v7994_v54  ;;  %6928 = vmatpush1.bf16.msra.mxu0 %v7996_v61  ;;  %v8020_v54 = vcombine.low %v3860_v30, %v3864_v37  ;;  %v8027_v0 = vcombine.high %v3867_v43, %v3871_v12  ;;  %v3896_v43 = vld [vmem:[#allocation27 + $0xa68] sm:$0xff] }
 0x67f   :  { %v3307_v24 = vrot.slane %v3306_v9, 2  ;;  %v3324_v4 = vadd.f32 %v9572_v49, %v3323_v13  ;;  %6765 = vmatprep.subr.bf16.mxu1 %v8003_v55  ;;  %6929 = vmatprep.subr.bf16.mxu0 %v8005_v56  ;;  %v3875_v55 = vld [vmem:[#allocation27 + $0x9c0] sm:$0xff]  ;;  %v3876_v13 = vld [vmem:[#allocation27 + $0x9c8] sm:$0xff] }
 0x680   :  { %v3313_v23 = vrot.slane %v3312_v57, 2  ;;  %v3879_v56 = vld [vmem:[#allocation27 + $0x9e0] sm:$0xff]  ;;  %v8036_v30 = vcombine.low %v3876_v13, %v3880_v16 }
 0x681   :  { %v3308_v5 = vadd.f32 %v3307_v24, %v3306_v9  ;;  %v3325_v25 = vrot.slane %v3324_v4, 2 }
 0x682   :  { %v3314_v31 = vadd.f32 %v3313_v23, %v3312_v57  ;;  %6766 = vmatpush1.bf16.msra.mxu1 %v8002_v58  ;;  %6930 = vmatpush1.bf16.msra.mxu0 %v8004_v59  ;;  %v8028_v57 = vcombine.low %v3868_v34, %v3872_v46  ;;  %v3883_v59 = vld [vmem:[#allocation27 + $0xa00] sm:$0xff] }
 0x683   :  { %v3309_v33 = vrot.slane %v3308_v5, 1  ;;  %v3326_v26 = vadd.f32 %v3325_v25, %v3324_v4  ;;  %6767 = vmatprep.subr.bf16.mxu1 %v8011_v27  ;;  %6931 = vmatprep.subr.bf16.mxu0 %v8013_v28  ;;  %v8035_v4 = vcombine.high %v3875_v55, %v3879_v56  ;;  %v3887_v28 = vld [vmem:[#allocation27 + $0xa20] sm:$0xff] }
 0x684   :  { %v3315_v41 = vrot.slane %v3314_v31, 1 }
 0x685   :  { %v3310_v6 = vadd.f32 %v3309_v33, %v3308_v5  ;;  %v3327_v11 = vrot.slane %v3326_v26, 1  ;;  %v8043_v33 = vcombine.high %v3883_v59, %v3887_v28 }
 0x686   :  { %v3316_v47 = vadd.f32 %v3315_v41, %v3314_v31  ;;  %6768 = vmatpush1.bf16.msra.mxu1 %v8010_v36  ;;  %6932 = vmatpush1.bf16.msra.mxu0 %v8012_v38  ;;  %v3891_v36 = vld [vmem:[#allocation27 + $0xa40] sm:$0xff] }
 0x687   :  { %v3333_v48 = vmul.f32 0.125, %v3310_v6  ;;  %v3328_v50 = vadd.f32 %v3327_v11, %v3326_v26  ;;  %6769 = vmatprep.subr.bf16.mxu1 %v8019_v42  ;;  %6933 = vmatprep.subr.bf16.mxu0 %v8021_v15  ;;  %v3895_v38 = vld [vmem:[#allocation27 + $0xa60] sm:$0xff]  ;;  %v3892_v15 = vld [vmem:[#allocation27 + $0xa48] sm:$0xff]  ;;  %v8042_v11 = vcombine.low %v3883_v59, %v3887_v28 }
 0x688   :  { %v3334_v61 = vmul.f32 0.125, %v3316_v47  ;;  %v8051_v47 = vcombine.high %v3891_v36, %v3895_v38  ;;  %v3908_v28 = vld [vmem:[#allocation27 + $0xac8] sm:$0xff] }
 0x689   :  { %v9585_v8 = vsub.f32 %v9565_v44, %v3333_v48  ;;  %v3336_v9 = vmul.f32 0.125, %v3328_v50  ;;  %v9596_v44 = vadd.f32 %v9567_v10, %v1660_v1  ;;  %v8034_v10 = vcombine.low %v3875_v55, %v3879_v56  ;;  %v3904_v55 = vld [vmem:[#allocation27 + $0xaa8] sm:$0xff] }
 0x68a   :  { %v9588_v18 = vsub.f32 %v9569_v14, %v3334_v61  ;;  %6770 = vmatpush1.bf16.msra.mxu1 %v8018_v60  ;;  %6934 = vmatpush1.bf16.msra.mxu0 %v8020_v54  ;;  %v8037_v14 = vcombine.high %v3876_v13, %v3880_v16  ;;  %v8053_v60 = vcombine.high %v3892_v15, %v3896_v43  ;;  %v3899_v54 = vld [vmem:[#allocation27 + $0xa80] sm:$0xff] }
 0x68b   :  { %v3349_v32 = vmul.f32 %v9585_v8, %v9585_v8  ;;  %v9593_v24 = vsub.f32 %v9572_v49, %v3336_v9  ;;  %6771 = vmatprep.subr.bf16.mxu1 %v8027_v0  ;;  %6935 = vmatprep.subr.bf16.mxu0 %v8029_v52  ;;  %v3884_v49 = vld [vmem:[#allocation27 + $0xa08] sm:$0xff]  ;;  %v3317_v37 = vrot.slane %v9596_v44, 4  ;;  %v3903_v0 = vld [vmem:[#allocation27 + $0xaa0] sm:$0xff]  ;;  %v8050_v16 = vcombine.low %v3891_v36, %v3895_v38 }
 0x68c   :  { %v3350_v58 = vmul.f32 %v9588_v18, %v9588_v18  ;;  %v8045_v26 = vcombine.high %v3884_v49, %v3888_v62  ;;  %v8044_v46 = vcombine.low %v3884_v49, %v3888_v62  ;;  %v3900_v52 = vld [vmem:[#allocation27 + $0xa88] sm:$0xff]  ;;  %v3919_v38 = vld [vmem:[#allocation27 + $0xb20] sm:$0xff] }
 0x68d   :  { %v3377_v23 = vrot.slane %v3349_v32, 4  ;;  %v3352_v27 = vmul.f32 %v9593_v24, %v9593_v24  ;;  %v3318_v48 = vadd.f32 %v9596_v44, %v3317_v37  ;;  %v3912_v49 = vld [vmem:[#allocation27 + $0xae8] sm:$0xff] }
 0x68e   :  { %v3383_v5 = vrot.slane %v3350_v58, 4  ;;  %6772 = vmatpush1.bf16.msra.mxu1 %v8026_v20  ;;  %6936 = vmatpush1.bf16.msra.mxu0 %v8028_v57  ;;  %v8052_v20 = vcombine.low %v3892_v15, %v3896_v43  ;;  %v8068_v43 = vcombine.low %v3908_v28, %v3912_v49 }
 0x68f   :  { %v3378_v25 = vadd.f32 %v3377_v23, %v3349_v32  ;;  %v3395_v22 = vrot.slane %v3352_v27, 4  ;;  %6773 = vmatprep.subr.bf16.mxu1 %v8035_v4  ;;  %6937 = vmatprep.subr.bf16.mxu0 %v8037_v14  ;;  %v3319_v57 = vrot.slane %v3318_v48, 2  ;;  %v8059_v4 = vcombine.high %v3899_v54, %v3903_v0  ;;  %v3907_v14 = vld [vmem:[#allocation27 + $0xac0] sm:$0xff] }
 0x690   :  { %v3384_v31 = vadd.f32 %v3383_v5, %v3350_v58  ;;  %v8061_v58 = vcombine.high %v3900_v52, %v3904_v55 }
 0x691   :  { %v3379_v41 = vrot.slane %v3378_v25, 2  ;;  %v3396_v42 = vadd.f32 %v3395_v22, %v3352_v27  ;;  %v3911_v27 = vld [vmem:[#allocation27 + $0xae0] sm:$0xff]  ;;  %v8058_v22 = vcombine.low %v3899_v54, %v3903_v0 }
 0x692   :  { %v3385_v6 = vrot.slane %v3384_v31, 2  ;;  %6774 = vmatpush1.bf16.msra.mxu1 %v8034_v10  ;;  %6938 = vmatpush1.bf16.msra.mxu0 %v8036_v30  ;;  %v8060_v10 = vcombine.low %v3900_v52, %v3904_v55  ;;  %v3320_v30 = vadd.f32 %v3319_v57, %v3318_v48  ;;  %v8066_v15 = vcombine.low %v3907_v14, %v3911_v27  ;;  %v3928_v48 = vld [vmem:[#allocation27 + $0xb68] sm:$0xff]  ;;  %v3931_v0 = vld [vmem:[#allocation27 + $0xb80] sm:$0xff] }
 0x693   :  { %v3380_v12 = vadd.f32 %v3379_v41, %v3378_v25  ;;  %v3397_v34 = vrot.slane %v3396_v42, 2  ;;  %6775 = vmatprep.subr.bf16.mxu1 %v8043_v33  ;;  %6939 = vmatprep.subr.bf16.mxu0 %v8045_v26  ;;  %v8069_v33 = vcombine.high %v3908_v28, %v3912_v49  ;;  %v3915_v26 = vld [vmem:[#allocation27 + $0xb00] sm:$0xff]  ;;  %v3916_v41 = vld [vmem:[#allocation27 + $0xb08] sm:$0xff]  ;;  %v3457_v57 = vrot.slane %v9503_v51, %v9550_v29 }
 0x694   :  { %v3386_v50 = vadd.f32 %v3385_v6, %v3384_v31  ;;  %v8067_v31 = vcombine.high %v3907_v14, %v3911_v27  ;;  %v3321_v6 = vrot.slane %v3320_v30, 1  ;;  %v3935_v52 = vld [vmem:[#allocation27 + $0xba0] sm:$0xff]  ;;  %v3932_v55 = vld [vmem:[#allocation27 + $0xb88] sm:$0xff] }
 0x695   :  { %v3381_v1 = vrot.slane %v3380_v12, 1  ;;  %v3398_v61 = vadd.f32 %v3397_v34, %v3396_v42  ;;  %v3920_v42 = vld [vmem:[#allocation27 + $0xb28] sm:$0xff]  ;;  %v3923_v34 = vld [vmem:[#allocation27 + $0xb40] sm:$0xff] }
 0x696   :  { %v3387_v56 = vrot.slane %v3386_v50, 1  ;;  %6776 = vmatpush1.bf16.msra.mxu1 %v8042_v11  ;;  %6940 = vmatpush1.bf16.msra.mxu0 %v8044_v46  ;;  %v8075_v11 = vcombine.high %v3915_v26, %v3919_v38  ;;  %v3927_v46 = vld [vmem:[#allocation27 + $0xb60] sm:$0xff]  ;;  %v3322_v54 = vadd.f32 %v3321_v6, %v3320_v30  ;;  %v3940_v28 = vld [vmem:[#allocation27 + $0xbc8] sm:$0xff] }
 0x697   :  { %v3382_v9 = vadd.f32 %v3381_v1, %v3380_v12  ;;  %v3399_v13 = vrot.slane %v3398_v61, 1  ;;  %6777 = vmatprep.subr.bf16.mxu1 %v8051_v47  ;;  %6941 = vmatprep.subr.bf16.mxu0 %v8053_v60  ;;  %v8077_v12 = vcombine.high %v3916_v41, %v3920_v42  ;;  %v3924_v47 = vld [vmem:[#allocation27 + $0xb48] sm:$0xff]  ;;  %v8076_v60 = vcombine.low %v3916_v41, %v3920_v42  ;;  %v3943_v27 = vld [vmem:[#allocation27 + $0xbe0] sm:$0xff] }
 0x698   :  { %v3388_v32 = vadd.f32 %v3387_v56, %v3386_v50  ;;  %v8074_v50 = vcombine.low %v3915_v26, %v3919_v38  ;;  %v8083_v1 = vcombine.high %v3923_v34, %v3927_v46  ;;  %v3936_v56 = vld [vmem:[#allocation27 + $0xba8] sm:$0xff]  ;;  %v3335_v14 = vmul.f32 0.125, %v3322_v54  ;;  %v3951_v42 = vld [vmem:[#allocation27 + $0xc20] sm:$0xff] }
 0x699   :  { %v3405_v59 = vmul.f32 0.125, %v3382_v9  ;;  %v3400_v23 = vadd.f32 %v3399_v13, %v3398_v61  ;;  %v8085_v61 = vcombine.high %v3924_v47, %v3928_v48  ;;  %v3453_v9 = vrot.slane %v9503_v51, %v9547_v21  ;;  %v3944_v49 = vld [vmem:[#allocation27 + $0xbe8] sm:$0xff]  ;;  %v3955_v54 = vld [vmem:[#allocation27 + $0xc40] sm:$0xff] }
 0x69a   :  { %v3406_v62 = vmul.f32 0.125, %v3388_v32  ;;  %6778 = vmatpush1.bf16.msra.mxu1 %v8050_v16  ;;  %6942 = vmatpush1.bf16.msra.mxu0 %v8052_v20  ;;  %v8082_v13 = vcombine.low %v3923_v34, %v3927_v46  ;;  %v3502_v20 = vrot.slane %v9505_v53, %v9547_v21  ;;  %v8084_v32 = vcombine.low %v3924_v47, %v3928_v48 }
 0x69b   :  { %v3413_v5 = vadd.f32 0.8, %v3405_v59  ;;  %v3408_v25 = vmul.f32 0.125, %v3400_v23  ;;  %6779 = vmatprep.subr.bf16.mxu1 %v8059_v4  ;;  %6943 = vmatprep.subr.bf16.mxu0 %v8061_v58  ;;  %v3939_v4 = vld [vmem:[#allocation27 + $0xbc0] sm:$0xff]  ;;  %v8091_v59 = vcombine.high %v3931_v0, %v3935_v52  ;;  %v8093_v23 = vcombine.high %v3932_v55, %v3936_v56 }
 0x69c   :  { %v3414_v37 = vadd.f32 0.8, %v3406_v62  ;;  %v8099_v26 = vcombine.high %v3939_v4, %v3943_v27  ;;  %v9620_v41 = vsub.f32 %v9596_v44, %v3335_v14  ;;  %v8100_v34 = vcombine.low %v3940_v28, %v3944_v49  ;;  %v3964_v14 = vld [vmem:[#allocation27 + $0xc88] sm:$0xff] }
 0x69d   :  { %8559 = vrsqrt.f32 %v3413_v5  ;;  %v3416_v36 = vadd.f32 0.8, %v3408_v25  ;;  %v3506_v5 = vrot.slane %v9505_v53, %v9550_v29  ;;  %v3465_v25 = vrot.slane %v9503_v51, %v9553_v7 }
 0x69e   :  { %8561 = vrsqrt.f32 %v3414_v37  ;;  %6780 = vmatpush1.bf16.msra.mxu1 %v8058_v22  ;;  %6944 = vmatpush1.bf16.msra.mxu0 %v8060_v10  ;;  %v3514_v22 = vrot.slane %v9505_v53, %v9553_v7  ;;  %v8090_v37 = vcombine.low %v3931_v0, %v3935_v52  ;;  %v3947_v53 = vld [vmem:[#allocation27 + $0xc00] sm:$0xff]  ;;  %v3351_v44 = vmul.f32 %v9620_v41, %v9620_v41  ;;  %v3956_v52 = vld [vmem:[#allocation27 + $0xc48] sm:$0xff] }
 0x69f   :  { %8563 = vrsqrt.f32 %v3416_v36  ;;  %6781 = vmatprep.subr.bf16.mxu1 %v8067_v31  ;;  %6945 = vmatprep.subr.bf16.mxu0 %v8069_v33  ;;  %v8092_v31 = vcombine.low %v3932_v55, %v3936_v56  ;;  %v8101_v36 = vcombine.high %v3940_v28, %v3944_v49  ;;  %v8107_v46 = vcombine.high %v3947_v53, %v3951_v42  ;;  %v3959_v0 = vld [vmem:[#allocation27 + $0xc60] sm:$0xff]  ;;  %v3960_v55 = vld [vmem:[#allocation27 + $0xc68] sm:$0xff] }
 0x6a0   :  { %v8116_v28 = vcombine.low %v3956_v52, %v3960_v55 }
 0x6a2   :  { %6782 = vmatpush1.bf16.msra.mxu1 %v8066_v15  ;;  %6946 = vmatpush1.bf16.msra.mxu0 %v8068_v43  ;;  %v3948_v43 = vld [vmem:[#allocation27 + $0xc08] sm:$0xff] }
 0x6a3   :  { %6783 = vmatprep.subr.bf16.mxu1 %v8075_v11  ;;  %6947 = vmatprep.subr.bf16.mxu0 %v8077_v12  ;;  %v8098_v11 = vcombine.low %v3939_v4, %v3943_v27  ;;  %v8117_v4 = vcombine.high %v3956_v52, %v3960_v55  ;;  %v8114_v27 = vcombine.low %v3955_v54, %v3959_v0 }
 0x6a6   :  { %6784 = vmatpush1.bf16.msra.mxu1 %v8074_v50  ;;  %6948 = vmatpush1.bf16.msra.mxu0 %v8076_v60 }
 0x6a7   :  { %v8560_v16 = vpop.eup %8559  ;;  %6785 = vmatprep.subr.bf16.mxu1 %v8083_v1  ;;  %6949 = vmatprep.subr.bf16.mxu0 %v8085_v61  ;;  %v8106_v61 = vcombine.low %v3947_v53, %v3951_v42  ;;  %v3984_v53 = vld [vmem:[#allocation27 + $0xd28] sm:$0xff] }
 0x6a8   :  { %v3429_v58 = vmul.f32 %v8560_v16, %v9585_v8  ;;  %v8562_v62 = vpop.eup %8561  ;;  %v3389_v16 = vrot.slane %v3351_v44, 4 }
 0x6a9   :  { %v8564_v10 = vpop.eup %8563  ;;  %v3430_v30 = vmul.f32 %v8562_v62, %v9588_v18  ;;  %v3952_v18 = vld [vmem:[#allocation27 + $0xc28] sm:$0xff] }
 0x6aa   :  { %v3478_v8 = vmul.f32 %v3453_v9, %v3429_v58  ;;  %v3432_v33 = vmul.f32 %v8564_v10, %v9593_v24  ;;  %6786 = vmatpush1.bf16.msra.mxu1 %v8082_v13  ;;  %6950 = vmatpush1.bf16.msra.mxu0 %v8084_v32  ;;  %v8109_v48 = vcombine.high %v3948_v43, %v3952_v18  ;;  %v3967_v58 = vld [vmem:[#allocation27 + $0xca0] sm:$0xff]  ;;  %v3972_v10 = vld [vmem:[#allocation27 + $0xcc8] sm:$0xff] }
 0x6ab   :  { %v3479_v51 = vmul.f32 %v3457_v57, %v3430_v30  ;;  %6787 = vmatprep.subr.bf16.mxu1 %v8091_v59  ;;  %6951 = vmatprep.subr.bf16.mxu0 %v8093_v23  ;;  %v8108_v9 = vcombine.low %v3948_v43, %v3952_v18  ;;  %v3963_v57 = vld [vmem:[#allocation27 + $0xc80] sm:$0xff]  ;;  %v8115_v32 = vcombine.high %v3955_v54, %v3959_v0  ;;  %v3968_v59 = vld [vmem:[#allocation27 + $0xca8] sm:$0xff] }
 0x6ac   :  { %v3527_v38 = vadd.f32 %v3502_v20, %v3478_v8  ;;  %v3481_v15 = vmul.f32 %v3465_v25, %v3432_v33  ;;  %v3390_v49 = vadd.f32 %v3389_v16, %v3351_v44  ;;  %v8123_v62 = vcombine.high %v3963_v57, %v3967_v58  ;;  %v3971_v25 = vld [vmem:[#allocation27 + $0xcc0] sm:$0xff]  ;;  %v3976_v8 = vld [vmem:[#allocation27 + $0xce8] sm:$0xff] }
 0x6ad   :  { %v3528_v6 = vadd.f32 %v3506_v5, %v3479_v51  ;;  %v8125_v5 = vcombine.high %v3964_v14, %v3968_v59  ;;  %v8122_v30 = vcombine.low %v3963_v57, %v3967_v58  ;;  %v3980_v51 = vld [vmem:[#allocation27 + $0xd08] sm:$0xff]  ;;  %v3999_v54 = vld [vmem:[#allocation27 + $0xda0] sm:$0xff] }
 0x6ae   :  { %vm3535_vm0 = vcmp.gt.f32.partialorder %v3527_v38, 0.0  ;;  %v3543_v24 = vmul.f32 0.2, %v3527_v38  ;;  %v3530_v12 = vadd.f32 %v3514_v22, %v3481_v15  ;;  %6788 = vmatpush1.bf16.msra.mxu1 %v8090_v37  ;;  %6952 = vmatpush1.bf16.msra.mxu0 %v8092_v31  ;;  %v3975_v22 = vld [vmem:[#allocation27 + $0xce0] sm:$0xff]  ;;  %v8124_v37 = vcombine.low %v3964_v14, %v3968_v59 }
 0x6af   :  { %6789 = vmatprep.subr.bf16.mxu1 %v8099_v26  ;;  %6953 = vmatprep.subr.bf16.mxu0 %v8101_v36  ;;  %vm3536_vm1 = vcmp.gt.f32.partialorder %v3528_v6, 0.0  ;;  %v3544_v47 = vmul.f32 0.2, %v3528_v6  ;;  %v3391_v31 = vrot.slane %v3390_v49, 2  ;;  %v8131_v33 = vcombine.high %v3971_v25, %v3975_v22  ;;  %v3979_v36 = vld [vmem:[#allocation27 + $0xd00] sm:$0xff] }
 0x6b0   :  { %v3551_v50 = vsel %vm3535_vm0, %v3527_v38, %v3543_v24  ;;  %vm3538_vm2 = vcmp.gt.f32.partialorder %v3530_v12, 0.0  ;;  %v3546_v60 = vmul.f32 0.2, %v3530_v12  ;;  %v8133_v26 = vcombine.high %v3972_v10, %v3976_v8  ;;  %v3983_v38 = vld [vmem:[#allocation27 + $0xd20] sm:$0xff] }
 0x6b1   :  { %v3552_v1 = vsel %vm3536_vm1, %v3528_v6, %v3544_v47  ;;  %v9626_v20 = vpack.c.bf16 %v3551_v50, %v3551_v50  ;;  %v8130_v42 = vcombine.low %v3971_v25, %v3975_v22  ;;  %v8132_v15 = vcombine.low %v3972_v10, %v3976_v8  ;;  %v3991_v24 = vld [vmem:[#allocation27 + $0xd60] sm:$0xff]  ;;  %v4016_v25 = vld [vmem:[#allocation27 + $0xe28] sm:$0xff] }
 0x6b2   :  { %6790 = vmatpush1.bf16.msra.mxu1 %v8098_v11  ;;  %6954 = vmatpush1.bf16.msra.mxu0 %v8100_v34  ;;  %v9624_v56 = vpack.c.bf16 %v3552_v1, %v3552_v1  ;;  %v3554_v13 = vsel %vm3538_vm2, %v3530_v12, %v3546_v60  ;;  %v3392_v43 = vadd.f32 %v3391_v31, %v3390_v49  ;;  %v3987_v11 = vld [vmem:[#allocation27 + $0xd40] sm:$0xff]  ;;  %v3988_v12 = vld [vmem:[#allocation27 + $0xd48] sm:$0xff] }
 0x6b3   :  { %6800 = vmatprep.subr.bf16.mxu1 %v8107_v46  ;;  %6964 = vmatprep.subr.bf16.mxu0 %v8109_v48  ;;  %v9632_v23 = vpack.c.bf16 %v3554_v13, %v3554_v13  ;;  %v8139_v18 = vcombine.high %v3979_v36, %v3983_v38  ;;  %v8141_v6 = vcombine.high %v3980_v51, %v3984_v53  ;;  %v3992_v34 = vld [vmem:[#allocation27 + $0xd68] sm:$0xff]  ;;  %v3995_v60 = vld [vmem:[#allocation27 + $0xd80] sm:$0xff] }
 0x6b4   :  { %6791 = vmatprep.mubr.bf16.mxu1 %v9624_v56  ;;  %6955 = vmatprep.mubr.bf16.mxu0 %v9624_v56  ;;  %v8138_v46 = vcombine.low %v3979_v36, %v3983_v38  ;;  %v8140_v44 = vcombine.low %v3980_v51, %v3984_v53  ;;  %v3393_v47 = vrot.slane %v3392_v43, 1  ;;  %v8147_v48 = vcombine.high %v3987_v11, %v3991_v24  ;;  %v3996_v1 = vld [vmem:[#allocation27 + $0xd88] sm:$0xff]  ;;  %v4003_v16 = vld [vmem:[#allocation27 + $0xdc0] sm:$0xff] }
 0x6b5   :  { %6792 = vmatmul.mubr.bf16.vlgmr.msra.gmra.mrb[16].mxu1 %v9626_v20  ;;  %6956 = vmatmul.mubr.bf16.vlgmr.msra.gmra.mrb[20].mxu0 %v9626_v20  ;;  %v8149_v50 = vcombine.high %v3988_v12, %v3992_v34  ;;  %v8146_v0 = vcombine.low %v3987_v11, %v3991_v24  ;;  %v8148_v52 = vcombine.low %v3988_v12, %v3992_v34  ;;  %v4007_v57 = vld [vmem:[#allocation27 + $0xde0] sm:$0xff]  ;;  %v4024_v36 = vld [vmem:[#allocation27 + $0xe68] sm:$0xff] }
 0x6b6   :  { %6801 = vmatpush1.bf16.msra.mxu1 %v8106_v61  ;;  %6965 = vmatpush1.bf16.msra.mxu0 %v8108_v9  ;;  %v4000_v61 = vld [vmem:[#allocation27 + $0xda8] sm:$0xff]  ;;  %v3394_v55 = vadd.f32 %v3393_v47, %v3392_v43  ;;  %v8155_v9 = vcombine.high %v3995_v60, %v3999_v54  ;;  %v8154_v58 = vcombine.low %v3995_v60, %v3999_v54  ;;  %v4011_v49 = vld [vmem:[#allocation27 + $0xe00] sm:$0xff] }
 0x6b7   :  { %6832 = vmatprep.mubr.bf16.mxu1 %v9632_v23  ;;  %6996 = vmatprep.mubr.bf16.mxu0 %v9632_v23  ;;  %v8157_v13 = vcombine.high %v3996_v1, %v4000_v61  ;;  %v8156_v14 = vcombine.low %v3996_v1, %v4000_v61  ;;  %v8162_v22 = vcombine.low %v4003_v16, %v4007_v57  ;;  %v4019_v31 = vld [vmem:[#allocation27 + $0xe40] sm:$0xff]  ;;  %v4036_v47 = vld [vmem:[#allocation27 + $0xec8] sm:$0xff] }
 0x6b8   :  { %6802 = vmatprep.subr.bf16.mxu1 %v8115_v32  ;;  %6966 = vmatprep.subr.bf16.mxu0 %v8117_v4  ;;  %v4004_v32 = vld [vmem:[#allocation27 + $0xdc8] sm:$0xff]  ;;  %v3407_v59 = vmul.f32 0.125, %v3394_v55  ;;  %v4031_v43 = vld [vmem:[#allocation27 + $0xea0] sm:$0xff] }
 0x6b9   :  { %v4008_v4 = vld [vmem:[#allocation27 + $0xde8] sm:$0xff]  ;;  %v4043_v61 = vld [vmem:[#allocation27 + $0xf00] sm:$0xff] }
 0x6ba   :  { %6803 = vmatpush1.bf16.msra.mxu1 %v8114_v27  ;;  %6967 = vmatpush1.bf16.msra.mxu0 %v8116_v28  ;;  %v8163_v27 = vcombine.high %v4003_v16, %v4007_v57  ;;  %v8165_v28 = vcombine.high %v4004_v32, %v4008_v4  ;;  %v8164_v10 = vcombine.low %v4004_v32, %v4008_v4  ;;  %v3415_v8 = vadd.f32 0.8, %v3407_v59  ;;  %v4048_v55 = vld [vmem:[#allocation27 + $0xf28] sm:$0xff]  ;;  %v4051_v4 = vld [vmem:[#allocation27 + $0xf40] sm:$0xff] }
 0x6bb   :  { %6804 = vmatprep.subr.bf16.mxu1 %v8123_v62  ;;  %6968 = vmatprep.subr.bf16.mxu0 %v8125_v5  ;;  %v4015_v62 = vld [vmem:[#allocation27 + $0xe20] sm:$0xff]  ;;  %v4012_v5 = vld [vmem:[#allocation27 + $0xe08] sm:$0xff] }
 0x6bc   :  { %v8170_v38 = vcombine.low %v4011_v49, %v4015_v62  ;;  %v8172_v51 = vcombine.low %v4012_v5, %v4016_v25  ;;  %8565 = vrsqrt.f32 %v3415_v8 }
 0x6be   :  { %6805 = vmatpush1.bf16.msra.mxu1 %v8122_v30  ;;  %6969 = vmatpush1.bf16.msra.mxu0 %v8124_v37  ;;  %v8171_v30 = vcombine.high %v4011_v49, %v4015_v62  ;;  %v8173_v37 = vcombine.high %v4012_v5, %v4016_v25  ;;  %v4056_v49 = vld [vmem:[#allocation27 + $0xf68] sm:$0xff] }
 0x6bf   :  { %6806 = vmatprep.subr.bf16.mxu1 %v8131_v33  ;;  %6970 = vmatprep.subr.bf16.mxu0 %v8133_v26  ;;  %v4023_v33 = vld [vmem:[#allocation27 + $0xe60] sm:$0xff]  ;;  %v4020_v26 = vld [vmem:[#allocation27 + $0xe48] sm:$0xff] }
 0x6c0   :  { %v8179_v53 = vcombine.high %v4019_v31, %v4023_v33  ;;  %v8178_v11 = vcombine.low %v4019_v31, %v4023_v33  ;;  %v8180_v24 = vcombine.low %v4020_v26, %v4024_v36  ;;  %v4060_v31 = vld [vmem:[#allocation27 + $0xf88] sm:$0xff] }
 0x6c1   :  { %v4064_v33 = vld [vmem:[#allocation27 + $0xfa8] sm:$0xff] }
 0x6c2   :  { %6807 = vmatpush1.bf16.msra.mxu1 %v8130_v42  ;;  %6971 = vmatpush1.bf16.msra.mxu0 %v8132_v15  ;;  %v8181_v42 = vcombine.high %v4020_v26, %v4024_v36  ;;  %v4027_v15 = vld [vmem:[#allocation27 + $0xe80] sm:$0xff] }
 0x6c3   :  { %6808 = vmatprep.subr.bf16.mxu1 %v8139_v18  ;;  %6972 = vmatprep.subr.bf16.mxu0 %v8141_v6  ;;  %v4028_v18 = vld [vmem:[#allocation27 + $0xe88] sm:$0xff]  ;;  %v8187_v12 = vcombine.high %v4027_v15, %v4031_v43 }
 0x6c4   :  { %v4032_v6 = vld [vmem:[#allocation27 + $0xea8] sm:$0xff] }
 0x6c5   :  { %v8189_v34 = vcombine.high %v4028_v18, %v4032_v6  ;;  %v8188_v60 = vcombine.low %v4028_v18, %v4032_v6  ;;  %v4072_v18 = vld [vmem:[#allocation27 + $0xfe8] sm:$0xff] }
 0x6c6   :  { %6809 = vmatpush1.bf16.msra.mxu1 %v8138_v46  ;;  %6973 = vmatpush1.bf16.msra.mxu0 %v8140_v44  ;;  %v4035_v46 = vld [vmem:[#allocation27 + $0xec0] sm:$0xff] }
 0x6c7   :  { %6810 = vmatprep.subr.bf16.mxu1 %v8147_v48  ;;  %6974 = vmatprep.subr.bf16.mxu0 %v8149_v50  ;;  %v4039_v44 = vld [vmem:[#allocation27 + $0xee0] sm:$0xff]  ;;  %v4040_v48 = vld [vmem:[#allocation27 + $0xee8] sm:$0xff]  ;;  %v8186_v50 = vcombine.low %v4027_v15, %v4031_v43 }
 0x6c8   :  { %v8195_v54 = vcombine.high %v4035_v46, %v4039_v44  ;;  %v8197_v1 = vcombine.high %v4036_v47, %v4040_v48  ;;  %v8196_v16 = vcombine.low %v4036_v47, %v4040_v48  ;;  %v4071_v15 = vld [vmem:[#allocation27 + $0xfe0] sm:$0xff]  ;;  %v4068_v43 = vld [vmem:[#allocation27 + $0xfc8] sm:$0xff]  ;;  %v3566_v47 = vld [vmem:[#allocation27 + $0x18] sm:$0xff] }
 0x6c9   :  { %v3570_v48 = vld [vmem:[#allocation27 + $0x38] sm:$0xff] }
 0x6ca   :  { %6811 = vmatpush1.bf16.msra.mxu1 %v8146_v0  ;;  %6975 = vmatpush1.bf16.msra.mxu0 %v8148_v52  ;;  %v4047_v0 = vld [vmem:[#allocation27 + $0xf20] sm:$0xff]  ;;  %v4044_v52 = vld [vmem:[#allocation27 + $0xf08] sm:$0xff] }
 0x6cb   :  { %6812 = vmatprep.subr.bf16.mxu1 %v8155_v9  ;;  %6976 = vmatprep.subr.bf16.mxu0 %v8157_v13  ;;  %v8566_v9 = vpop.eup %8565  ;;  %v8194_v13 = vcombine.low %v4035_v46, %v4039_v44  ;;  %v8203_v57 = vcombine.high %v4043_v61, %v4047_v0  ;;  %v8205_v32 = vcombine.high %v4044_v52, %v4048_v55  ;;  %v3569_v44 = vld [vmem:[#allocation27 + $0x30] sm:$0xff] }
 0x6cc   :  { %v8202_v62 = vcombine.low %v4043_v61, %v4047_v0  ;;  %v8204_v5 = vcombine.low %v4044_v52, %v4048_v55  ;;  %v3573_v0 = vld [vmem:[#allocation27 + $0x50] sm:$0xff]  ;;  %v3574_v55 = vld [vmem:[#allocation27 + $0x58] sm:$0xff] }
 0x6cd   :  { %v3577_v52 = vld [vmem:[#allocation27 + $0x70] sm:$0xff] }
 0x6ce   :  { %6813 = vmatpush1.bf16.msra.mxu1 %v8154_v58  ;;  %6977 = vmatpush1.bf16.msra.mxu0 %v8156_v14  ;;  %v3431_v58 = vmul.f32 %v8566_v9, %v9620_v41  ;;  %v8583_v14 = vld [vmem:[#allocation24] sm:$0xff]  ;;  %v4063_v41 = vld [vmem:[#allocation27 + $0xfa0] sm:$0xff]  ;;  %v3578_v9 = vld [vmem:[#allocation27 + $0x78] sm:$0xff] }
 0x6cf   :  { %6814 = vmatprep.subr.bf16.mxu1 %v8163_v27  ;;  %6978 = vmatprep.subr.bf16.mxu0 %v8165_v28  ;;  %v3461_v59 = vrot.slane %v8583_v14, %v9580_v40  ;;  %v4055_v27 = vld [vmem:[#allocation27 + $0xf60] sm:$0xff]  ;;  %v4052_v28 = vld [vmem:[#allocation27 + $0xf48] sm:$0xff]  ;;  %v3585_v14 = vld [vmem:[#allocation27 + $0xb0] sm:$0xff] }
 0x6d0   :  { %v8211_v25 = vcombine.high %v4051_v4, %v4055_v27  ;;  %v8210_v26 = vcombine.low %v4051_v4, %v4055_v27  ;;  %v8212_v36 = vcombine.low %v4052_v28, %v4056_v49  ;;  %v7737_v4 = vcombine.high %v3574_v55, %v3578_v9  ;;  %v3586_v27 = vld [vmem:[#allocation27 + $0xb8] sm:$0xff] }
 0x6d1   :  { %v3480_v8 = vmul.f32 %v3461_v59, %v3431_v58  ;;  %v3581_v58 = vld [vmem:[#allocation27 + $0x90] sm:$0xff]  ;;  %v3582_v59 = vld [vmem:[#allocation27 + $0x98] sm:$0xff] }
 0x6d2   :  { %6815 = vmatpush1.bf16.msra.mxu1 %v8162_v22  ;;  %6979 = vmatpush1.bf16.msra.mxu0 %v8164_v10  ;;  %v8213_v22 = vcombine.high %v4052_v28, %v4056_v49  ;;  %v4059_v10 = vld [vmem:[#allocation27 + $0xf80] sm:$0xff]  ;;  %v7734_v28 = vcombine.low %v3573_v0, %v3577_v52  ;;  %v7736_v49 = vcombine.low %v3574_v55, %v3578_v9  ;;  %v3626_v55 = vld [vmem:[#allocation27 + $0x1f8] sm:$0xff] }
 0x6d3   :  { %6816 = vmatprep.subr.bf16.mxu1 %v8171_v30  ;;  %6980 = vmatprep.subr.bf16.mxu0 %v8173_v37  ;;  %v8584_v30 = vld [vmem:[#allocation25] sm:$0xff]  ;;  %v8218_v6 = vcombine.low %v4059_v10, %v4063_v41 }
 0x6d4   :  { %v3510_v37 = vrot.slane %v8584_v30, %v9580_v40  ;;  %v7742_v30 = vcombine.low %v3581_v58, %v3585_v14 }
 0x6d6   :  { %6817 = vmatpush1.bf16.msra.mxu1 %v8170_v38  ;;  %6981 = vmatpush1.bf16.msra.mxu0 %v8172_v51  ;;  %v8219_v38 = vcombine.high %v4059_v10, %v4063_v41  ;;  %v8221_v51 = vcombine.high %v4060_v31, %v4064_v33  ;;  %v3590_v10 = vld [vmem:[#allocation27 + $0xd8] sm:$0xff] }
 0x6d7   :  { %6818 = vmatprep.subr.bf16.mxu1 %v8179_v53  ;;  %6982 = vmatprep.subr.bf16.mxu0 %v8181_v42  ;;  %v4067_v53 = vld [vmem:[#allocation27 + $0xfc0] sm:$0xff]  ;;  %v3529_v42 = vadd.f32 %v3510_v37, %v3480_v8  ;;  %v3594_v8 = vld [vmem:[#allocation27 + $0xf8] sm:$0xff]  ;;  %v7744_v37 = vcombine.low %v3582_v59, %v3586_v27 }
 0x6d9   :  { %v3545_v46 = vmul.f32 0.2, %v3529_v42  ;;  %vm3537_vm3 = vcmp.gt.f32.partialorder %v3529_v42, 0.0 }
 0x6da   :  { %6819 = vmatpush1.bf16.msra.mxu1 %v8178_v11  ;;  %6983 = vmatpush1.bf16.msra.mxu0 %v8180_v24  ;;  %v8220_v11 = vcombine.low %v4060_v31, %v4064_v33  ;;  %v8227_v24 = vcombine.high %v4067_v53, %v4071_v15  ;;  %v7753_v31 = vcombine.high %v3590_v10, %v3594_v8  ;;  %v3597_v33 = vld [vmem:[#allocation27 + $0x110] sm:$0xff] }
 0x6db   :  { %6820 = vmatprep.subr.bf16.mxu1 %v8187_v12  ;;  %6984 = vmatprep.subr.bf16.mxu0 %v8189_v34  ;;  %v8229_v12 = vcombine.high %v4068_v43, %v4072_v18  ;;  %v3565_v34 = vld [vmem:[#allocation27 + $0x10] sm:$0xff]  ;;  %v3553_v61 = vsel %vm3537_vm3, %v3529_v42, %v3545_v46 }
 0x6dc   :  { %v3613_v46 = vld [vmem:[#allocation27 + $0x190] sm:$0xff] }
 0x6de   :  { %6821 = vmatpush1.bf16.msra.mxu1 %v8186_v50  ;;  %6985 = vmatpush1.bf16.msra.mxu0 %v8188_v60  ;;  %v8226_v50 = vcombine.low %v4067_v53, %v4071_v15  ;;  %v8228_v60 = vcombine.low %v4068_v43, %v4072_v18  ;;  %v3605_v15 = vld [vmem:[#allocation27 + $0x150] sm:$0xff]  ;;  %v3606_v18 = vld [vmem:[#allocation27 + $0x158] sm:$0xff] }
 0x6df   :  { %6822 = vmatprep.subr.bf16.mxu1 %v8195_v54  ;;  %6986 = vmatprep.subr.bf16.mxu0 %v8197_v1  ;;  %v7727_v54 = vcombine.high %v3565_v34, %v3569_v44  ;;  %v7729_v1 = vcombine.high %v3566_v47, %v3570_v48  ;;  %v3609_v43 = vld [vmem:[#allocation27 + $0x170] sm:$0xff] }
 0x6e2   :  { %6823 = vmatpush1.bf16.msra.mxu1 %v8194_v13  ;;  %6987 = vmatpush1.bf16.msra.mxu0 %v8196_v16  ;;  %v7726_v13 = vcombine.low %v3565_v34, %v3569_v44  ;;  %v9639_v16 = vpack.c.bf16 %v3553_v61, %v3553_v61  ;;  %v3617_v44 = vld [vmem:[#allocation27 + $0x1b0] sm:$0xff] }
 0x6e3   :  { %6824 = vmatprep.subr.bf16.mxu1 %v8203_v57  ;;  %6988 = vmatprep.subr.bf16.mxu0 %v8205_v32  ;;  %v7728_v57 = vcombine.low %v3566_v47, %v3570_v48  ;;  %v7735_v32 = vcombine.high %v3573_v0, %v3577_v52  ;;  %v3614_v47 = vld [vmem:[#allocation27 + $0x198] sm:$0xff]  ;;  %v3621_v61 = vld [vmem:[#allocation27 + $0x1d0] sm:$0xff]  ;;  %v7774_v9 = vcombine.low %v3613_v46, %v3617_v44 }
 0x6e4   :  { %v3618_v48 = vld [vmem:[#allocation27 + $0x1b8] sm:$0xff]  ;;  %v3625_v0 = vld [vmem:[#allocation27 + $0x1f0] sm:$0xff] }
 0x6e5   :  { %v3622_v52 = vld [vmem:[#allocation27 + $0x1d8] sm:$0xff] }
 0x6e6   :  { %6825 = vmatpush1.bf16.msra.mxu1 %v8202_v62  ;;  %6989 = vmatpush1.bf16.msra.mxu0 %v8204_v5  ;;  %v7743_v62 = vcombine.high %v3581_v58, %v3585_v14  ;;  %v7745_v5 = vcombine.high %v3582_v59, %v3586_v27  ;;  %v3633_v58 = vld [vmem:[#allocation27 + $0x230] sm:$0xff]  ;;  %v3630_v14 = vld [vmem:[#allocation27 + $0x218] sm:$0xff]  ;;  %v7782_v27 = vcombine.low %v3621_v61, %v3625_v0 }
 0x6e7   :  { %6826 = vmatprep.subr.bf16.mxu1 %v8211_v25  ;;  %6990 = vmatprep.subr.bf16.mxu0 %v8213_v22  ;;  %v3589_v25 = vld [vmem:[#allocation27 + $0xd0] sm:$0xff]  ;;  %v3634_v59 = vld [vmem:[#allocation27 + $0x238] sm:$0xff] }
 0x6e8   :  { %v3593_v22 = vld [vmem:[#allocation27 + $0xf0] sm:$0xff] }
 0x6e9   :  { %v7751_v41 = vcombine.high %v3589_v25, %v3593_v22 }
 0x6ea   :  { %6827 = vmatpush1.bf16.msra.mxu1 %v8210_v26  ;;  %6991 = vmatpush1.bf16.msra.mxu0 %v8212_v36  ;;  %v3601_v26 = vld [vmem:[#allocation27 + $0x130] sm:$0xff]  ;;  %v3602_v36 = vld [vmem:[#allocation27 + $0x138] sm:$0xff] }
 0x6eb   :  { %6828 = vmatprep.subr.bf16.mxu1 %v8219_v38  ;;  %6992 = vmatprep.subr.bf16.mxu0 %v8221_v51  ;;  %v7750_v38 = vcombine.low %v3589_v25, %v3593_v22  ;;  %v7752_v51 = vcombine.low %v3590_v10, %v3594_v8  ;;  %v7759_v53 = vcombine.high %v3597_v33, %v3601_v26  ;;  %v3641_v25 = vld [vmem:[#allocation27 + $0x270] sm:$0xff]  ;;  %v3638_v22 = vld [vmem:[#allocation27 + $0x258] sm:$0xff] }
 0x6ec   :  { %v3642_v10 = vld [vmem:[#allocation27 + $0x278] sm:$0xff] }
 0x6ee   :  { %6829 = vmatpush1.bf16.msra.mxu1 %v8218_v6  ;;  %6993 = vmatpush1.bf16.msra.mxu0 %v8220_v11  ;;  %v3610_v6 = vld [vmem:[#allocation27 + $0x178] sm:$0xff]  ;;  %v7758_v11 = vcombine.low %v3597_v33, %v3601_v26  ;;  %v3649_v33 = vld [vmem:[#allocation27 + $0x2b0] sm:$0xff] }
 0x6ef   :  { %6830 = vmatprep.subr.bf16.mxu1 %v8227_v24  ;;  %6994 = vmatprep.subr.bf16.mxu0 %v8229_v12  ;;  %v7767_v12 = vcombine.high %v3605_v15, %v3609_v43  ;;  %v7769_v34 = vcombine.high %v3606_v18, %v3610_v6  ;;  %v3646_v26 = vld [vmem:[#allocation27 + $0x298] sm:$0xff] }
 0x6f2   :  { %6831 = vmatpush1.bf16.msra.mxu1 %v8226_v50  ;;  %6995 = vmatpush1.bf16.msra.mxu0 %v8228_v60  ;;  %v7766_v50 = vcombine.low %v3605_v15, %v3609_v43  ;;  %v7768_v60 = vcombine.low %v3606_v18, %v3610_v6  ;;  %v3657_v15 = vld [vmem:[#allocation27 + $0x2f0] sm:$0xff]  ;;  %v3654_v43 = vld [vmem:[#allocation27 + $0x2d8] sm:$0xff] }
 0x6f3   :  { %7005 = vmatprep.subr.bf16.mxu1 %v7727_v54  ;;  %7169 = vmatprep.subr.bf16.mxu0 %v7729_v1  ;;  %v7775_v54 = vcombine.high %v3613_v46, %v3617_v44  ;;  %v7777_v1 = vcombine.high %v3614_v47, %v3618_v48  ;;  %v3658_v18 = vld [vmem:[#allocation27 + $0x2f8] sm:$0xff]  ;;  %v3665_v46 = vld [vmem:[#allocation27 + $0x330] sm:$0xff] }
 0x6f4   :  { %v3662_v44 = vld [vmem:[#allocation27 + $0x318] sm:$0xff] }
 0x6f5   :  { %6833 = vmatmul.mubr.bf16.vlgmr.msra.gmra.mrb[16].mxu1 %v9639_v16  ;;  %6997 = vmatmul.mubr.bf16.vlgmr.msra.gmra.mrb[20].mxu0 %v9639_v16 }
 0x6f6   :  { %7006 = vmatpush1.bf16.msra.mxu1 %v7726_v13  ;;  %7037 = vmatprep.mubr.bf16.mxu1 %v9523_v35  ;;  %v7776_v13 = vcombine.low %v3614_v47, %v3618_v48  ;;  %v3666_v47 = vld [vmem:[#allocation27 + $0x338] sm:$0xff] }
 0x6f7   :  { %7170 = vmatpush1.bf16.msra.mxu0 %v7728_v57  ;;  %7201 = vmatprep.mubr.bf16.mxu0 %v9523_v35  ;;  %v3598_v35 = vld [vmem:[#allocation27 + $0x118] sm:$0xff]  ;;  %v7783_v57 = vcombine.high %v3621_v61, %v3625_v0  ;;  %v3673_v61 = vld [vmem:[#allocation27 + $0x370] sm:$0xff] }
 0x6f8   :  { %7007 = vmatprep.subr.bf16.mxu1 %v7735_v32  ;;  %7171 = vmatprep.subr.bf16.mxu0 %v7737_v4  ;;  %v7761_v42 = vcombine.high %v3598_v35, %v3602_v36  ;;  %v7760_v24 = vcombine.low %v3598_v35, %v3602_v36  ;;  %v7785_v32 = vcombine.high %v3622_v52, %v3626_v55  ;;  %v3629_v4 = vld [vmem:[#allocation27 + $0x210] sm:$0xff]  ;;  %v3650_v35 = vld [vmem:[#allocation27 + $0x2b8] sm:$0xff] }
 0x6f9   :  { %v7790_v8 = vcombine.low %v3629_v4, %v3633_v58  ;;  %v3670_v0 = vld [vmem:[#allocation27 + $0x358] sm:$0xff] }
 0x6fa   :  { %7008 = vmatpush1.bf16.msra.mxu1 %v7734_v28  ;;  %v7784_v28 = vcombine.low %v3622_v52, %v3626_v55  ;;  %v3674_v52 = vld [vmem:[#allocation27 + $0x378] sm:$0xff] }
 0x6fb   :  { %7172 = vmatpush1.bf16.msra.mxu0 %v7736_v49  ;;  %7009 = vmatprep.subr.bf16.mxu1 %v7743_v62  ;;  %v7791_v49 = vcombine.high %v3629_v4, %v3633_v58  ;;  %v7793_v62 = vcombine.high %v3630_v14, %v3634_v59  ;;  %v3681_v4 = vld [vmem:[#allocation27 + $0x3b0] sm:$0xff]  ;;  %v3678_v58 = vld [vmem:[#allocation27 + $0x398] sm:$0xff] }
 0x6fc   :  { %7173 = vmatprep.subr.bf16.mxu0 %v7745_v5  ;;  %v3637_v5 = vld [vmem:[#allocation27 + $0x250] sm:$0xff] }
 0x6fd   :  { %v7798_v36 = vcombine.low %v3637_v5, %v3641_v25 }
 0x6fe   :  { %7010 = vmatpush1.bf16.msra.mxu1 %v7742_v30  ;;  %v7792_v30 = vcombine.low %v3630_v14, %v3634_v59  ;;  %v3682_v14 = vld [vmem:[#allocation27 + $0x3b8] sm:$0xff] }
 0x6ff   :  { %7174 = vmatpush1.bf16.msra.mxu0 %v7744_v37  ;;  %7011 = vmatprep.subr.bf16.mxu1 %v7751_v41  ;;  %v7799_v37 = vcombine.high %v3637_v5, %v3641_v25  ;;  %v7801_v41 = vcombine.high %v3638_v22, %v3642_v10  ;;  %v3689_v5 = vld [vmem:[#allocation27 + $0x3f0] sm:$0xff]  ;;  %v3686_v25 = vld [vmem:[#allocation27 + $0x3d8] sm:$0xff] }
 0x700   :  { %7175 = vmatprep.subr.bf16.mxu0 %v7753_v31  ;;  %v3645_v31 = vld [vmem:[#allocation27 + $0x290] sm:$0xff] }
 0x701   :  { %v7806_v6 = vcombine.low %v3645_v31, %v3649_v33 }
 0x702   :  { %7012 = vmatpush1.bf16.msra.mxu1 %v7750_v38  ;;  %v7800_v38 = vcombine.low %v3638_v22, %v3642_v10  ;;  %v3690_v22 = vld [vmem:[#allocation27 + $0x3f8] sm:$0xff] }
 0x703   :  { %7176 = vmatpush1.bf16.msra.mxu0 %v7752_v51  ;;  %7013 = vmatprep.subr.bf16.mxu1 %v7759_v53  ;;  %v7807_v51 = vcombine.high %v3645_v31, %v3649_v33  ;;  %v7809_v53 = vcombine.high %v3646_v26, %v3650_v35  ;;  %v3697_v31 = vld [vmem:[#allocation27 + $0x430] sm:$0xff]  ;;  %v3694_v33 = vld [vmem:[#allocation27 + $0x418] sm:$0xff] }
 0x704   :  { %7177 = vmatprep.subr.bf16.mxu0 %v7761_v42  ;;  %v3653_v42 = vld [vmem:[#allocation27 + $0x2d0] sm:$0xff] }
 0x705   :  { %v7814_v48 = vcombine.low %v3653_v42, %v3657_v15 }
 0x706   :  { %7014 = vmatpush1.bf16.msra.mxu1 %v7758_v11  ;;  %v7808_v11 = vcombine.low %v3646_v26, %v3650_v35  ;;  %v3698_v26 = vld [vmem:[#allocation27 + $0x438] sm:$0xff] }
 0x707   :  { %7178 = vmatpush1.bf16.msra.mxu0 %v7760_v24  ;;  %7015 = vmatprep.subr.bf16.mxu1 %v7767_v12  ;;  %v7815_v24 = vcombine.high %v3653_v42, %v3657_v15  ;;  %v7817_v12 = vcombine.high %v3654_v43, %v3658_v18  ;;  %v3705_v42 = vld [vmem:[#allocation27 + $0x470] sm:$0xff] }
 0x708   :  { %7179 = vmatprep.subr.bf16.mxu0 %v7769_v34  ;;  %v3661_v34 = vld [vmem:[#allocation27 + $0x310] sm:$0xff] }
 0x709   :  { %v7822_v55 = vcombine.low %v3661_v34, %v3665_v46 }
 0x70a   :  { %7016 = vmatpush1.bf16.msra.mxu1 %v7766_v50  ;;  %v7816_v50 = vcombine.low %v3654_v43, %v3658_v18  ;;  %v3702_v43 = vld [vmem:[#allocation27 + $0x458] sm:$0xff] }
 0x70b   :  { %7180 = vmatpush1.bf16.msra.mxu0 %v7768_v60  ;;  %7017 = vmatprep.subr.bf16.mxu1 %v7775_v54  ;;  %v7823_v60 = vcombine.high %v3661_v34, %v3665_v46  ;;  %v7825_v54 = vcombine.high %v3662_v44, %v3666_v47  ;;  %v3706_v18 = vld [vmem:[#allocation27 + $0x478] sm:$0xff] }
 0x70c   :  { %7181 = vmatprep.subr.bf16.mxu0 %v7777_v1  ;;  %v3669_v1 = vld [vmem:[#allocation27 + $0x350] sm:$0xff]  ;;  %v7865_v34 = vcombine.high %v3702_v43, %v3706_v18  ;;  %v3710_v46 = vld [vmem:[#allocation27 + $0x498] sm:$0xff] }
 0x70d   :  { %v7830_v59 = vcombine.low %v3669_v1, %v3673_v61 }
 0x70e   :  { %7018 = vmatpush1.bf16.msra.mxu1 %v7774_v9  ;;  %v7824_v9 = vcombine.low %v3662_v44, %v3666_v47  ;;  %v3714_v44 = vld [vmem:[#allocation27 + $0x4b8] sm:$0xff] }
 0x70f   :  { %7182 = vmatpush1.bf16.msra.mxu0 %v7776_v13  ;;  %7019 = vmatprep.subr.bf16.mxu1 %v7783_v57  ;;  %v7831_v13 = vcombine.high %v3669_v1, %v3673_v61  ;;  %v7833_v57 = vcombine.high %v3670_v0, %v3674_v52  ;;  %v3721_v1 = vld [vmem:[#allocation27 + $0x4f0] sm:$0xff]  ;;  %v3718_v61 = vld [vmem:[#allocation27 + $0x4d8] sm:$0xff] }
 0x710   :  { %7183 = vmatprep.subr.bf16.mxu0 %v7785_v32  ;;  %v3677_v32 = vld [vmem:[#allocation27 + $0x390] sm:$0xff] }
 0x711   :  { %v7838_v10 = vcombine.low %v3677_v32, %v3681_v4 }
 0x712   :  { %7020 = vmatpush1.bf16.msra.mxu1 %v7782_v27  ;;  %v7832_v27 = vcombine.low %v3670_v0, %v3674_v52  ;;  %v3722_v0 = vld [vmem:[#allocation27 + $0x4f8] sm:$0xff] }
 0x713   :  { %7184 = vmatpush1.bf16.msra.mxu0 %v7784_v28  ;;  %7021 = vmatprep.subr.bf16.mxu1 %v7791_v49  ;;  %v7839_v28 = vcombine.high %v3677_v32, %v3681_v4  ;;  %v7841_v49 = vcombine.high %v3678_v58, %v3682_v14  ;;  %v3726_v32 = vld [vmem:[#allocation27 + $0x518] sm:$0xff] }
 0x714   :  { %7185 = vmatprep.subr.bf16.mxu0 %v7793_v62  ;;  %v3685_v62 = vld [vmem:[#allocation27 + $0x3d0] sm:$0xff]  ;;  %v3730_v4 = vld [vmem:[#allocation27 + $0x538] sm:$0xff] }
 0x715   :  { %v7846_v35 = vcombine.low %v3685_v62, %v3689_v5 }
 0x716   :  { %7022 = vmatpush1.bf16.msra.mxu1 %v7790_v8  ;;  %v7840_v8 = vcombine.low %v3678_v58, %v3682_v14  ;;  %v7880_v58 = vcombine.low %v3718_v61, %v3722_v0 }
 0x717   :  { %7186 = vmatpush1.bf16.msra.mxu0 %v7792_v30  ;;  %7023 = vmatprep.subr.bf16.mxu1 %v7799_v37  ;;  %v7847_v30 = vcombine.high %v3685_v62, %v3689_v5  ;;  %v7849_v37 = vcombine.high %v3686_v25, %v3690_v22  ;;  %v3738_v62 = vld [vmem:[#allocation27 + $0x578] sm:$0xff] }
 0x718   :  { %7187 = vmatprep.subr.bf16.mxu0 %v7801_v41  ;;  %v3693_v41 = vld [vmem:[#allocation27 + $0x410] sm:$0xff] }
 0x719   :  { %v7854_v15 = vcombine.low %v3693_v41, %v3697_v31 }
 0x71a   :  { %7024 = vmatpush1.bf16.msra.mxu1 %v7798_v36  ;;  %v7848_v36 = vcombine.low %v3686_v25, %v3690_v22  ;;  %v7888_v25 = vcombine.low %v3726_v32, %v3730_v4 }
 0x71b   :  { %7188 = vmatpush1.bf16.msra.mxu0 %v7800_v38  ;;  %7025 = vmatprep.subr.bf16.mxu1 %v7807_v51  ;;  %v7855_v38 = vcombine.high %v3693_v41, %v3697_v31  ;;  %v7857_v51 = vcombine.high %v3694_v33, %v3698_v26  ;;  %v3746_v41 = vld [vmem:[#allocation27 + $0x5b8] sm:$0xff] }
 0x71c   :  { %7189 = vmatprep.subr.bf16.mxu0 %v7809_v53  ;;  %v3701_v53 = vld [vmem:[#allocation27 + $0x450] sm:$0xff] }
 0x71d   :  { %v7862_v47 = vcombine.low %v3701_v53, %v3705_v42 }
 0x71e   :  { %7026 = vmatpush1.bf16.msra.mxu1 %v7806_v6  ;;  %v7856_v6 = vcombine.low %v3694_v33, %v3698_v26 }
 0x71f   :  { %7190 = vmatpush1.bf16.msra.mxu0 %v7808_v11  ;;  %7027 = vmatprep.subr.bf16.mxu1 %v7815_v24  ;;  %v7863_v11 = vcombine.high %v3701_v53, %v3705_v42  ;;  %v3709_v24 = vld [vmem:[#allocation27 + $0x490] sm:$0xff]  ;;  %v3754_v53 = vld [vmem:[#allocation27 + $0x5f8] sm:$0xff] }
 0x720   :  { %7191 = vmatprep.subr.bf16.mxu0 %v7817_v12  ;;  %v3713_v12 = vld [vmem:[#allocation27 + $0x4b0] sm:$0xff] }
 0x721   :  { %v7870_v52 = vcombine.low %v3709_v24, %v3713_v12 }
 0x722   :  { %7028 = vmatpush1.bf16.msra.mxu1 %v7814_v48  ;;  %v7864_v48 = vcombine.low %v3702_v43, %v3706_v18 }
 0x723   :  { %7192 = vmatpush1.bf16.msra.mxu0 %v7816_v50  ;;  %7029 = vmatprep.subr.bf16.mxu1 %v7823_v60  ;;  %v7871_v50 = vcombine.high %v3709_v24, %v3713_v12  ;;  %v7873_v60 = vcombine.high %v3710_v46, %v3714_v44  ;;  %v3758_v24 = vld [vmem:[#allocation27 + $0x618] sm:$0xff] }
 0x724   :  { %7193 = vmatprep.subr.bf16.mxu0 %v7825_v54  ;;  %v3717_v54 = vld [vmem:[#allocation27 + $0x4d0] sm:$0xff]  ;;  %v3762_v12 = vld [vmem:[#allocation27 + $0x638] sm:$0xff] }
 0x726   :  { %7030 = vmatpush1.bf16.msra.mxu1 %v7822_v55  ;;  %v7879_v55 = vcombine.high %v3717_v54, %v3721_v1 }
 0x727   :  { %7194 = vmatpush1.bf16.msra.mxu0 %v7824_v9  ;;  %7031 = vmatprep.subr.bf16.mxu1 %v7831_v13  ;;  %v7881_v9 = vcombine.high %v3718_v61, %v3722_v0  ;;  %v3725_v13 = vld [vmem:[#allocation27 + $0x510] sm:$0xff]  ;;  %v7920_v61 = vcombine.low %v3758_v24, %v3762_v12 }
 0x728   :  { %7195 = vmatprep.subr.bf16.mxu0 %v7833_v57  ;;  %v3729_v57 = vld [vmem:[#allocation27 + $0x530] sm:$0xff] }
 0x729   :  { %v7887_v14 = vcombine.high %v3725_v13, %v3729_v57  ;;  %v7886_v5 = vcombine.low %v3725_v13, %v3729_v57  ;;  %v3778_v13 = vld [vmem:[#allocation27 + $0x6b8] sm:$0xff] }
 0x72a   :  { %7032 = vmatpush1.bf16.msra.mxu1 %v7830_v59  ;;  %v7889_v59 = vcombine.high %v3726_v32, %v3730_v4 }
 0x72b   :  { %7196 = vmatpush1.bf16.msra.mxu0 %v7832_v27  ;;  %7033 = vmatprep.subr.bf16.mxu1 %v7839_v28  ;;  %v3733_v27 = vld [vmem:[#allocation27 + $0x550] sm:$0xff] }
 0x72c   :  { %7197 = vmatprep.subr.bf16.mxu0 %v7841_v49  ;;  %v3737_v28 = vld [vmem:[#allocation27 + $0x570] sm:$0xff]  ;;  %v3734_v49 = vld [vmem:[#allocation27 + $0x558] sm:$0xff] }
 0x72d   :  { %v7895_v22 = vcombine.high %v3733_v27, %v3737_v28  ;;  %v7894_v31 = vcombine.low %v3733_v27, %v3737_v28  ;;  %v7896_v33 = vcombine.low %v3734_v49, %v3738_v62  ;;  %v3786_v27 = vld [vmem:[#allocation27 + $0x6f8] sm:$0xff] }
 0x72e   :  { %7034 = vmatpush1.bf16.msra.mxu1 %v7838_v10  ;;  %v7897_v10 = vcombine.high %v3734_v49, %v3738_v62 }
 0x72f   :  { %7198 = vmatpush1.bf16.msra.mxu0 %v7840_v8  ;;  %7035 = vmatprep.subr.bf16.mxu1 %v7847_v30  ;;  %v3741_v8 = vld [vmem:[#allocation27 + $0x590] sm:$0xff] }
 0x730   :  { %7199 = vmatprep.subr.bf16.mxu0 %v7849_v37  ;;  %v3745_v30 = vld [vmem:[#allocation27 + $0x5b0] sm:$0xff]  ;;  %v3742_v37 = vld [vmem:[#allocation27 + $0x598] sm:$0xff] }
 0x731   :  { %v7903_v26 = vcombine.high %v3741_v8, %v3745_v30  ;;  %v7902_v42 = vcombine.low %v3741_v8, %v3745_v30  ;;  %v3794_v8 = vld [vmem:[#allocation27 + $0x738] sm:$0xff] }
 0x732   :  { %7036 = vmatpush1.bf16.msra.mxu1 %v7846_v35  ;;  %v7905_v35 = vcombine.high %v3742_v37, %v3746_v41 }
 0x733   :  { %7200 = vmatpush1.bf16.msra.mxu0 %v7848_v36  ;;  %7046 = vmatprep.subr.bf16.mxu1 %v7855_v38  ;;  %v3749_v36 = vld [vmem:[#allocation27 + $0x5d0] sm:$0xff] }
 0x734   :  { %7210 = vmatprep.subr.bf16.mxu0 %v7857_v51  ;;  %v3753_v38 = vld [vmem:[#allocation27 + $0x5f0] sm:$0xff]  ;;  %v3750_v51 = vld [vmem:[#allocation27 + $0x5d8] sm:$0xff] }
 0x735   :  { %7038 = vmatmul.mubr.bf16.vlgmr.msra.gmra.mrb[20].mxu1 %v9525_v39  ;;  %v7911_v43 = vcombine.high %v3749_v36, %v3753_v38  ;;  %v7913_v18 = vcombine.high %v3750_v51, %v3754_v53 }
 0x736   :  { %7202 = vmatmul.mubr.bf16.vlgmr.msra.gmra.mrb[24].mxu0 %v9525_v39  ;;  %7047 = vmatpush1.bf16.msra.mxu1 %v7854_v15  ;;  %v7872_v39 = vcombine.low %v3710_v46, %v3714_v44  ;;  %v7904_v15 = vcombine.low %v3742_v37, %v3746_v41  ;;  %v7912_v46 = vcombine.low %v3750_v51, %v3754_v53 }
 0x737   :  { %7078 = vmatprep.mubr.bf16.mxu1 %v9531_v45  ;;  %7211 = vmatpush1.bf16.msra.mxu0 %v7856_v6  ;;  %v3757_v6 = vld [vmem:[#allocation27 + $0x610] sm:$0xff] }
 0x738   :  { %7242 = vmatprep.mubr.bf16.mxu0 %v9531_v45  ;;  %7048 = vmatprep.subr.bf16.mxu1 %v7863_v11  ;;  %v7878_v45 = vcombine.low %v3717_v54, %v3721_v1  ;;  %v3761_v11 = vld [vmem:[#allocation27 + $0x630] sm:$0xff]  ;;  %v3770_v54 = vld [vmem:[#allocation27 + $0x678] sm:$0xff] }
 0x739   :  { %7212 = vmatprep.subr.bf16.mxu0 %v7865_v34  ;;  %v7910_v34 = vcombine.low %v3749_v36, %v3753_v38  ;;  %v7919_v44 = vcombine.high %v3757_v6, %v3761_v11  ;;  %v7918_v1 = vcombine.low %v3757_v6, %v3761_v11  ;;  %v3802_v36 = vld [vmem:[#allocation27 + $0x778] sm:$0xff] }
 0x73a   :  { %7049 = vmatpush1.bf16.msra.mxu1 %v7862_v47  ;;  %v7921_v47 = vcombine.high %v3758_v24, %v3762_v12  ;;  %v3810_v6 = vld [vmem:[#allocation27 + $0x7b8] sm:$0xff] }
 0x73b   :  { %7213 = vmatpush1.bf16.msra.mxu0 %v7864_v48  ;;  %7050 = vmatprep.subr.bf16.mxu1 %v7871_v50  ;;  %v3765_v48 = vld [vmem:[#allocation27 + $0x650] sm:$0xff] }
 0x73c   :  { %7214 = vmatprep.subr.bf16.mxu0 %v7873_v60  ;;  %v3769_v50 = vld [vmem:[#allocation27 + $0x670] sm:$0xff]  ;;  %v3766_v60 = vld [vmem:[#allocation27 + $0x658] sm:$0xff] }
 0x73d   :  { %v7927_v0 = vcombine.high %v3765_v48, %v3769_v50  ;;  %v7926_v57 = vcombine.low %v3765_v48, %v3769_v50  ;;  %v7928_v32 = vcombine.low %v3766_v60, %v3770_v54  ;;  %v3818_v48 = vld [vmem:[#allocation27 + $0x7f8] sm:$0xff] }
 0x73e   :  { %7051 = vmatpush1.bf16.msra.mxu1 %v7870_v52  ;;  %v7929_v52 = vcombine.high %v3766_v60, %v3770_v54 }
 0x73f   :  { %7215 = vmatpush1.bf16.msra.mxu0 %v7872_v39  ;;  %7052 = vmatprep.subr.bf16.mxu1 %v7879_v55  ;;  %v3773_v39 = vld [vmem:[#allocation27 + $0x690] sm:$0xff] }
 0x740   :  { %7216 = vmatprep.subr.bf16.mxu0 %v7881_v9  ;;  %v3777_v55 = vld [vmem:[#allocation27 + $0x6b0] sm:$0xff]  ;;  %v3774_v9 = vld [vmem:[#allocation27 + $0x698] sm:$0xff] }
 0x741   :  { %v7935_v4 = vcombine.high %v3773_v39, %v3777_v55  ;;  %v7934_v28 = vcombine.low %v3773_v39, %v3777_v55  ;;  %v7936_v49 = vcombine.low %v3774_v9, %v3778_v13  ;;  %v3826_v39 = vld [vmem:[#allocation27 + $0x838] sm:$0xff] }
 0x742   :  { %7053 = vmatpush1.bf16.msra.mxu1 %v7878_v45  ;;  %v7937_v45 = vcombine.high %v3774_v9, %v3778_v13 }
 0x743   :  { %7217 = vmatpush1.bf16.msra.mxu0 %v7880_v58  ;;  %7054 = vmatprep.subr.bf16.mxu1 %v7887_v14  ;;  %v3781_v58 = vld [vmem:[#allocation27 + $0x6d0] sm:$0xff] }
 0x744   :  { %7218 = vmatprep.subr.bf16.mxu0 %v7889_v59  ;;  %v3785_v14 = vld [vmem:[#allocation27 + $0x6f0] sm:$0xff]  ;;  %v3782_v59 = vld [vmem:[#allocation27 + $0x6d8] sm:$0xff] }
 0x745   :  { %v7943_v62 = vcombine.high %v3781_v58, %v3785_v14  ;;  %v7942_v30 = vcombine.low %v3781_v58, %v3785_v14  ;;  %v7944_v37 = vcombine.low %v3782_v59, %v3786_v27  ;;  %v3830_v58 = vld [vmem:[#allocation27 + $0x858] sm:$0xff] }
 0x746   :  { %7055 = vmatpush1.bf16.msra.mxu1 %v7886_v5  ;;  %v7945_v5 = vcombine.high %v3782_v59, %v3786_v27  ;;  %v3834_v14 = vld [vmem:[#allocation27 + $0x878] sm:$0xff] }
 0x747   :  { %7219 = vmatpush1.bf16.msra.mxu0 %v7888_v25  ;;  %7056 = vmatprep.subr.bf16.mxu1 %v7895_v22  ;;  %v3789_v25 = vld [vmem:[#allocation27 + $0x710] sm:$0xff] }
 0x748   :  { %7220 = vmatprep.subr.bf16.mxu0 %v7897_v10  ;;  %v3793_v22 = vld [vmem:[#allocation27 + $0x730] sm:$0xff]  ;;  %v3790_v10 = vld [vmem:[#allocation27 + $0x718] sm:$0xff] }
 0x749   :  { %v7951_v41 = vcombine.high %v3789_v25, %v3793_v22  ;;  %v7950_v38 = vcombine.low %v3789_v25, %v3793_v22  ;;  %v7952_v51 = vcombine.low %v3790_v10, %v3794_v8  ;;  %v3842_v25 = vld [vmem:[#allocation27 + $0x8b8] sm:$0xff] }
 0x74a   :  { %7057 = vmatpush1.bf16.msra.mxu1 %v7894_v31  ;;  %v7953_v31 = vcombine.high %v3790_v10, %v3794_v8  ;;  %v7992_v10 = vcombine.low %v3830_v58, %v3834_v14 }
 0x74b   :  { %7221 = vmatpush1.bf16.msra.mxu0 %v7896_v33  ;;  %7058 = vmatprep.subr.bf16.mxu1 %v7903_v26  ;;  %v3797_v33 = vld [vmem:[#allocation27 + $0x750] sm:$0xff] }
 0x74c   :  { %7222 = vmatprep.subr.bf16.mxu0 %v7905_v35  ;;  %v3801_v26 = vld [vmem:[#allocation27 + $0x770] sm:$0xff]  ;;  %v3798_v35 = vld [vmem:[#allocation27 + $0x758] sm:$0xff] }
 0x74d   :  { %v7959_v53 = vcombine.high %v3797_v33, %v3801_v26  ;;  %v7958_v11 = vcombine.low %v3797_v33, %v3801_v26  ;;  %v7960_v24 = vcombine.low %v3798_v35, %v3802_v36  ;;  %v3850_v33 = vld [vmem:[#allocation27 + $0x8f8] sm:$0xff] }
 0x74e   :  { %7059 = vmatpush1.bf16.msra.mxu1 %v7902_v42  ;;  %v7961_v42 = vcombine.high %v3798_v35, %v3802_v36 }
 0x74f   :  { %7223 = vmatpush1.bf16.msra.mxu0 %v7904_v15  ;;  %7060 = vmatprep.subr.bf16.mxu1 %v7911_v43  ;;  %v3805_v15 = vld [vmem:[#allocation27 + $0x790] sm:$0xff] }
 0x750   :  { %7224 = vmatprep.subr.bf16.mxu0 %v7913_v18  ;;  %v3809_v43 = vld [vmem:[#allocation27 + $0x7b0] sm:$0xff]  ;;  %v3806_v18 = vld [vmem:[#allocation27 + $0x798] sm:$0xff] }
 0x751   :  { %v7967_v12 = vcombine.high %v3805_v15, %v3809_v43  ;;  %v7966_v50 = vcombine.low %v3805_v15, %v3809_v43  ;;  %v7968_v60 = vcombine.low %v3806_v18, %v3810_v6 }
 0x752   :  { %7061 = vmatpush1.bf16.msra.mxu1 %v7910_v34  ;;  %v7969_v34 = vcombine.high %v3806_v18, %v3810_v6  ;;  %v3861_v6 = vld [vmem:[#allocation27 + $0x950] sm:$0xff] }
 0x753   :  { %7225 = vmatpush1.bf16.msra.mxu0 %v7912_v46  ;;  %7062 = vmatprep.subr.bf16.mxu1 %v7919_v44  ;;  %v3813_v46 = vld [vmem:[#allocation27 + $0x7d0] sm:$0xff] }
 0x754   :  { %7226 = vmatprep.subr.bf16.mxu0 %v7921_v47  ;;  %v3817_v44 = vld [vmem:[#allocation27 + $0x7f0] sm:$0xff]  ;;  %v3814_v47 = vld [vmem:[#allocation27 + $0x7d8] sm:$0xff] }
 0x755   :  { %v7975_v54 = vcombine.high %v3813_v46, %v3817_v44  ;;  %v7974_v55 = vcombine.low %v3813_v46, %v3817_v44  ;;  %v7976_v9 = vcombine.low %v3814_v47, %v3818_v48 }
 0x756   :  { %7063 = vmatpush1.bf16.msra.mxu1 %v7918_v1  ;;  %v7977_v1 = vcombine.high %v3814_v47, %v3818_v48  ;;  %v3869_v48 = vld [vmem:[#allocation27 + $0x990] sm:$0xff] }
 0x757   :  { %7227 = vmatpush1.bf16.msra.mxu0 %v7920_v61  ;;  %7064 = vmatprep.subr.bf16.mxu1 %v7927_v0  ;;  %v3821_v61 = vld [vmem:[#allocation27 + $0x810] sm:$0xff] }
 0x758   :  { %7228 = vmatprep.subr.bf16.mxu0 %v7929_v52  ;;  %v3825_v0 = vld [vmem:[#allocation27 + $0x830] sm:$0xff]  ;;  %v3822_v52 = vld [vmem:[#allocation27 + $0x818] sm:$0xff] }
 0x759   :  { %v7983_v13 = vcombine.high %v3821_v61, %v3825_v0  ;;  %v7984_v59 = vcombine.low %v3822_v52, %v3826_v39 }
 0x75a   :  { %7065 = vmatpush1.bf16.msra.mxu1 %v7926_v57  ;;  %v7985_v57 = vcombine.high %v3822_v52, %v3826_v39  ;;  %v3877_v39 = vld [vmem:[#allocation27 + $0x9d0] sm:$0xff] }
 0x75b   :  { %7229 = vmatpush1.bf16.msra.mxu0 %v7928_v32  ;;  %7066 = vmatprep.subr.bf16.mxu1 %v7935_v4  ;;  %v3829_v32 = vld [vmem:[#allocation27 + $0x850] sm:$0xff] }
 0x75c   :  { %7230 = vmatprep.subr.bf16.mxu0 %v7937_v45  ;;  %v3833_v4 = vld [vmem:[#allocation27 + $0x870] sm:$0xff]  ;;  %v7982_v45 = vcombine.low %v3821_v61, %v3825_v0 }
 0x75d   :  { %v7991_v27 = vcombine.high %v3829_v32, %v3833_v4  ;;  %v7990_v22 = vcombine.low %v3829_v32, %v3833_v4 }
 0x75e   :  { %7067 = vmatpush1.bf16.msra.mxu1 %v7934_v28  ;;  %v3837_v28 = vld [vmem:[#allocation27 + $0x890] sm:$0xff] }
 0x75f   :  { %7231 = vmatpush1.bf16.msra.mxu0 %v7936_v49  ;;  %7068 = vmatprep.subr.bf16.mxu1 %v7943_v62  ;;  %v3841_v49 = vld [vmem:[#allocation27 + $0x8b0] sm:$0xff]  ;;  %v7993_v62 = vcombine.high %v3830_v58, %v3834_v14 }
 0x760   :  { %7232 = vmatprep.subr.bf16.mxu0 %v7945_v5  ;;  %v3838_v5 = vld [vmem:[#allocation27 + $0x898] sm:$0xff]  ;;  %v7999_v8 = vcombine.high %v3837_v28, %v3841_v49  ;;  %v7998_v26 = vcombine.low %v3837_v28, %v3841_v49  ;;  %v3885_v58 = vld [vmem:[#allocation27 + $0xa10] sm:$0xff] }
 0x761   :  { %v3889_v14 = vld [vmem:[#allocation27 + $0xa30] sm:$0xff] }
 0x762   :  { %7069 = vmatpush1.bf16.msra.mxu1 %v7942_v30  ;;  %v8001_v30 = vcombine.high %v3838_v5, %v3842_v25 }
 0x763   :  { %7233 = vmatpush1.bf16.msra.mxu0 %v7944_v37  ;;  %7070 = vmatprep.subr.bf16.mxu1 %v7951_v41  ;;  %v3845_v37 = vld [vmem:[#allocation27 + $0x8d0] sm:$0xff] }
 0x764   :  { %7234 = vmatprep.subr.bf16.mxu0 %v7953_v31  ;;  %v3849_v41 = vld [vmem:[#allocation27 + $0x8f0] sm:$0xff]  ;;  %v3846_v31 = vld [vmem:[#allocation27 + $0x8d8] sm:$0xff] }
 0x765   :  { %v8007_v35 = vcombine.high %v3845_v37, %v3849_v41  ;;  %v8009_v36 = vcombine.high %v3846_v31, %v3850_v33  ;;  %v8008_v15 = vcombine.low %v3846_v31, %v3850_v33  ;;  %v3901_v33 = vld [vmem:[#allocation27 + $0xa90] sm:$0xff] }
 0x766   :  { %7071 = vmatpush1.bf16.msra.mxu1 %v7950_v38  ;;  %v3853_v38 = vld [vmem:[#allocation27 + $0x910] sm:$0xff] }
 0x767   :  { %7235 = vmatpush1.bf16.msra.mxu0 %v7952_v51  ;;  %7072 = vmatprep.subr.bf16.mxu1 %v7959_v53  ;;  %v3857_v51 = vld [vmem:[#allocation27 + $0x930] sm:$0xff]  ;;  %v3854_v53 = vld [vmem:[#allocation27 + $0x918] sm:$0xff] }
 0x768   :  { %7236 = vmatprep.subr.bf16.mxu0 %v7961_v42  ;;  %v3858_v42 = vld [vmem:[#allocation27 + $0x938] sm:$0xff]  ;;  %v8015_v43 = vcombine.high %v3853_v38, %v3857_v51 }
 0x769   :  { %v8017_v18 = vcombine.high %v3854_v53, %v3858_v42  ;;  %v8016_v46 = vcombine.low %v3854_v53, %v3858_v42  ;;  %v3909_v42 = vld [vmem:[#allocation27 + $0xad0] sm:$0xff] }
 0x76a   :  { %7073 = vmatpush1.bf16.msra.mxu1 %v7958_v11  ;;  %v3865_v11 = vld [vmem:[#allocation27 + $0x970] sm:$0xff] }
 0x76b   :  { %7237 = vmatpush1.bf16.msra.mxu0 %v7960_v24  ;;  %7074 = vmatprep.subr.bf16.mxu1 %v7967_v12  ;;  %v3862_v24 = vld [vmem:[#allocation27 + $0x958] sm:$0xff]  ;;  %v8023_v44 = vcombine.high %v3861_v6, %v3865_v11 }
 0x76c   :  { %7238 = vmatprep.subr.bf16.mxu0 %v7969_v34  ;;  %v3866_v12 = vld [vmem:[#allocation27 + $0x978] sm:$0xff]  ;;  %v8014_v34 = vcombine.low %v3853_v38, %v3857_v51 }
 0x76d   :  { %v8025_v47 = vcombine.high %v3862_v24, %v3866_v12  ;;  %v8024_v61 = vcombine.low %v3862_v24, %v3866_v12  ;;  %v3917_v12 = vld [vmem:[#allocation27 + $0xb10] sm:$0xff] }
 0x76e   :  { %7075 = vmatpush1.bf16.msra.mxu1 %v7966_v50  ;;  %v3873_v50 = vld [vmem:[#allocation27 + $0x9b0] sm:$0xff] }
 0x76f   :  { %7239 = vmatpush1.bf16.msra.mxu0 %v7968_v60  ;;  %7076 = vmatprep.subr.bf16.mxu1 %v7975_v54  ;;  %v3870_v60 = vld [vmem:[#allocation27 + $0x998] sm:$0xff]  ;;  %v8031_v0 = vcombine.high %v3869_v48, %v3873_v50 }
 0x770   :  { %7240 = vmatprep.subr.bf16.mxu0 %v7977_v1  ;;  %v3874_v54 = vld [vmem:[#allocation27 + $0x9b8] sm:$0xff]  ;;  %v8022_v1 = vcombine.low %v3861_v6, %v3865_v11 }
 0x771   :  { %v8033_v52 = vcombine.high %v3870_v60, %v3874_v54  ;;  %v8032_v32 = vcombine.low %v3870_v60, %v3874_v54  ;;  %v3925_v54 = vld [vmem:[#allocation27 + $0xb50] sm:$0xff] }
 0x772   :  { %7077 = vmatpush1.bf16.msra.mxu1 %v7974_v55  ;;  %v3881_v55 = vld [vmem:[#allocation27 + $0x9f0] sm:$0xff] }
 0x773   :  { %7241 = vmatpush1.bf16.msra.mxu0 %v7976_v9  ;;  %7087 = vmatprep.subr.bf16.mxu1 %v7983_v13  ;;  %v3878_v9 = vld [vmem:[#allocation27 + $0x9d8] sm:$0xff]  ;;  %v8039_v4 = vcombine.high %v3877_v39, %v3881_v55  ;;  %v8038_v28 = vcombine.low %v3877_v39, %v3881_v55 }
 0x774   :  { %7251 = vmatprep.subr.bf16.mxu0 %v7985_v57  ;;  %v3882_v13 = vld [vmem:[#allocation27 + $0x9f8] sm:$0xff]  ;;  %v8030_v57 = vcombine.low %v3869_v48, %v3873_v50 }
 0x775   :  { %7079 = vmatmul.mubr.bf16.vlgmr.msra.gmra.mrb[20].mxu1 %v9555_v63  ;;  %v8040_v49 = vcombine.low %v3878_v9, %v3882_v13 }
 0x776   :  { %7243 = vmatmul.mubr.bf16.vlgmr.msra.gmra.mrb[24].mxu0 %v9555_v63  ;;  %7088 = vmatpush1.bf16.msra.mxu1 %v7982_v45  ;;  %v8000_v63 = vcombine.low %v3838_v5, %v3842_v25  ;;  %v8041_v45 = vcombine.high %v3878_v9, %v3882_v13  ;;  %v3893_v25 = vld [vmem:[#allocation27 + $0xa50] sm:$0xff] }
 0x777   :  { %7119 = vmatprep.mubr.bf16.mxu1 %v9624_v56  ;;  %7252 = vmatpush1.bf16.msra.mxu0 %v7984_v59  ;;  %v3886_v59 = vld [vmem:[#allocation27 + $0xa18] sm:$0xff]  ;;  %v3933_v13 = vld [vmem:[#allocation27 + $0xb90] sm:$0xff] }
 0x778   :  { %7283 = vmatprep.mubr.bf16.mxu0 %v9624_v56  ;;  %7089 = vmatprep.subr.bf16.mxu1 %v7991_v27  ;;  %v8006_v56 = vcombine.low %v3845_v37, %v3849_v41  ;;  %v3890_v27 = vld [vmem:[#allocation27 + $0xa38] sm:$0xff] }
 0x779   :  { %7253 = vmatprep.subr.bf16.mxu0 %v7993_v62  ;;  %v8047_v62 = vcombine.high %v3885_v58, %v3889_v14  ;;  %v8049_v5 = vcombine.high %v3886_v59, %v3890_v27  ;;  %v8048_v37 = vcombine.low %v3886_v59, %v3890_v27  ;;  %v3941_v27 = vld [vmem:[#allocation27 + $0xbd0] sm:$0xff] }
 0x77a   :  { %7090 = vmatpush1.bf16.msra.mxu1 %v7990_v22  ;;  %v3897_v22 = vld [vmem:[#allocation27 + $0xa70] sm:$0xff] }
 0x77b   :  { %7254 = vmatpush1.bf16.msra.mxu0 %v7992_v10  ;;  %7091 = vmatprep.subr.bf16.mxu1 %v7999_v8  ;;  %v3894_v10 = vld [vmem:[#allocation27 + $0xa58] sm:$0xff]  ;;  %v8055_v41 = vcombine.high %v3893_v25, %v3897_v22 }
 0x77c   :  { %7255 = vmatprep.subr.bf16.mxu0 %v8001_v30  ;;  %v3898_v8 = vld [vmem:[#allocation27 + $0xa78] sm:$0xff]  ;;  %v8046_v30 = vcombine.low %v3885_v58, %v3889_v14 }
 0x77d   :  { %v8057_v31 = vcombine.high %v3894_v10, %v3898_v8  ;;  %v8056_v38 = vcombine.low %v3894_v10, %v3898_v8  ;;  %v3949_v8 = vld [vmem:[#allocation27 + $0xc10] sm:$0xff] }
 0x77e   :  { %7092 = vmatpush1.bf16.msra.mxu1 %v7998_v26  ;;  %v3905_v26 = vld [vmem:[#allocation27 + $0xab0] sm:$0xff] }
 0x77f   :  { %7256 = vmatpush1.bf16.msra.mxu0 %v8000_v63  ;;  %7093 = vmatprep.subr.bf16.mxu1 %v8007_v35  ;;  %v3902_v63 = vld [vmem:[#allocation27 + $0xa98] sm:$0xff]  ;;  %v8063_v51 = vcombine.high %v3901_v33, %v3905_v26 }
 0x780   :  { %7257 = vmatprep.subr.bf16.mxu0 %v8009_v36  ;;  %v3906_v35 = vld [vmem:[#allocation27 + $0xab8] sm:$0xff]  ;;  %v8054_v36 = vcombine.low %v3893_v25, %v3897_v22 }
 0x781   :  { %v8065_v53 = vcombine.high %v3902_v63, %v3906_v35  ;;  %v8064_v6 = vcombine.low %v3902_v63, %v3906_v35  ;;  %v3957_v35 = vld [vmem:[#allocation27 + $0xc50] sm:$0xff] }
 0x782   :  { %7094 = vmatpush1.bf16.msra.mxu1 %v8006_v56  ;;  %v3913_v56 = vld [vmem:[#allocation27 + $0xaf0] sm:$0xff] }
 0x783   :  { %7258 = vmatpush1.bf16.msra.mxu0 %v8008_v15  ;;  %7095 = vmatprep.subr.bf16.mxu1 %v8015_v43  ;;  %v3910_v15 = vld [vmem:[#allocation27 + $0xad8] sm:$0xff]  ;;  %v8071_v11 = vcombine.high %v3909_v42, %v3913_v56 }
 0x784   :  { %7259 = vmatprep.subr.bf16.mxu0 %v8017_v18  ;;  %v3914_v43 = vld [vmem:[#allocation27 + $0xaf8] sm:$0xff]  ;;  %v8062_v18 = vcombine.low %v3901_v33, %v3905_v26 }
 0x785   :  { %v8073_v24 = vcombine.high %v3910_v15, %v3914_v43  ;;  %v8072_v48 = vcombine.low %v3910_v15, %v3914_v43  ;;  %v3965_v15 = vld [vmem:[#allocation27 + $0xc90] sm:$0xff] }
 0x786   :  { %7096 = vmatpush1.bf16.msra.mxu1 %v8014_v34  ;;  %v3921_v34 = vld [vmem:[#allocation27 + $0xb30] sm:$0xff] }
 0x787   :  { %7260 = vmatpush1.bf16.msra.mxu0 %v8016_v46  ;;  %7097 = vmatprep.subr.bf16.mxu1 %v8023_v44  ;;  %v3918_v46 = vld [vmem:[#allocation27 + $0xb18] sm:$0xff]  ;;  %v8079_v50 = vcombine.high %v3917_v12, %v3921_v34  ;;  %v3969_v43 = vld [vmem:[#allocation27 + $0xcb0] sm:$0xff] }
 0x788   :  { %7261 = vmatprep.subr.bf16.mxu0 %v8025_v47  ;;  %v3922_v44 = vld [vmem:[#allocation27 + $0xb38] sm:$0xff]  ;;  %v8070_v47 = vcombine.low %v3909_v42, %v3913_v56 }
 0x789   :  { %v8081_v60 = vcombine.high %v3918_v46, %v3922_v44  ;;  %v8080_v39 = vcombine.low %v3918_v46, %v3922_v44  ;;  %v3973_v44 = vld [vmem:[#allocation27 + $0xcd0] sm:$0xff] }
 0x78a   :  { %7098 = vmatpush1.bf16.msra.mxu1 %v8022_v1  ;;  %v3929_v1 = vld [vmem:[#allocation27 + $0xb70] sm:$0xff] }
 0x78b   :  { %7262 = vmatpush1.bf16.msra.mxu0 %v8024_v61  ;;  %7099 = vmatprep.subr.bf16.mxu1 %v8031_v0  ;;  %v3926_v61 = vld [vmem:[#allocation27 + $0xb58] sm:$0xff]  ;;  %v8087_v55 = vcombine.high %v3925_v54, %v3929_v1 }
 0x78c   :  { %7263 = vmatprep.subr.bf16.mxu0 %v8033_v52  ;;  %v3930_v0 = vld [vmem:[#allocation27 + $0xb78] sm:$0xff]  ;;  %v8078_v52 = vcombine.low %v3917_v12, %v3921_v34  ;;  %v8127_v34 = vcombine.high %v3965_v15, %v3969_v43 }
 0x78d   :  { %v8089_v9 = vcombine.high %v3926_v61, %v3930_v0  ;;  %v8088_v58 = vcombine.low %v3926_v61, %v3930_v0  ;;  %v3981_v61 = vld [vmem:[#allocation27 + $0xd10] sm:$0xff] }
 0x78e   :  { %7100 = vmatpush1.bf16.msra.mxu1 %v8030_v57  ;;  %v3937_v57 = vld [vmem:[#allocation27 + $0xbb0] sm:$0xff] }
 0x78f   :  { %7264 = vmatpush1.bf16.msra.mxu0 %v8032_v32  ;;  %7101 = vmatprep.subr.bf16.mxu1 %v8039_v4  ;;  %v3934_v32 = vld [vmem:[#allocation27 + $0xb98] sm:$0xff]  ;;  %v8095_v14 = vcombine.high %v3933_v13, %v3937_v57  ;;  %v3985_v0 = vld [vmem:[#allocation27 + $0xd30] sm:$0xff] }
 0x790   :  { %7265 = vmatprep.subr.bf16.mxu0 %v8041_v45  ;;  %v3938_v4 = vld [vmem:[#allocation27 + $0xbb8] sm:$0xff]  ;;  %v8086_v45 = vcombine.low %v3925_v54, %v3929_v1 }
 0x791   :  { %v8097_v59 = vcombine.high %v3934_v32, %v3938_v4  ;;  %v8096_v25 = vcombine.low %v3934_v32, %v3938_v4  ;;  %v3993_v32 = vld [vmem:[#allocation27 + $0xd70] sm:$0xff]  ;;  %v3990_v4 = vld [vmem:[#allocation27 + $0xd58] sm:$0xff] }
 0x792   :  { %7102 = vmatpush1.bf16.msra.mxu1 %v8038_v28  ;;  %v3945_v28 = vld [vmem:[#allocation27 + $0xbf0] sm:$0xff] }
 0x793   :  { %7266 = vmatpush1.bf16.msra.mxu0 %v8040_v49  ;;  %7103 = vmatprep.subr.bf16.mxu1 %v8047_v62  ;;  %v3942_v49 = vld [vmem:[#allocation27 + $0xbd8] sm:$0xff]  ;;  %v8103_v22 = vcombine.high %v3941_v27, %v3945_v28 }
 0x794   :  { %7267 = vmatprep.subr.bf16.mxu0 %v8049_v5  ;;  %v3946_v62 = vld [vmem:[#allocation27 + $0xbf8] sm:$0xff]  ;;  %v8094_v5 = vcombine.low %v3933_v13, %v3937_v57  ;;  %v3989_v57 = vld [vmem:[#allocation27 + $0xd50] sm:$0xff] }
 0x795   :  { %v8105_v10 = vcombine.high %v3942_v49, %v3946_v62  ;;  %v8104_v33 = vcombine.low %v3942_v49, %v3946_v62  ;;  %v3997_v49 = vld [vmem:[#allocation27 + $0xd90] sm:$0xff] }
 0x796   :  { %7104 = vmatpush1.bf16.msra.mxu1 %v8046_v30  ;;  %v3953_v30 = vld [vmem:[#allocation27 + $0xc30] sm:$0xff] }
 0x797   :  { %7268 = vmatpush1.bf16.msra.mxu0 %v8048_v37  ;;  %7105 = vmatprep.subr.bf16.mxu1 %v8055_v41  ;;  %v3950_v37 = vld [vmem:[#allocation27 + $0xc18] sm:$0xff]  ;;  %v8111_v26 = vcombine.high %v3949_v8, %v3953_v30  ;;  %v4001_v62 = vld [vmem:[#allocation27 + $0xdb0] sm:$0xff] }
 0x798   :  { %7269 = vmatprep.subr.bf16.mxu0 %v8057_v31  ;;  %v3954_v41 = vld [vmem:[#allocation27 + $0xc38] sm:$0xff]  ;;  %v8102_v31 = vcombine.low %v3941_v27, %v3945_v28  ;;  %v8151_v27 = vcombine.high %v3989_v57, %v3993_v32 }
 0x799   :  { %v8113_v63 = vcombine.high %v3950_v37, %v3954_v41  ;;  %v8112_v42 = vcombine.low %v3950_v37, %v3954_v41  ;;  %v8150_v37 = vcombine.low %v3989_v57, %v3993_v32  ;;  %v4030_v32 = vld [vmem:[#allocation27 + $0xe98] sm:$0xff] }
 0x79a   :  { %7106 = vmatpush1.bf16.msra.mxu1 %v8054_v36  ;;  %v3961_v36 = vld [vmem:[#allocation27 + $0xc70] sm:$0xff] }
 0x79b   :  { %7270 = vmatpush1.bf16.msra.mxu0 %v8056_v38  ;;  %7107 = vmatprep.subr.bf16.mxu1 %v8063_v51  ;;  %v8110_v38 = vcombine.low %v3949_v8, %v3953_v30  ;;  %v3958_v51 = vld [vmem:[#allocation27 + $0xc58] sm:$0xff]  ;;  %v8119_v56 = vcombine.high %v3957_v35, %v3961_v36 }
 0x79c   :  { %7271 = vmatprep.subr.bf16.mxu0 %v8065_v53  ;;  %v3962_v53 = vld [vmem:[#allocation27 + $0xc78] sm:$0xff] }
 0x79d   :  { %v8120_v12 = vcombine.low %v3958_v51, %v3962_v53 }
 0x79e   :  { %7108 = vmatpush1.bf16.msra.mxu1 %v8062_v18  ;;  %v8121_v18 = vcombine.high %v3958_v51, %v3962_v53  ;;  %v4006_v53 = vld [vmem:[#allocation27 + $0xdd8] sm:$0xff] }
 0x79f   :  { %7272 = vmatpush1.bf16.msra.mxu0 %v8064_v6  ;;  %7109 = vmatprep.subr.bf16.mxu1 %v8071_v11  ;;  %v3966_v6 = vld [vmem:[#allocation27 + $0xc98] sm:$0xff] }
 0x7a0   :  { %7273 = vmatprep.subr.bf16.mxu0 %v8073_v24  ;;  %v3970_v11 = vld [vmem:[#allocation27 + $0xcb8] sm:$0xff]  ;;  %v8118_v24 = vcombine.low %v3957_v35, %v3961_v36 }
 0x7a1   :  { %v8129_v46 = vcombine.high %v3966_v6, %v3970_v11 }
 0x7a2   :  { %7110 = vmatpush1.bf16.msra.mxu1 %v8070_v47  ;;  %v3977_v47 = vld [vmem:[#allocation27 + $0xcf0] sm:$0xff] }
 0x7a3   :  { %7274 = vmatpush1.bf16.msra.mxu0 %v8072_v48  ;;  %7111 = vmatprep.subr.bf16.mxu1 %v8079_v50  ;;  %v3974_v48 = vld [vmem:[#allocation27 + $0xcd8] sm:$0xff]  ;;  %v8135_v54 = vcombine.high %v3973_v44, %v3977_v47 }
 0x7a4   :  { %7275 = vmatprep.subr.bf16.mxu0 %v8081_v60  ;;  %v3978_v50 = vld [vmem:[#allocation27 + $0xcf8] sm:$0xff]  ;;  %v8126_v60 = vcombine.low %v3965_v15, %v3969_v43  ;;  %v8158_v43 = vcombine.low %v3997_v49, %v4001_v62 }
 0x7a5   :  { %v8137_v1 = vcombine.high %v3974_v48, %v3978_v50 }
 0x7a6   :  { %7112 = vmatpush1.bf16.msra.mxu1 %v8078_v52  ;;  %v3982_v52 = vld [vmem:[#allocation27 + $0xd18] sm:$0xff] }
 0x7a7   :  { %7276 = vmatpush1.bf16.msra.mxu0 %v8080_v39  ;;  %7113 = vmatprep.subr.bf16.mxu1 %v8087_v55  ;;  %v3986_v39 = vld [vmem:[#allocation27 + $0xd38] sm:$0xff]  ;;  %v8136_v55 = vcombine.low %v3974_v48, %v3978_v50 }
 0x7a8   :  { %7277 = vmatprep.subr.bf16.mxu0 %v8089_v9  ;;  %v8143_v9 = vcombine.high %v3981_v61, %v3985_v0  ;;  %v8145_v13 = vcombine.high %v3982_v52, %v3986_v39 }
 0x7aa   :  { %7114 = vmatpush1.bf16.msra.mxu1 %v8086_v45  ;;  %v3994_v45 = vld [vmem:[#allocation27 + $0xd78] sm:$0xff] }
 0x7ab   :  { %7278 = vmatpush1.bf16.msra.mxu0 %v8088_v58  ;;  %7115 = vmatprep.subr.bf16.mxu1 %v8095_v14  ;;  %v8142_v58 = vcombine.low %v3981_v61, %v3985_v0  ;;  %v9657_v14 = vld [vmem:[#allocation28] sm:$0xff]  ;;  %v8153_v28 = vcombine.high %v3990_v4, %v3994_v45  ;;  %v8152_v41 = vcombine.low %v3990_v4, %v3994_v45  ;;  %v4022_v61 = vld [vmem:[#allocation27 + $0xe58] sm:$0xff] }
 0x7ac   :  { %7279 = vmatprep.subr.bf16.mxu0 %v8097_v59  ;;  %v8144_v59 = vcombine.low %v3982_v52, %v3986_v39  ;;  %v4084_v8 = vrot.slane %v9657_v14, %v9394_v3  ;;  %v4092_v30 = vrot.slane %v9657_v14, %v9428_v19  ;;  %v4010_v3 = vld [vmem:[#allocation27 + $0xdf8] sm:$0xff] }
 0x7ad   :  { %v8168_v50 = vcombine.low %v4006_v53, %v4010_v3  ;;  %v4026_v0 = vld [vmem:[#allocation27 + $0xe78] sm:$0xff] }
 0x7ae   :  { %7116 = vmatpush1.bf16.msra.mxu1 %v8094_v5  ;;  %v4080_v5 = vrot.slane %v9657_v14, %v9391_v2  ;;  %v4034_v4 = vld [vmem:[#allocation27 + $0xeb8] sm:$0xff] }
 0x7af   :  { %7280 = vmatpush1.bf16.msra.mxu0 %v8096_v25  ;;  %7117 = vmatprep.subr.bf16.mxu1 %v8103_v22  ;;  %v4088_v25 = vrot.slane %v9657_v14, %v9425_v17  ;;  %v3998_v22 = vld [vmem:[#allocation27 + $0xd98] sm:$0xff]  ;;  %v4009_v17 = vld [vmem:[#allocation27 + $0xdf0] sm:$0xff] }
 0x7b0   :  { %7281 = vmatprep.subr.bf16.mxu0 %v8105_v10  ;;  %v4002_v10 = vld [vmem:[#allocation27 + $0xdb8] sm:$0xff] }
 0x7b1   :  { %v8161_v2 = vcombine.high %v3998_v22, %v4002_v10 }
 0x7b2   :  { %7118 = vmatpush1.bf16.msra.mxu1 %v8102_v31  ;;  %v8159_v31 = vcombine.high %v3997_v49, %v4001_v62  ;;  %v8193_v62 = vcombine.high %v4030_v32, %v4034_v4 }
 0x7b3   :  { %7282 = vmatpush1.bf16.msra.mxu0 %v8104_v33  ;;  %7128 = vmatprep.subr.bf16.mxu1 %v8111_v26 }
 0x7b4   :  { %7292 = vmatprep.subr.bf16.mxu0 %v8113_v63  ;;  %v4005_v63 = vld [vmem:[#allocation27 + $0xdd0] sm:$0xff] }
 0x7b5   :  { %7120 = vmatmul.mubr.bf16.vlgmr.msra.gmra.mrb[20].mxu1 %v9626_v20  ;;  %v8166_v48 = vcombine.low %v4005_v63, %v4009_v17 }
 0x7b6   :  { %7284 = vmatmul.mubr.bf16.vlgmr.msra.gmra.mrb[24].mxu0 %v9626_v20  ;;  %7129 = vmatpush1.bf16.msra.mxu1 %v8110_v38  ;;  %v8128_v20 = vcombine.low %v3966_v6, %v3970_v11  ;;  %v8160_v11 = vcombine.low %v3998_v22, %v4002_v10  ;;  %v4038_v22 = vld [vmem:[#allocation27 + $0xed8] sm:$0xff] }
 0x7b7   :  { %7160 = vmatprep.mubr.bf16.mxu1 %v9632_v23  ;;  %7293 = vmatpush1.bf16.msra.mxu0 %v8112_v42  ;;  %v4042_v10 = vld [vmem:[#allocation27 + $0xef8] sm:$0xff] }
 0x7b8   :  { %7324 = vmatprep.mubr.bf16.mxu0 %v9632_v23  ;;  %7130 = vmatprep.subr.bf16.mxu1 %v8119_v56  ;;  %v8134_v23 = vcombine.low %v3973_v44, %v3977_v47  ;;  %v4014_v44 = vld [vmem:[#allocation27 + $0xe18] sm:$0xff] }
 0x7b9   :  { %7294 = vmatprep.subr.bf16.mxu0 %v8121_v18  ;;  %v4018_v47 = vld [vmem:[#allocation27 + $0xe38] sm:$0xff] }
 0x7ba   :  { %7131 = vmatpush1.bf16.msra.mxu1 %v8118_v24  ;;  %v8167_v24 = vcombine.high %v4005_v63, %v4009_v17  ;;  %v8176_v39 = vcombine.low %v4014_v44, %v4018_v47  ;;  %v8200_v17 = vcombine.low %v4038_v22, %v4042_v10 }
 0x7bb   :  { %7295 = vmatpush1.bf16.msra.mxu0 %v8120_v12  ;;  %7132 = vmatprep.subr.bf16.mxu1 %v8127_v34  ;;  %v8169_v12 = vcombine.high %v4006_v53, %v4010_v3  ;;  %v4013_v34 = vld [vmem:[#allocation27 + $0xe10] sm:$0xff]  ;;  %v4054_v53 = vld [vmem:[#allocation27 + $0xf58] sm:$0xff] }
 0x7bc   :  { %7296 = vmatprep.subr.bf16.mxu0 %v8129_v46  ;;  %v4017_v46 = vld [vmem:[#allocation27 + $0xe30] sm:$0xff]  ;;  %v4058_v3 = vld [vmem:[#allocation27 + $0xf78] sm:$0xff] }
 0x7bd   :  { %v8174_v52 = vcombine.low %v4013_v34, %v4017_v46 }
 0x7be   :  { %7133 = vmatpush1.bf16.msra.mxu1 %v8126_v60  ;;  %v8175_v60 = vcombine.high %v4013_v34, %v4017_v46 }
 0x7bf   :  { %7297 = vmatpush1.bf16.msra.mxu0 %v8128_v20  ;;  %7134 = vmatprep.subr.bf16.mxu1 %v8135_v54  ;;  %v8177_v20 = vcombine.high %v4014_v44, %v4018_v47  ;;  %v4021_v54 = vld [vmem:[#allocation27 + $0xe50] sm:$0xff] }
 0x7c0   :  { %7298 = vmatprep.subr.bf16.mxu0 %v8137_v1  ;;  %v4025_v1 = vld [vmem:[#allocation27 + $0xe70] sm:$0xff] }
 0x7c1   :  { %v4069_v44 = vld [vmem:[#allocation27 + $0xfd0] sm:$0xff] }
 0x7c2   :  { %7135 = vmatpush1.bf16.msra.mxu1 %v8134_v23  ;;  %v8183_v23 = vcombine.high %v4021_v54, %v4025_v1  ;;  %v4073_v47 = vld [vmem:[#allocation27 + $0xff0] sm:$0xff] }
 0x7c3   :  { %7299 = vmatpush1.bf16.msra.mxu0 %v8136_v55  ;;  %7136 = vmatprep.subr.bf16.mxu1 %v8143_v9  ;;  %v8185_v55 = vcombine.high %v4022_v61, %v4026_v0  ;;  %v4029_v9 = vld [vmem:[#allocation27 + $0xe90] sm:$0xff] }
 0x7c4   :  { %7300 = vmatprep.subr.bf16.mxu0 %v8145_v13  ;;  %v4033_v13 = vld [vmem:[#allocation27 + $0xeb0] sm:$0xff] }
 0x7c6   :  { %7137 = vmatpush1.bf16.msra.mxu1 %v8142_v58  ;;  %v8182_v58 = vcombine.low %v4021_v54, %v4025_v1  ;;  %v8231_v54 = vcombine.high %v4069_v44, %v4073_v47 }
 0x7c7   :  { %7301 = vmatpush1.bf16.msra.mxu0 %v8144_v59  ;;  %7138 = vmatprep.subr.bf16.mxu1 %v8151_v27  ;;  %v8184_v27 = vcombine.low %v4022_v61, %v4026_v0  ;;  %v8230_v61 = vcombine.low %v4069_v44, %v4073_v47 }
 0x7c8   :  { %v6834_v33 = vpop.f32.mrb[16].mxu1  ;;  %v6998_v26 = vpop.f32.mrb[20].mxu0  ;;  %7302 = vmatprep.subr.bf16.mxu0 %v8153_v28  ;;  %v8191_v28 = vcombine.high %v4029_v9, %v4033_v13 }
 0x7c9   :  { %v8300_v35 = vadd.f32 %v6834_v33, %v4080_v5  ;;  %v8302_v36 = vadd.f32 %v6998_v26, %v4088_v25  ;;  %v6836_v38 = vpop.f32.mrb[17].mxu1  ;;  %v7000_v51 = vpop.f32.mrb[21].mxu0  ;;  %v4037_v5 = vld [vmem:[#allocation27 + $0xed0] sm:$0xff]  ;;  %v4046_v26 = vld [vmem:[#allocation27 + $0xf18] sm:$0xff] }
 0x7ca   :  { %v8301_v42 = vadd.f32 %v6836_v38, %v4084_v8  ;;  %v8303_v56 = vadd.f32 %v7000_v51, %v4092_v30  ;;  %v6838_v19 = vpop.f32.mrb[18].mxu1  ;;  %v7002_v15 = vpop.f32.mrb[22].mxu0  ;;  %7139 = vmatpush1.bf16.msra.mxu1 %v8150_v37  ;;  %v4041_v25 = vld [vmem:[#allocation27 + $0xef0] sm:$0xff]  ;;  %v8190_v8 = vcombine.low %v4029_v9, %v4033_v13  ;;  %v8192_v30 = vcombine.low %v4030_v32, %v4034_v4 }
 0x7cb   :  { %8567 = vtanh.f32 %v8300_v35  ;;  %7303 = vmatpush1.bf16.msra.mxu0 %v8152_v41  ;;  %v6839_v18 = vpop.f32.mrb[19].mxu1  ;;  %v7003_v6 = vpop.f32.mrb[23].mxu0  ;;  %7140 = vmatprep.subr.bf16.mxu1 %v8159_v31  ;;  %v8199_v37 = vcombine.high %v4037_v5, %v4041_v25  ;;  %v8201_v41 = vcombine.high %v4038_v22, %v4042_v10  ;;  %v4045_v31 = vld [vmem:[#allocation27 + $0xf10] sm:$0xff]  ;;  %v8198_v63 = vcombine.low %v4037_v5, %v4041_v25 }
 0x7cc   :  { %8569 = vtanh.f32 %v8302_v36  ;;  %7304 = vmatprep.subr.bf16.mxu0 %v8161_v2  ;;  %v4049_v33 = vld [vmem:[#allocation27 + $0xf30] sm:$0xff]  ;;  %v4050_v2 = vld [vmem:[#allocation27 + $0xf38] sm:$0xff]  ;;  %v8217_v15 = vcombine.high %v4054_v53, %v4058_v3 }
 0x7cd   :  { %8571 = vtanh.f32 %v8301_v42  ;;  %v8207_v35 = vcombine.high %v4045_v31, %v4049_v33  ;;  %v8209_v36 = vcombine.high %v4046_v26, %v4050_v2  ;;  %v4053_v38 = vld [vmem:[#allocation27 + $0xf50] sm:$0xff]  ;;  %v8206_v42 = vcombine.low %v4045_v31, %v4049_v33  ;;  %v4062_v6 = vld [vmem:[#allocation27 + $0xf98] sm:$0xff] }
 0x7ce   :  { %8573 = vtanh.f32 %v8303_v56  ;;  %7141 = vmatpush1.bf16.msra.mxu1 %v8158_v43  ;;  %v4057_v51 = vld [vmem:[#allocation27 + $0xf70] sm:$0xff]  ;;  %v8208_v56 = vcombine.low %v4046_v26, %v4050_v2 }
 0x7cf   :  { %7305 = vmatpush1.bf16.msra.mxu0 %v8160_v11  ;;  %7142 = vmatprep.subr.bf16.mxu1 %v8167_v24  ;;  %v8215_v19 = vcombine.high %v4053_v38, %v4057_v51  ;;  %v4061_v43 = vld [vmem:[#allocation27 + $0xf90] sm:$0xff]  ;;  %v4066_v11 = vld [vmem:[#allocation27 + $0xfb8] sm:$0xff]  ;;  %v8214_v24 = vcombine.low %v4053_v38, %v4057_v51 }
 0x7d0   :  { %7306 = vmatprep.subr.bf16.mxu0 %v8169_v12  ;;  %v4065_v18 = vld [vmem:[#allocation27 + $0xfb0] sm:$0xff]  ;;  %v8216_v12 = vcombine.low %v4054_v53, %v4058_v3  ;;  %v8225_v46 = vcombine.high %v4062_v6, %v4066_v11 }
 0x7d1   :  { %v8223_v34 = vcombine.high %v4061_v43, %v4065_v18 }
 0x7d2   :  { %7143 = vmatpush1.bf16.msra.mxu1 %v8166_v48  ;;  %v4070_v48 = vld [vmem:[#allocation27 + $0xfd8] sm:$0xff] }
 0x7d3   :  { %7307 = vmatpush1.bf16.msra.mxu0 %v8168_v50  ;;  %7144 = vmatprep.subr.bf16.mxu1 %v8175_v60  ;;  %v4074_v50 = vld [vmem:[#allocation27 + $0xff8] sm:$0xff]  ;;  %v8222_v60 = vcombine.low %v4061_v43, %v4065_v18 }
 0x7d4   :  { %7308 = vmatprep.subr.bf16.mxu0 %v8177_v20  ;;  %v8224_v20 = vcombine.low %v4062_v6, %v4066_v11  ;;  %v8233_v1 = vcombine.high %v4070_v48, %v4074_v50  ;;  %v8232_v0 = vcombine.low %v4070_v48, %v4074_v50 }
 0x7d5   :  { %v8568_v57 = vpop.eup %8567 }
 0x7d6   :  { %v8570_v45 = vpop.eup %8569  ;;  %7341 = vst [vmem:[%s9739_s13] sm:$0xff] %v8568_v57  ;;  %7145 = vmatpush1.bf16.msra.mxu1 %v8174_v52  ;;  %v4096_v52 = vrot.slane %v9657_v14, %v9547_v21 }
 0x7d7   :  { %v8572_v59 = vpop.eup %8571  ;;  %7343 = vst [vmem:[%s9739_s13 + $0x10] sm:$0xff] %v8570_v45  ;;  %7309 = vmatpush1.bf16.msra.mxu0 %v8176_v39  ;;  %7146 = vmatprep.subr.bf16.mxu1 %v8183_v23  ;;  %v4104_v39 = vrot.slane %v9657_v14, %v9580_v40  ;;  %v4100_v23 = vrot.slane %v9657_v14, %v9550_v29 }
 0x7d8   :  { %v8574_v49 = vpop.eup %8573  ;;  %7342 = vst [vmem:[%s9739_s13 + $0x8] sm:$0xff] %v8572_v59  ;;  %7310 = vmatprep.subr.bf16.mxu0 %v8185_v55  ;;  %v4108_v55 = vrot.slane %v9657_v14, %v9553_v7 }
 0x7d9   :  { %7344 = vst [vmem:[%s9739_s13 + $0x18] sm:$0xff] %v8574_v49 }
 0x7da   :  { %7147 = vmatpush1.bf16.msra.mxu1 %v8182_v58 }
 0x7db   :  { %7311 = vmatpush1.bf16.msra.mxu0 %v8184_v27  ;;  %7148 = vmatprep.subr.bf16.mxu1 %v8191_v28 }
 0x7dc   :  { %7312 = vmatprep.subr.bf16.mxu0 %v8193_v62 }
 0x7de   :  { %7149 = vmatpush1.bf16.msra.mxu1 %v8190_v8 }
 0x7df   :  { %7313 = vmatpush1.bf16.msra.mxu0 %v8192_v30  ;;  %7150 = vmatprep.subr.bf16.mxu1 %v8199_v37 }
 0x7e0   :  { %7314 = vmatprep.subr.bf16.mxu0 %v8201_v41 }
 0x7e2   :  { %7151 = vmatpush1.bf16.msra.mxu1 %v8198_v63 }
 0x7e3   :  { %7315 = vmatpush1.bf16.msra.mxu0 %v8200_v17  ;;  %7152 = vmatprep.subr.bf16.mxu1 %v8207_v35 }
 0x7e4   :  { %7316 = vmatprep.subr.bf16.mxu0 %v8209_v36 }
 0x7e6   :  { %7153 = vmatpush1.bf16.msra.mxu1 %v8206_v42 }
 0x7e7   :  { %7317 = vmatpush1.bf16.msra.mxu0 %v8208_v56  ;;  %7154 = vmatprep.subr.bf16.mxu1 %v8215_v19 }
 0x7e8   :  { %7318 = vmatprep.subr.bf16.mxu0 %v8217_v15 }
 0x7ea   :  { %7155 = vmatpush1.bf16.msra.mxu1 %v8214_v24 }
 0x7eb   :  { %7319 = vmatpush1.bf16.msra.mxu0 %v8216_v12  ;;  %7156 = vmatprep.subr.bf16.mxu1 %v8223_v34 }
 0x7ec   :  { %7320 = vmatprep.subr.bf16.mxu0 %v8225_v46 }
 0x7ee   :  { %7157 = vmatpush1.bf16.msra.mxu1 %v8222_v60 }
 0x7ef   :  { %7321 = vmatpush1.bf16.msra.mxu0 %v8224_v20  ;;  %7158 = vmatprep.subr.bf16.mxu1 %v8231_v54 }
 0x7f0   :  { %7322 = vmatprep.subr.bf16.mxu0 %v8233_v1 }
 0x7f2   :  { %7159 = vmatpush1.bf16.msra.mxu1 %v8230_v61 }
 0x7f3   :  { %7323 = vmatpush1.bf16.msra.mxu0 %v8232_v0 }
 0x7f5   :  { %7161 = vmatmul.mubr.bf16.vlgmr.msra.gmra.mrb[20].mxu1 %v9639_v16 }
 0x7f6   :  { %7325 = vmatmul.mubr.bf16.vlgmr.msra.gmra.mrb[24].mxu0 %v9639_v16 }
 0x8c8   :  { %v7162_v9 = vpop.f32.mrb[20].mxu1 }
 0x8c9   :  { %v8304_v13 = vadd.f32 %v7162_v9, %v4096_v52  ;;  %v7326_v57 = vpop.f32.mrb[24].mxu0  ;;  %v7164_v32 = vpop.f32.mrb[21].mxu1 }
 0x8ca   :  { %v8306_v4 = vadd.f32 %v7326_v57, %v4104_v39  ;;  %v8305_v45 = vadd.f32 %v7164_v32, %v4100_v23  ;;  %v7328_v58 = vpop.f32.mrb[25].mxu0  ;;  %v7166_v16 = vpop.f32.mrb[22].mxu1 }
 0x8cb   :  { %8575 = vtanh.f32 %v8304_v13  ;;  %v8307_v59 = vadd.f32 %v7328_v58, %v4108_v55  ;;  %v7330_v21 = vpop.f32.mrb[26].mxu0  ;;  %v7167_v27 = vpop.f32.mrb[23].mxu1 }
 0x8cc   :  { %8577 = vtanh.f32 %v8306_v4  ;;  %v7331_v40 = vpop.f32.mrb[27].mxu0 }
 0x8cd   :  { %8579 = vtanh.f32 %v8305_v45 }
 0x8ce   :  { %8581 = vtanh.f32 %v8307_v59 }
 0x8d5   :  { %v8576_v29 = vpop.eup %8575 }
 0x8d6   :  { %v8578_v28 = vpop.eup %8577  ;;  %7345 = vst [vmem:[%s9739_s13 + $0x20] sm:$0xff] %v8576_v29 }
 0x8d7   :  { %v8580_v7 = vpop.eup %8579  ;;  %7347 = vst [vmem:[%s9739_s13 + $0x30] sm:$0xff] %v8578_v28 }
 0x8d8   :  { %v8582_v14 = vpop.eup %8581  ;;  %7346 = vst [vmem:[%s9739_s13 + $0x28] sm:$0xff] %v8580_v7 }
 0x8d9   :  { %7348 = vst [vmem:[%s9739_s13 + $0x38] sm:$0xff] %v8582_v14 }
 0x8da   :  { %7353 = vsyncpa [#allocation3], 1 }
 0x8db   :  { %7354 = vsyncpa [#allocation5], 1 }
 0x8dc   :  { %7355 = vsyncpa [#allocation8], 1 }
 0x8dd   :  { %7356 = vsyncpa [#allocation11], 1 }
 0x8de   :  { %7357 = vsyncpa [#allocation14], 1 }
 0x8df   :  { %7358 = vsyncpa [#allocation17], 1 }
 0x8e0   :  { %7359 = vsyncpa [#allocation20], 1 }
 0x8e1   :  { %7360 = vsyncpa [#allocation23], 1 }
 0x8e2   :  { %7361 = vsyncpa [#allocation26], 1 }
 0x8e3   :  { %7362 = vsyncpa [#allocation29], 1 }

</bundles_post_ra>
